<compile_context>
chip_gen: v7x
topology: tpu7x:2x2x1
jax: 0.10.0
libtpu: 0.0.40
codegen_flags: <defaults>
</compile_context>

<pallas_src>
import functools
import math

import jax
import jax.numpy as jnp
import numpy as np
from jax.experimental import pallas as pl
from jax.experimental.pallas import tpu as pltpu

VGG_CFG = (8, 8, 'M', 16, 'M')    # small truncated VGG-style feature extractor


# ---------------------------------------------------------------------------
# Fused kernel: entire features stack for a sub-batch of images per grid step.
# ---------------------------------------------------------------------------
def _fused_vgg_kernel(*refs, layer_meta, nb):
    # refs layout:
    #   refs[0]                      x_ref   (nb, H0, W0, C0)  f32
    #   refs[1 + 2*l], refs[2 + 2*l] w_l (9*cin_l, cout_l) bf16 ; b_l (1, cout_l) f32
    #   refs[1 + 2*L]                o_ref   (nb, Hf, Wf, Cf)  f32
    #   refs[2 + 2*L:]               xp_l    (nb, H_l+2, W_l+2, cin_l) f32 scratch
    n_layers = len(layer_meta)
    x_ref = refs[0]
    o_ref = refs[1 + 2 * n_layers]
    xp_refs = refs[2 + 2 * n_layers:]

    a = x_ref[...]                                        # (nb, H0, W0, C0) f32

    for li, (H, W, cin, cout, pool) in enumerate(layer_meta):
        w_ref = refs[1 + 2 * li]                          # (9*cin, cout) bf16
        b_ref = refs[2 + 2 * li]                          # (1, cout)     f32
        xp = xp_refs[li]                                  # (nb, H+2, W+2, cin)

        # ---- zero only the 1-px halo border; interior is overwritten below.
        #      Done every step (scratch is per-core under a "parallel" grid).
        zrow = jnp.zeros((nb, 1, W + 2, cin), jnp.float32)
        zcol = jnp.zeros((nb, H + 2, 1, cin), jnp.float32)
        xp[:, 0:1, :, :] = zrow
        xp[:, H + 1:H + 2, :, :] = zrow
        xp[:, :, 0:1, :] = zcol
        xp[:, :, W + 1:W + 2, :] = zcol

        # ---- write the interior, then build im2col as ONE concatenated value
        #      (tap order (kh, kw, cin) matches w.reshape(9*cin, cout) of HWIO).
        xp[:, 1:H + 1, 1:W + 1, :] = a
        cols = jnp.concatenate(
            [xp[:, kh:kh + H, kw:kw + W, :]
             for kh in range(3) for kw in range(3)],
            axis=-1)                                      # (nb, H, W, 9*cin)
        cols2 = cols.reshape(nb * H * W, 9 * cin).astype(jnp.bfloat16)

        # ---- one MXU matmul per layer (bf16 operands, f32 accumulate),
        #      then bias + ReLU in f32.
        y = jnp.dot(cols2, w_ref[...], preferred_element_type=jnp.float32)
        y = jnp.maximum(y + b_ref[...], 0.0)
        a = y.reshape(nb, H, W, cout)

        if pool:
            # 2x2 / stride-2 max-pool, exact, value-level.  All reshapes keep
            # the channel (lane) dimension unchanged.
            Ho, Wo = H // 2, W // 2
            a5 = a.reshape(nb, H, Wo, 2, cout)
            a = jnp.maximum(a5[:, :, :, 0:1, :],
                            a5[:, :, :, 1:2, :]).reshape(nb, H, Wo, cout)
            a6 = a.reshape(nb, Ho, 2, Wo, cout)
            a = jnp.maximum(a6[:, :, 0:1, :, :],
                            a6[:, :, 1:2, :, :]).reshape(nb, Ho, Wo, cout)

    o_ref[...] = a


# ---------------------------------------------------------------------------
# Truncated-VGG "features" stack.
# ---------------------------------------------------------------------------
def _parse_cfg(cfg):
    """-> list of (cout, pool_after).  Each 'M' must directly follow a conv."""
    layers, i = [], 0
    cfg = tuple(cfg)
    while i < len(cfg):
        v = cfg[i]
        if v == 'M':
            # TODO(synk): a standalone / consecutive 'M' would need its own pool
            # stage; VGG-style cfgs always place 'M' right after a conv.
            raise NotImplementedError("'M' must directly follow a conv layer")
        pool = (i + 1 < len(cfg)) and (cfg[i + 1] == 'M')
        layers.append((int(v), pool))
        i += 2 if pool else 1
    return layers


def init_truncated_vgg_params(key, in_channels, cfg=VGG_CFG):
    """Deterministic init matching truncated_VGG._initialize_weights."""
    params, cin = [], in_channels
    for v in cfg:
        if v == 'M':
            continue
        cout = int(v)
        key, wk = jax.random.split(key)
        std = math.sqrt(2.0 / (3 * 3 * cout))
        w = jax.random.normal(wk, (3, 3, cin, cout), jnp.float32) * std  # HWIO
        b = jnp.zeros((cout,), jnp.float32)
        params.append((w, b))
        cin = cout
    return params


def truncated_vgg_forward(x_nchw, params, cfg=VGG_CFG):
    """Accept NCHW (PyTorch), run the fused NHWC kernel, return NCHW."""
    x = jnp.transpose(x_nchw, (0, 2, 3, 1)).astype(jnp.float32)
    N, H0, W0, C0 = x.shape
    layers = _parse_cfg(cfg)
    assert len(layers) == len(params)

    # ---- per-layer operands (tiny, prepared at trace time) + static metadata.
    wb_ops, layer_meta = [], []
    Hc, Wc, c = H0, W0, C0
    for (cout, pool), (w, b) in zip(layers, params):
        assert w.shape == (3, 3, c, cout) and b.shape == (cout,)
        if pool:
            assert Hc % 2 == 0 and Wc % 2 == 0
        wb_ops += [w.reshape(9 * c, cout).astype(jnp.bfloat16),
                   b.reshape(1, cout).astype(jnp.float32)]
        layer_meta.append((Hc, Wc, c, cout, pool))
        if pool:
            Hc, Wc = Hc // 2, Wc // 2
        c = cout
    Hf, Wf, Cf = Hc, Wc, c

    # Two-way batch split keeps both v7x TensorCores busy; v5e/v6e just loop.
    G = 2 if (N % 2 == 0 and N >= 2) else 1
    nb = N // G

    in_specs = [pl.BlockSpec((nb, H0, W0, C0), lambda i: (i, 0, 0, 0))]
    for _ in wb_ops:
        in_specs.append(pl.BlockSpec(wb_ops[len(in_specs) - 1].shape,
                                     lambda i: (0, 0)))       # resident weights
    out_spec = pl.BlockSpec((nb, Hf, Wf, Cf), lambda i: (i, 0, 0, 0))

    scratch_shapes = [pltpu.VMEM((nb, Hl + 2, Wl + 2, ci), jnp.float32)
                      for (Hl, Wl, ci, _, _) in layer_meta]

    flops = 2 * N * sum(Hl * Wl * 9 * ci * co
                        for (Hl, Wl, ci, co, _) in layer_meta)
    bytes_accessed = int(x.size * 4
                         + sum(op.size * op.dtype.itemsize for op in wb_ops)
                         + N * Hf * Wf * Cf * 4)

    kernel = functools.partial(_fused_vgg_kernel,
                               layer_meta=tuple(layer_meta), nb=nb)

    out = pl.pallas_call(
        kernel,
        grid=(G,),
        out_shape=jax.ShapeDtypeStruct((N, Hf, Wf, Cf), jnp.float32),
        in_specs=in_specs,
        out_specs=out_spec,
        scratch_shapes=scratch_shapes,
        compiler_params=pltpu.CompilerParams(
            dimension_semantics=("parallel",),
            vmem_limit_bytes=32 * 1024 * 1024),
        cost_estimate=pl.CostEstimate(
            flops=flops, transcendentals=0, bytes_accessed=bytes_accessed),
    )(x, *wb_ops)

    return jnp.transpose(out, (0, 3, 1, 2))


# ---------------------------------------------------------------------------
# Pure-JAX reference for a correctness sanity check.
# ---------------------------------------------------------------------------
def _reference_forward(x_nchw, params, cfg=VGG_CFG):
    x = jnp.transpose(x_nchw, (0, 2, 3, 1)).astype(jnp.float32)
    it = iter(params)
    for v in cfg:
        if v == 'M':
            x = jax.lax.reduce_window(
                x, -jnp.inf, jax.lax.max, (1, 2, 2, 1), (1, 2, 2, 1), 'VALID')
        else:
            w, b = next(it)
            x = jax.lax.conv_general_dilated(
                x, w, window_strides=(1, 1), padding=((1, 1), (1, 1)),
                dimension_numbers=('NHWC', 'HWIO', 'NHWC'))
            x = jnp.maximum(x + b.reshape(1, 1, 1, -1), 0.0)
    return jnp.transpose(x, (0, 3, 1, 2))


if __name__ == "__main__":
    key = jax.random.PRNGKey(0)
    key, xk, pk = jax.random.split(key, 3)

    # NCHW input, like PyTorch Conv2d.
    x = jax.random.normal(xk, (2, 4, 16, 16), jnp.float32)
    params = init_truncated_vgg_params(pk, in_channels=4, cfg=VGG_CFG)

    fwd = jax.jit(lambda inp: truncated_vgg_forward(inp, params))
    out = jax.block_until_ready(fwd(x))

    assert out.shape == (2, 16, 4, 4), out.shape
    ref = _reference_forward(x, params)
    # bf16 MXU operands (same effective precision as the default-precision f32
    # dot of the previous version); pooling is now exact.
    np.testing.assert_allclose(np.asarray(out), np.asarray(ref),
                               rtol=2e-2, atol=2e-2)
    print("KERNEL_OK")
</pallas_src>

<mosaic_0001>
module attributes {stable_mosaic.version = 11 : i64} {
  func.func @_fused_vgg_kernel(%arg0: i32, %arg1: memref<1x16x16x4xf32, #tpu.memory_space<vmem>>, %arg2: memref<36x8xbf16, #tpu.memory_space<vmem>>, %arg3: memref<1x8xf32, #tpu.memory_space<vmem>>, %arg4: memref<72x8xbf16, #tpu.memory_space<vmem>>, %arg5: memref<1x8xf32, #tpu.memory_space<vmem>>, %arg6: memref<72x16xbf16, #tpu.memory_space<vmem>>, %arg7: memref<1x16xf32, #tpu.memory_space<vmem>>, %arg8: memref<1x4x4x16xf32, #tpu.memory_space<vmem>>, %arg9: memref<1x18x18x4xf32, #tpu.memory_space<vmem>>, %arg10: memref<1x18x18x8xf32, #tpu.memory_space<vmem>>, %arg11: memref<1x10x10x8xf32, #tpu.memory_space<vmem>>) attributes {dimension_semantics = [#tpu.dimension_semantics<parallel>], iteration_bounds = array<i64: 2>, scalar_prefetch = 0 : i64, scratch_operands = 3 : i64, tpu.core_type = #tpu.core_type<tc>, window_params = [{transform_indices = @transform_0, window_bounds = array<i64: 1, 16, 16, 4>}, {pipeline_mode = #tpu.pipeline_mode<synchronous>, transform_indices = @transform_1, window_bounds = array<i64: 36, 8>}, {pipeline_mode = #tpu.pipeline_mode<synchronous>, transform_indices = @transform_2, window_bounds = array<i64: 1, 8>}, {pipeline_mode = #tpu.pipeline_mode<synchronous>, transform_indices = @transform_3, window_bounds = array<i64: 72, 8>}, {pipeline_mode = #tpu.pipeline_mode<synchronous>, transform_indices = @transform_4, window_bounds = array<i64: 1, 8>}, {pipeline_mode = #tpu.pipeline_mode<synchronous>, transform_indices = @transform_5, window_bounds = array<i64: 72, 16>}, {pipeline_mode = #tpu.pipeline_mode<synchronous>, transform_indices = @transform_6, window_bounds = array<i64: 1, 16>}, {transform_indices = @transform_7, window_bounds = array<i64: 1, 4, 4, 16>}]} {
    %c0 = arith.constant 0 : index
    %c0_0 = arith.constant 0 : index
    %c0_1 = arith.constant 0 : index
    %c0_2 = arith.constant 0 : index
    %0 = vector.load %arg1[%c0, %c0_0, %c0_1, %c0_2] : memref<1x16x16x4xf32, #tpu.memory_space<vmem>>, vector<1x16x16x4xf32>
    %cst = arith.constant 0.000000e+00 : f32
    %1 = vector.broadcast %cst : f32 to vector<1x1x18x4xf32>
    %cst_3 = arith.constant 0.000000e+00 : f32
    %2 = vector.broadcast %cst_3 : f32 to vector<1x18x1x4xf32>
    %c0_4 = arith.constant 0 : index
    %c0_5 = arith.constant 0 : index
    %c0_6 = arith.constant 0 : index
    %c0_7 = arith.constant 0 : index
    %3 = vector.load %arg9[%c0_4, %c0_5, %c0_6, %c0_7] : memref<1x18x18x4xf32, #tpu.memory_space<vmem>>, vector<1x1x18x4xf32>
    tpu.vector_store %arg9[%c0_4, %c0_5, %c0_6, %c0_7], %1 {strides = array<i32>} : memref<1x18x18x4xf32, #tpu.memory_space<vmem>>, vector<1x1x18x4xf32>,
    %c0_8 = arith.constant 0 : index
    %c17 = arith.constant 17 : index
    %c0_9 = arith.constant 0 : index
    %c0_10 = arith.constant 0 : index
    %4 = vector.load %arg9[%c0_8, %c17, %c0_9, %c0_10] : memref<1x18x18x4xf32, #tpu.memory_space<vmem>>, vector<1x1x18x4xf32>
    tpu.vector_store %arg9[%c0_8, %c17, %c0_9, %c0_10], %1 {strides = array<i32>} : memref<1x18x18x4xf32, #tpu.memory_space<vmem>>, vector<1x1x18x4xf32>,
    %c0_11 = arith.constant 0 : index
    %c0_12 = arith.constant 0 : index
    %c0_13 = arith.constant 0 : index
    %c0_14 = arith.constant 0 : index
    %5 = vector.load %arg9[%c0_11, %c0_12, %c0_13, %c0_14] : memref<1x18x18x4xf32, #tpu.memory_space<vmem>>, vector<1x18x1x4xf32>
    tpu.vector_store %arg9[%c0_11, %c0_12, %c0_13, %c0_14], %2 {strides = array<i32>} : memref<1x18x18x4xf32, #tpu.memory_space<vmem>>, vector<1x18x1x4xf32>,
    %c0_15 = arith.constant 0 : index
    %c0_16 = arith.constant 0 : index
    %c17_17 = arith.constant 17 : index
    %c0_18 = arith.constant 0 : index
    %6 = vector.load %arg9[%c0_15, %c0_16, %c17_17, %c0_18] : memref<1x18x18x4xf32, #tpu.memory_space<vmem>>, vector<1x18x1x4xf32>
    tpu.vector_store %arg9[%c0_15, %c0_16, %c17_17, %c0_18], %2 {strides = array<i32>} : memref<1x18x18x4xf32, #tpu.memory_space<vmem>>, vector<1x18x1x4xf32>,
    %c0_19 = arith.constant 0 : index
    %c1 = arith.constant 1 : index
    %c1_20 = arith.constant 1 : index
    %c0_21 = arith.constant 0 : index
    %7 = vector.load %arg9[%c0_19, %c1, %c1_20, %c0_21] : memref<1x18x18x4xf32, #tpu.memory_space<vmem>>, vector<1x16x16x4xf32>
    tpu.vector_store %arg9[%c0_19, %c1, %c1_20, %c0_21], %0 {strides = array<i32>} : memref<1x18x18x4xf32, #tpu.memory_space<vmem>>, vector<1x16x16x4xf32>,
    %c0_22 = arith.constant 0 : index
    %c0_23 = arith.constant 0 : index
    %c0_24 = arith.constant 0 : index
    %c0_25 = arith.constant 0 : index
    %8 = vector.load %arg9[%c0_22, %c0_23, %c0_24, %c0_25] : memref<1x18x18x4xf32, #tpu.memory_space<vmem>>, vector<1x16x16x4xf32>
    %c0_26 = arith.constant 0 : index
    %c0_27 = arith.constant 0 : index
    %c1_28 = arith.constant 1 : index
    %c0_29 = arith.constant 0 : index
    %9 = vector.load %arg9[%c0_26, %c0_27, %c1_28, %c0_29] : memref<1x18x18x4xf32, #tpu.memory_space<vmem>>, vector<1x16x16x4xf32>
    %c0_30 = arith.constant 0 : index
    %c0_31 = arith.constant 0 : index
    %c2 = arith.constant 2 : index
    %c0_32 = arith.constant 0 : index
    %10 = vector.load %arg9[%c0_30, %c0_31, %c2, %c0_32] : memref<1x18x18x4xf32, #tpu.memory_space<vmem>>, vector<1x16x16x4xf32>
    %c0_33 = arith.constant 0 : index
    %c1_34 = arith.constant 1 : index
    %c0_35 = arith.constant 0 : index
    %c0_36 = arith.constant 0 : index
    %11 = vector.load %arg9[%c0_33, %c1_34, %c0_35, %c0_36] : memref<1x18x18x4xf32, #tpu.memory_space<vmem>>, vector<1x16x16x4xf32>
    %c0_37 = arith.constant 0 : index
    %c1_38 = arith.constant 1 : index
    %c1_39 = arith.constant 1 : index
    %c0_40 = arith.constant 0 : index
    %12 = vector.load %arg9[%c0_37, %c1_38, %c1_39, %c0_40] : memref<1x18x18x4xf32, #tpu.memory_space<vmem>>, vector<1x16x16x4xf32>
    %c0_41 = arith.constant 0 : index
    %c1_42 = arith.constant 1 : index
    %c2_43 = arith.constant 2 : index
    %c0_44 = arith.constant 0 : index
    %13 = vector.load %arg9[%c0_41, %c1_42, %c2_43, %c0_44] : memref<1x18x18x4xf32, #tpu.memory_space<vmem>>, vector<1x16x16x4xf32>
    %c0_45 = arith.constant 0 : index
    %c2_46 = arith.constant 2 : index
    %c0_47 = arith.constant 0 : index
    %c0_48 = arith.constant 0 : index
    %14 = vector.load %arg9[%c0_45, %c2_46, %c0_47, %c0_48] : memref<1x18x18x4xf32, #tpu.memory_space<vmem>>, vector<1x16x16x4xf32>
    %c0_49 = arith.constant 0 : index
    %c2_50 = arith.constant 2 : index
    %c1_51 = arith.constant 1 : index
    %c0_52 = arith.constant 0 : index
    %15 = vector.load %arg9[%c0_49, %c2_50, %c1_51, %c0_52] : memref<1x18x18x4xf32, #tpu.memory_space<vmem>>, vector<1x16x16x4xf32>
    %c0_53 = arith.constant 0 : index
    %c2_54 = arith.constant 2 : index
    %c2_55 = arith.constant 2 : index
    %c0_56 = arith.constant 0 : index
    %16 = vector.load %arg9[%c0_53, %c2_54, %c2_55, %c0_56] : memref<1x18x18x4xf32, #tpu.memory_space<vmem>>, vector<1x16x16x4xf32>
    %17 = tpu.concatenate %8, %9, %10, %11, %12, %13, %14, %15, %16 in 3 : vector<1x16x16x4xf32>, vector<1x16x16x4xf32>, vector<1x16x16x4xf32>, vector<1x16x16x4xf32>, vector<1x16x16x4xf32>, vector<1x16x16x4xf32>, vector<1x16x16x4xf32>, vector<1x16x16x4xf32>, vector<1x16x16x4xf32> -> vector<1x16x16x36xf32>
    %18 = vector.shape_cast %17 : vector<1x16x16x36xf32> to vector<256x36xf32>
    %19 = arith.truncf %18 : vector<256x36xf32> to vector<256x36xbf16>
    %c0_57 = arith.constant 0 : index
    %c0_58 = arith.constant 0 : index
    %20 = vector.load %arg2[%c0_57, %c0_58] : memref<36x8xbf16, #tpu.memory_space<vmem>>, vector<36x8xbf16>
    %cst_59 = arith.constant dense<0.000000e+00> : vector<256x8xf32>
    %21 = tpu.matmul %19, %20, %cst_59 {dimension_numbers = #tpu.dot_dimension_numbers<[1], [0], [0], [1], [0, 0, 1, 1], [], []>} : vector<256x36xbf16>, vector<36x8xbf16>, vector<256x8xf32> -> vector<256x8xf32>
    %c0_60 = arith.constant 0 : index
    %c0_61 = arith.constant 0 : index
    %22 = vector.load %arg3[%c0_60, %c0_61] : memref<1x8xf32, #tpu.memory_space<vmem>>, vector<1x8xf32>
    %23 = vector.broadcast %22 : vector<1x8xf32> to vector<256x8xf32>
    %24 = arith.addf %21, %23 : vector<256x8xf32>
    %cst_62 = arith.constant 0.000000e+00 : f32
    %25 = vector.broadcast %cst_62 : f32 to vector<256x8xf32>
    %26 = arith.maximumf %24, %25 : vector<256x8xf32>
    %27 = vector.shape_cast %26 : vector<256x8xf32> to vector<1x16x16x8xf32>
    %cst_63 = arith.constant 0.000000e+00 : f32
    %28 = vector.broadcast %cst_63 : f32 to vector<1x1x18x8xf32>
    %cst_64 = arith.constant 0.000000e+00 : f32
    %29 = vector.broadcast %cst_64 : f32 to vector<1x18x1x8xf32>
    %c0_65 = arith.constant 0 : index
    %c0_66 = arith.constant 0 : index
    %c0_67 = arith.constant 0 : index
    %c0_68 = arith.constant 0 : index
    %30 = vector.load %arg10[%c0_65, %c0_66, %c0_67, %c0_68] : memref<1x18x18x8xf32, #tpu.memory_space<vmem>>, vector<1x1x18x8xf32>
    tpu.vector_store %arg10[%c0_65, %c0_66, %c0_67, %c0_68], %28 {strides = array<i32>} : memref<1x18x18x8xf32, #tpu.memory_space<vmem>>, vector<1x1x18x8xf32>,
    %c0_69 = arith.constant 0 : index
    %c17_70 = arith.constant 17 : index
    %c0_71 = arith.constant 0 : index
    %c0_72 = arith.constant 0 : index
    %31 = vector.load %arg10[%c0_69, %c17_70, %c0_71, %c0_72] : memref<1x18x18x8xf32, #tpu.memory_space<vmem>>, vector<1x1x18x8xf32>
    tpu.vector_store %arg10[%c0_69, %c17_70, %c0_71, %c0_72], %28 {strides = array<i32>} : memref<1x18x18x8xf32, #tpu.memory_space<vmem>>, vector<1x1x18x8xf32>,
    %c0_73 = arith.constant 0 : index
    %c0_74 = arith.constant 0 : index
    %c0_75 = arith.constant 0 : index
    %c0_76 = arith.constant 0 : index
    %32 = vector.load %arg10[%c0_73, %c0_74, %c0_75, %c0_76] : memref<1x18x18x8xf32, #tpu.memory_space<vmem>>, vector<1x18x1x8xf32>
    tpu.vector_store %arg10[%c0_73, %c0_74, %c0_75, %c0_76], %29 {strides = array<i32>} : memref<1x18x18x8xf32, #tpu.memory_space<vmem>>, vector<1x18x1x8xf32>,
    %c0_77 = arith.constant 0 : index
    %c0_78 = arith.constant 0 : index
    %c17_79 = arith.constant 17 : index
    %c0_80 = arith.constant 0 : index
    %33 = vector.load %arg10[%c0_77, %c0_78, %c17_79, %c0_80] : memref<1x18x18x8xf32, #tpu.memory_space<vmem>>, vector<1x18x1x8xf32>
    tpu.vector_store %arg10[%c0_77, %c0_78, %c17_79, %c0_80], %29 {strides = array<i32>} : memref<1x18x18x8xf32, #tpu.memory_space<vmem>>, vector<1x18x1x8xf32>,
    %c0_81 = arith.constant 0 : index
    %c1_82 = arith.constant 1 : index
    %c1_83 = arith.constant 1 : index
    %c0_84 = arith.constant 0 : index
    %34 = vector.load %arg10[%c0_81, %c1_82, %c1_83, %c0_84] : memref<1x18x18x8xf32, #tpu.memory_space<vmem>>, vector<1x16x16x8xf32>
    tpu.vector_store %arg10[%c0_81, %c1_82, %c1_83, %c0_84], %27 {strides = array<i32>} : memref<1x18x18x8xf32, #tpu.memory_space<vmem>>, vector<1x16x16x8xf32>,
    %c0_85 = arith.constant 0 : index
    %c0_86 = arith.constant 0 : index
    %c0_87 = arith.constant 0 : index
    %c0_88 = arith.constant 0 : index
    %35 = vector.load %arg10[%c0_85, %c0_86, %c0_87, %c0_88] : memref<1x18x18x8xf32, #tpu.memory_space<vmem>>, vector<1x16x16x8xf32>
    %c0_89 = arith.constant 0 : index
    %c0_90 = arith.constant 0 : index
    %c1_91 = arith.constant 1 : index
    %c0_92 = arith.constant 0 : index
    %36 = vector.load %arg10[%c0_89, %c0_90, %c1_91, %c0_92] : memref<1x18x18x8xf32, #tpu.memory_space<vmem>>, vector<1x16x16x8xf32>
    %c0_93 = arith.constant 0 : index
    %c0_94 = arith.constant 0 : index
    %c2_95 = arith.constant 2 : index
    %c0_96 = arith.constant 0 : index
    %37 = vector.load %arg10[%c0_93, %c0_94, %c2_95, %c0_96] : memref<1x18x18x8xf32, #tpu.memory_space<vmem>>, vector<1x16x16x8xf32>
    %c0_97 = arith.constant 0 : index
    %c1_98 = arith.constant 1 : index
    %c0_99 = arith.constant 0 : index
    %c0_100 = arith.constant 0 : index
    %38 = vector.load %arg10[%c0_97, %c1_98, %c0_99, %c0_100] : memref<1x18x18x8xf32, #tpu.memory_space<vmem>>, vector<1x16x16x8xf32>
    %c0_101 = arith.constant 0 : index
    %c1_102 = arith.constant 1 : index
    %c1_103 = arith.constant 1 : index
    %c0_104 = arith.constant 0 : index
    %39 = vector.load %arg10[%c0_101, %c1_102, %c1_103, %c0_104] : memref<1x18x18x8xf32, #tpu.memory_space<vmem>>, vector<1x16x16x8xf32>
    %c0_105 = arith.constant 0 : index
    %c1_106 = arith.constant 1 : index
    %c2_107 = arith.constant 2 : index
    %c0_108 = arith.constant 0 : index
    %40 = vector.load %arg10[%c0_105, %c1_106, %c2_107, %c0_108] : memref<1x18x18x8xf32, #tpu.memory_space<vmem>>, vector<1x16x16x8xf32>
    %c0_109 = arith.constant 0 : index
    %c2_110 = arith.constant 2 : index
    %c0_111 = arith.constant 0 : index
    %c0_112 = arith.constant 0 : index
    %41 = vector.load %arg10[%c0_109, %c2_110, %c0_111, %c0_112] : memref<1x18x18x8xf32, #tpu.memory_space<vmem>>, vector<1x16x16x8xf32>
    %c0_113 = arith.constant 0 : index
    %c2_114 = arith.constant 2 : index
    %c1_115 = arith.constant 1 : index
    %c0_116 = arith.constant 0 : index
    %42 = vector.load %arg10[%c0_113, %c2_114, %c1_115, %c0_116] : memref<1x18x18x8xf32, #tpu.memory_space<vmem>>, vector<1x16x16x8xf32>
    %c0_117 = arith.constant 0 : index
    %c2_118 = arith.constant 2 : index
    %c2_119 = arith.constant 2 : index
    %c0_120 = arith.constant 0 : index
    %43 = vector.load %arg10[%c0_117, %c2_118, %c2_119, %c0_120] : memref<1x18x18x8xf32, #tpu.memory_space<vmem>>, vector<1x16x16x8xf32>
    %44 = tpu.concatenate %35, %36, %37, %38, %39, %40, %41, %42, %43 in 3 : vector<1x16x16x8xf32>, vector<1x16x16x8xf32>, vector<1x16x16x8xf32>, vector<1x16x16x8xf32>, vector<1x16x16x8xf32>, vector<1x16x16x8xf32>, vector<1x16x16x8xf32>, vector<1x16x16x8xf32>, vector<1x16x16x8xf32> -> vector<1x16x16x72xf32>
    %45 = vector.shape_cast %44 : vector<1x16x16x72xf32> to vector<256x72xf32>
    %46 = arith.truncf %45 : vector<256x72xf32> to vector<256x72xbf16>
    %c0_121 = arith.constant 0 : index
    %c0_122 = arith.constant 0 : index
    %47 = vector.load %arg4[%c0_121, %c0_122] : memref<72x8xbf16, #tpu.memory_space<vmem>>, vector<72x8xbf16>
    %cst_123 = arith.constant dense<0.000000e+00> : vector<256x8xf32>
    %48 = tpu.matmul %46, %47, %cst_123 {dimension_numbers = #tpu.dot_dimension_numbers<[1], [0], [0], [1], [0, 0, 1, 1], [], []>} : vector<256x72xbf16>, vector<72x8xbf16>, vector<256x8xf32> -> vector<256x8xf32>
    %c0_124 = arith.constant 0 : index
    %c0_125 = arith.constant 0 : index
    %49 = vector.load %arg5[%c0_124, %c0_125] : memref<1x8xf32, #tpu.memory_space<vmem>>, vector<1x8xf32>
    %50 = vector.broadcast %49 : vector<1x8xf32> to vector<256x8xf32>
    %51 = arith.addf %48, %50 : vector<256x8xf32>
    %cst_126 = arith.constant 0.000000e+00 : f32
    %52 = vector.broadcast %cst_126 : f32 to vector<256x8xf32>
    %53 = arith.maximumf %51, %52 : vector<256x8xf32>
    %54 = vector.shape_cast %53 : vector<256x8xf32> to vector<1x16x16x8xf32>
    %55 = vector.shape_cast %54 : vector<1x16x16x8xf32> to vector<1x16x8x2x8xf32>
    %56 = vector.extract_strided_slice %55 {offsets = [0, 0, 0, 0, 0], sizes = [1, 16, 8, 1, 8], strides = [1, 1, 1, 1, 1]} : vector<1x16x8x2x8xf32> to vector<1x16x8x1x8xf32>
    %57 = vector.extract_strided_slice %55 {offsets = [0, 0, 0, 1, 0], sizes = [1, 16, 8, 1, 8], strides = [1, 1, 1, 1, 1]} : vector<1x16x8x2x8xf32> to vector<1x16x8x1x8xf32>
    %58 = arith.maximumf %56, %57 : vector<1x16x8x1x8xf32>
    %59 = vector.shape_cast %58 : vector<1x16x8x1x8xf32> to vector<1x16x8x8xf32>
    %60 = vector.shape_cast %59 : vector<1x16x8x8xf32> to vector<1x8x2x8x8xf32>
    %61 = vector.extract_strided_slice %60 {offsets = [0, 0, 0, 0, 0], sizes = [1, 8, 1, 8, 8], strides = [1, 1, 1, 1, 1]} : vector<1x8x2x8x8xf32> to vector<1x8x1x8x8xf32>
    %62 = vector.extract_strided_slice %60 {offsets = [0, 0, 1, 0, 0], sizes = [1, 8, 1, 8, 8], strides = [1, 1, 1, 1, 1]} : vector<1x8x2x8x8xf32> to vector<1x8x1x8x8xf32>
    %63 = arith.maximumf %61, %62 : vector<1x8x1x8x8xf32>
    %64 = vector.shape_cast %63 : vector<1x8x1x8x8xf32> to vector<1x8x8x8xf32>
    %cst_127 = arith.constant 0.000000e+00 : f32
    %65 = vector.broadcast %cst_127 : f32 to vector<1x1x10x8xf32>
    %cst_128 = arith.constant 0.000000e+00 : f32
    %66 = vector.broadcast %cst_128 : f32 to vector<1x10x1x8xf32>
    %c0_129 = arith.constant 0 : index
    %c0_130 = arith.constant 0 : index
    %c0_131 = arith.constant 0 : index
    %c0_132 = arith.constant 0 : index
    %67 = vector.load %arg11[%c0_129, %c0_130, %c0_131, %c0_132] : memref<1x10x10x8xf32, #tpu.memory_space<vmem>>, vector<1x1x10x8xf32>
    tpu.vector_store %arg11[%c0_129, %c0_130, %c0_131, %c0_132], %65 {strides = array<i32>} : memref<1x10x10x8xf32, #tpu.memory_space<vmem>>, vector<1x1x10x8xf32>,
    %c0_133 = arith.constant 0 : index
    %c9 = arith.constant 9 : index
    %c0_134 = arith.constant 0 : index
    %c0_135 = arith.constant 0 : index
    %68 = vector.load %arg11[%c0_133, %c9, %c0_134, %c0_135] : memref<1x10x10x8xf32, #tpu.memory_space<vmem>>, vector<1x1x10x8xf32>
    tpu.vector_store %arg11[%c0_133, %c9, %c0_134, %c0_135], %65 {strides = array<i32>} : memref<1x10x10x8xf32, #tpu.memory_space<vmem>>, vector<1x1x10x8xf32>,
    %c0_136 = arith.constant 0 : index
    %c0_137 = arith.constant 0 : index
    %c0_138 = arith.constant 0 : index
    %c0_139 = arith.constant 0 : index
    %69 = vector.load %arg11[%c0_136, %c0_137, %c0_138, %c0_139] : memref<1x10x10x8xf32, #tpu.memory_space<vmem>>, vector<1x10x1x8xf32>
    tpu.vector_store %arg11[%c0_136, %c0_137, %c0_138, %c0_139], %66 {strides = array<i32>} : memref<1x10x10x8xf32, #tpu.memory_space<vmem>>, vector<1x10x1x8xf32>,
    %c0_140 = arith.constant 0 : index
    %c0_141 = arith.constant 0 : index
    %c9_142 = arith.constant 9 : index
    %c0_143 = arith.constant 0 : index
    %70 = vector.load %arg11[%c0_140, %c0_141, %c9_142, %c0_143] : memref<1x10x10x8xf32, #tpu.memory_space<vmem>>, vector<1x10x1x8xf32>
    tpu.vector_store %arg11[%c0_140, %c0_141, %c9_142, %c0_143], %66 {strides = array<i32>} : memref<1x10x10x8xf32, #tpu.memory_space<vmem>>, vector<1x10x1x8xf32>,
    %c0_144 = arith.constant 0 : index
    %c1_145 = arith.constant 1 : index
    %c1_146 = arith.constant 1 : index
    %c0_147 = arith.constant 0 : index
    %71 = vector.load %arg11[%c0_144, %c1_145, %c1_146, %c0_147] : memref<1x10x10x8xf32, #tpu.memory_space<vmem>>, vector<1x8x8x8xf32>
    tpu.vector_store %arg11[%c0_144, %c1_145, %c1_146, %c0_147], %64 {strides = array<i32>} : memref<1x10x10x8xf32, #tpu.memory_space<vmem>>, vector<1x8x8x8xf32>,
    %c0_148 = arith.constant 0 : index
    %c0_149 = arith.constant 0 : index
    %c0_150 = arith.constant 0 : index
    %c0_151 = arith.constant 0 : index
    %72 = vector.load %arg11[%c0_148, %c0_149, %c0_150, %c0_151] : memref<1x10x10x8xf32, #tpu.memory_space<vmem>>, vector<1x8x8x8xf32>
    %c0_152 = arith.constant 0 : index
    %c0_153 = arith.constant 0 : index
    %c1_154 = arith.constant 1 : index
    %c0_155 = arith.constant 0 : index
    %73 = vector.load %arg11[%c0_152, %c0_153, %c1_154, %c0_155] : memref<1x10x10x8xf32, #tpu.memory_space<vmem>>, vector<1x8x8x8xf32>
    %c0_156 = arith.constant 0 : index
    %c0_157 = arith.constant 0 : index
    %c2_158 = arith.constant 2 : index
    %c0_159 = arith.constant 0 : index
    %74 = vector.load %arg11[%c0_156, %c0_157, %c2_158, %c0_159] : memref<1x10x10x8xf32, #tpu.memory_space<vmem>>, vector<1x8x8x8xf32>
    %c0_160 = arith.constant 0 : index
    %c1_161 = arith.constant 1 : index
    %c0_162 = arith.constant 0 : index
    %c0_163 = arith.constant 0 : index
    %75 = vector.load %arg11[%c0_160, %c1_161, %c0_162, %c0_163] : memref<1x10x10x8xf32, #tpu.memory_space<vmem>>, vector<1x8x8x8xf32>
    %c0_164 = arith.constant 0 : index
    %c1_165 = arith.constant 1 : index
    %c1_166 = arith.constant 1 : index
    %c0_167 = arith.constant 0 : index
    %76 = vector.load %arg11[%c0_164, %c1_165, %c1_166, %c0_167] : memref<1x10x10x8xf32, #tpu.memory_space<vmem>>, vector<1x8x8x8xf32>
    %c0_168 = arith.constant 0 : index
    %c1_169 = arith.constant 1 : index
    %c2_170 = arith.constant 2 : index
    %c0_171 = arith.constant 0 : index
    %77 = vector.load %arg11[%c0_168, %c1_169, %c2_170, %c0_171] : memref<1x10x10x8xf32, #tpu.memory_space<vmem>>, vector<1x8x8x8xf32>
    %c0_172 = arith.constant 0 : index
    %c2_173 = arith.constant 2 : index
    %c0_174 = arith.constant 0 : index
    %c0_175 = arith.constant 0 : index
    %78 = vector.load %arg11[%c0_172, %c2_173, %c0_174, %c0_175] : memref<1x10x10x8xf32, #tpu.memory_space<vmem>>, vector<1x8x8x8xf32>
    %c0_176 = arith.constant 0 : index
    %c2_177 = arith.constant 2 : index
    %c1_178 = arith.constant 1 : index
    %c0_179 = arith.constant 0 : index
    %79 = vector.load %arg11[%c0_176, %c2_177, %c1_178, %c0_179] : memref<1x10x10x8xf32, #tpu.memory_space<vmem>>, vector<1x8x8x8xf32>
    %c0_180 = arith.constant 0 : index
    %c2_181 = arith.constant 2 : index
    %c2_182 = arith.constant 2 : index
    %c0_183 = arith.constant 0 : index
    %80 = vector.load %arg11[%c0_180, %c2_181, %c2_182, %c0_183] : memref<1x10x10x8xf32, #tpu.memory_space<vmem>>, vector<1x8x8x8xf32>
    %81 = tpu.concatenate %72, %73, %74, %75, %76, %77, %78, %79, %80 in 3 : vector<1x8x8x8xf32>, vector<1x8x8x8xf32>, vector<1x8x8x8xf32>, vector<1x8x8x8xf32>, vector<1x8x8x8xf32>, vector<1x8x8x8xf32>, vector<1x8x8x8xf32>, vector<1x8x8x8xf32>, vector<1x8x8x8xf32> -> vector<1x8x8x72xf32>
    %82 = vector.shape_cast %81 : vector<1x8x8x72xf32> to vector<64x72xf32>
    %83 = arith.truncf %82 : vector<64x72xf32> to vector<64x72xbf16>
    %c0_184 = arith.constant 0 : index
    %c0_185 = arith.constant 0 : index
    %84 = vector.load %arg6[%c0_184, %c0_185] : memref<72x16xbf16, #tpu.memory_space<vmem>>, vector<72x16xbf16>
    %cst_186 = arith.constant dense<0.000000e+00> : vector<64x16xf32>
    %85 = tpu.matmul %83, %84, %cst_186 {dimension_numbers = #tpu.dot_dimension_numbers<[1], [0], [0], [1], [0, 0, 1, 1], [], []>} : vector<64x72xbf16>, vector<72x16xbf16>, vector<64x16xf32> -> vector<64x16xf32>
    %c0_187 = arith.constant 0 : index
    %c0_188 = arith.constant 0 : index
    %86 = vector.load %arg7[%c0_187, %c0_188] : memref<1x16xf32, #tpu.memory_space<vmem>>, vector<1x16xf32>
    %87 = vector.broadcast %86 : vector<1x16xf32> to vector<64x16xf32>
    %88 = arith.addf %85, %87 : vector<64x16xf32>
    %cst_189 = arith.constant 0.000000e+00 : f32
    %89 = vector.broadcast %cst_189 : f32 to vector<64x16xf32>
    %90 = arith.maximumf %88, %89 : vector<64x16xf32>
    %91 = vector.shape_cast %90 : vector<64x16xf32> to vector<1x8x8x16xf32>
    %92 = vector.shape_cast %91 : vector<1x8x8x16xf32> to vector<1x8x4x2x16xf32>
    %93 = vector.extract_strided_slice %92 {offsets = [0, 0, 0, 0, 0], sizes = [1, 8, 4, 1, 16], strides = [1, 1, 1, 1, 1]} : vector<1x8x4x2x16xf32> to vector<1x8x4x1x16xf32>
    %94 = vector.extract_strided_slice %92 {offsets = [0, 0, 0, 1, 0], sizes = [1, 8, 4, 1, 16], strides = [1, 1, 1, 1, 1]} : vector<1x8x4x2x16xf32> to vector<1x8x4x1x16xf32>
    %95 = arith.maximumf %93, %94 : vector<1x8x4x1x16xf32>
    %96 = vector.shape_cast %95 : vector<1x8x4x1x16xf32> to vector<1x8x4x16xf32>
    %97 = vector.shape_cast %96 : vector<1x8x4x16xf32> to vector<1x4x2x4x16xf32>
    %98 = vector.extract_strided_slice %97 {offsets = [0, 0, 0, 0, 0], sizes = [1, 4, 1, 4, 16], strides = [1, 1, 1, 1, 1]} : vector<1x4x2x4x16xf32> to vector<1x4x1x4x16xf32>
    %99 = vector.extract_strided_slice %97 {offsets = [0, 0, 1, 0, 0], sizes = [1, 4, 1, 4, 16], strides = [1, 1, 1, 1, 1]} : vector<1x4x2x4x16xf32> to vector<1x4x1x4x16xf32>
    %100 = arith.maximumf %98, %99 : vector<1x4x1x4x16xf32>
    %101 = vector.shape_cast %100 : vector<1x4x1x4x16xf32> to vector<1x4x4x16xf32>
    %c0_190 = arith.constant 0 : index
    %c0_191 = arith.constant 0 : index
    %c0_192 = arith.constant 0 : index
    %c0_193 = arith.constant 0 : index
    %102 = vector.load %arg8[%c0_190, %c0_191, %c0_192, %c0_193] : memref<1x4x4x16xf32, #tpu.memory_space<vmem>>, vector<1x4x4x16xf32>
    tpu.vector_store %arg8[%c0_190, %c0_191, %c0_192, %c0_193], %101 {strides = array<i32>} : memref<1x4x4x16xf32, #tpu.memory_space<vmem>>, vector<1x4x4x16xf32>,
    return
  }
  func.func @transform_0(%arg0: i32) -> (i32, i32, i32, i32) {
    %c0_i32 = arith.constant 0 : i32
    %c0_i32_0 = arith.constant 0 : i32
    %c0_i32_1 = arith.constant 0 : i32
    %c0_i32_2 = arith.constant 0 : i32
    return %arg0, %c0_i32, %c0_i32_0, %c0_i32_1 : i32, i32, i32, i32
  }
  func.func @transform_1(%arg0: i32) -> (i32, i32) {
    %c0_i32 = arith.constant 0 : i32
    %c0_i32_0 = arith.constant 0 : i32
    %c0_i32_1 = arith.constant 0 : i32
    return %c0_i32, %c0_i32_0 : i32, i32
  }
  func.func @transform_2(%arg0: i32) -> (i32, i32) {
    %c0_i32 = arith.constant 0 : i32
    %c0_i32_0 = arith.constant 0 : i32
    %c0_i32_1 = arith.constant 0 : i32
    return %c0_i32, %c0_i32_0 : i32, i32
  }
  func.func @transform_3(%arg0: i32) -> (i32, i32) {
    %c0_i32 = arith.constant 0 : i32
    %c0_i32_0 = arith.constant 0 : i32
    %c0_i32_1 = arith.constant 0 : i32
    return %c0_i32, %c0_i32_0 : i32, i32
  }
  func.func @transform_4(%arg0: i32) -> (i32, i32) {
    %c0_i32 = arith.constant 0 : i32
    %c0_i32_0 = arith.constant 0 : i32
    %c0_i32_1 = arith.constant 0 : i32
    return %c0_i32, %c0_i32_0 : i32, i32
  }
  func.func @transform_5(%arg0: i32) -> (i32, i32) {
    %c0_i32 = arith.constant 0 : i32
    %c0_i32_0 = arith.constant 0 : i32
    %c0_i32_1 = arith.constant 0 : i32
    return %c0_i32, %c0_i32_0 : i32, i32
  }
  func.func @transform_6(%arg0: i32) -> (i32, i32) {
    %c0_i32 = arith.constant 0 : i32
    %c0_i32_0 = arith.constant 0 : i32
    %c0_i32_1 = arith.constant 0 : i32
    return %c0_i32, %c0_i32_0 : i32, i32
  }
  func.func @transform_7(%arg0: i32) -> (i32, i32, i32, i32) {
    %c0_i32 = arith.constant 0 : i32
    %c0_i32_0 = arith.constant 0 : i32
    %c0_i32_1 = arith.constant 0 : i32
    %c0_i32_2 = arith.constant 0 : i32
    return %arg0, %c0_i32, %c0_i32_0, %c0_i32_1 : i32, i32, i32, i32
  }
}

</mosaic_0001>

<bundles_post_ra>
// kernel: _lambda_.1
= control target key start
LH: loop header
LB: loop body
LE: loop exit
PB: predicated region body
PF: predicated region fallthrough
CT: control target
= control target key end

     0   :  { %12 = vsyncpa [#allocation6], 0  ;;  %s11536_s0 = inlined_call_operand.vmem [shape: f32[2,16,16,4], index: 0, kind: input, shape index: {}]   ;;  %s11537_s1 = inlined_call_operand.vmem [shape: bf16[36,8], index: 1, kind: input, shape index: {}]   ;;  %s11538_s2 = inlined_call_operand.vmem [shape: f32[1,8], index: 2, kind: input, shape index: {}, may-alias: {2,4}]   ;;  %s11539_s3 = inlined_call_operand.vmem [shape: bf16[72,8], index: 3, kind: input, shape index: {}]   ;;  %s11540_s4 = inlined_call_operand.vmem [shape: f32[1,8], index: 4, kind: input, shape index: {}, may-alias: {2,4}]   ;;  %s11541_s5 = inlined_call_operand.vmem [shape: bf16[72,16], index: 5, kind: input, shape index: {}]   ;;  %s11542_s6 = inlined_call_operand.vmem [shape: f32[1,16], index: 6, kind: input, shape index: {}]   ;;  %s11543_s7 = inlined_call_operand.hbm [shape: f32[2,4,4,16], index: 7, kind: output, shape index: {}]  }
   0x1   :  { %14 = vsyncpa [#allocation6 + $0x1], 0  ;;  %s8960_s24 = smov 0   ;;  %s8962_s25 = smov 0  }
   0x2   :  { %s8964_s26 = smov 0   ;;  %s8966_s27 = smov 0  }
   0x3 LB: > { %s8981_s28 = sadd.s32 4294967295, %s8903_s27   ;;  %s6940_s29 = sadd.s32 4294967294, %s8903_s27   ;;  %s8903_s27 = sphi %s8966_s27, %s11638_s27   ;;  %s8899_s26 = sphi %s8964_s26, %s11637_s26   ;;  %s8895_s25 = sphi %s8962_s25, %s11636_s25   ;;  %s8891_s24 = sphi %s8960_s24, %s11635_s24  }
   0x4   : > { %s8985_s30 = sadd.s32 1, %s8903_s27   ;;  %s179_s8 = sadd.s32 1, %s8899_s26 }
   0x5   : > { %s176_s9 = ssub.s32 %s8903_s27, %s8985_s30  ;;  %p189_p0 = scmp.ne.s32.totalorder %s8899_s26, %s8895_s25 }
   0x6   : > { %p177_p1 = scmp.eq.s32.totalorder %s176_s9, 0  ;;  %p190_p2 = scmp.eq.s32.totalorder %s8981_s28, 1 }
   0x7   : > { %p195_p3 = scmp.ne.s32.totalorder %s8895_s25, %s8891_s24  ;;  %p196_p4 = scmp.eq.s32.totalorder %s6940_s29, 1 }
   0x8   : > { %s8996_s10 = scalar_select %p177_p1, %s8899_s26, %s179_s8  }
   0x9   : > { %p8998_p5 = por %p190_p2, %p189_p0  ;;  %p9002_p6 = por %p196_p4, %p195_p3 }
   0xa   : > { %p6943_p7 = scmp.ge.s32.totalorder %s8903_s27, 1  ;;  %p240_p8 = scmp.lt.s32.totalorder %s8903_s27, 3 }
   0xc   : > { %p241_p9 = pnand %p6943_p7, %p240_p8 }
   0xe   : > { %244 = sbr.rel (%p241_p9) target bundleno = 1528 (0x5f8), region = 48 }
  0x15   : > { %vm310_vm0 = vcmask 31744   ;;  %vm313_vm1 = vcmask 25600   ;;  %vm319_vm2 = vcmask 24576   ;;  %p272_p10 = scmp.lt.s32.totalorder %s8981_s28, 1  ;;  %v11544_v0 = vmov 0.0   ;;  %s8906_s18 = smov 4  }
  0x16   : > { %311 = vst.msk [vmem:[#allocation2] sm:$0xff] %vm310_vm0, %v11544_v0  ;;  %312 = vst.msk [vmem:[#allocation2 + $0x8] sm:$0xff] %vm310_vm0, %v11544_v0  ;;  %vm1734_vm3 = vcmask 64512   ;;  %s8907_s19 = smov 8   ;;  %s8908_s20 = smov 12   ;;  %vm2057_vm4 = vcmask 1041408  }
  0x17   : > { %314 = vst.msk [vmem:[#allocation2 + $0x10] sm:$0x3] %vm313_vm1, %v11544_v0  ;;  %318 = vst.msk [vmem:[#allocation2 + $0x1a8] sm:$0x3] %vm313_vm1, %v11544_v0  ;;  %s273_s13 = scalar_select %p272_p10, %s8981_s28, 1  ;;  %vm1767_vm5 = vcmask 97280  }
  0x18   : > { %316 = vst.msk [vmem:[#allocation2 + $0x198] sm:$0xff] %vm310_vm0, %v11544_v0  ;;  %317 = vst.msk [vmem:[#allocation2 + $0x1a0] sm:$0xff] %vm310_vm0, %v11544_v0  ;;  %s8909_s23 = smov 16   ;;  %s8910_s9 = smov 20   ;;  %vm1800_vm6 = vcmask 130048   ;;  %vm1833_vm7 = vcmask 162816  }
  0x19   : > { %321 = vst.msk [vmem:[#allocation2 + $0x18] sm:$0x1] %vm319_vm2, %v11544_v0  ;;  %322 = vst.msk [vmem:[#allocation2 + $0x30] sm:$0x1] %vm319_vm2, %v11544_v0  ;;  %s7164_s14 = sshll.u32 %s273_s13, 8  ;;  %s8911_s15 = smov 24  }
  0x1a   : > { %323 = vst.msk [vmem:[#allocation2 + $0x48] sm:$0x1] %vm319_vm2, %v11544_v0  ;;  %324 = vst.msk [vmem:[#allocation2 + $0x60] sm:$0x1] %vm319_vm2, %v11544_v0  ;;  %s9097_s17 = scalar_lea.vmem %s11536_s0, %s7164_s14  ;;  %s8912_s16 = smov 28   ;;  %vm1866_vm8 = vcmask 195584  }
  0x1b   : > { %325 = vst.msk [vmem:[#allocation2 + $0x78] sm:$0x1] %vm319_vm2, %v11544_v0  ;;  %326 = vst.msk [vmem:[#allocation2 + $0x90] sm:$0x1] %vm319_vm2, %v11544_v0  ;;  %v280_v1 = vld [vmem:[%s9097_s17 + $0x10] sm:$0xff]  ;;  %v281_v2 = vld [vmem:[%s9097_s17 + $0x18] sm:$0xff] }
  0x1c   : > { %327 = vst.msk [vmem:[#allocation2 + $0xa8] sm:$0x1] %vm319_vm2, %v11544_v0  ;;  %328 = vst.msk [vmem:[#allocation2 + $0xc0] sm:$0x1] %vm319_vm2, %v11544_v0  ;;  %v278_v3 = vld [vmem:[%s9097_s17] sm:$0xff]  ;;  %v279_v4 = vld [vmem:[%s9097_s17 + $0x8] sm:$0xff] }
  0x1d   : > { %329 = vst.msk [vmem:[#allocation2 + $0xd8] sm:$0x1] %vm319_vm2, %v11544_v0  ;;  %330 = vst.msk [vmem:[#allocation2 + $0xf0] sm:$0x1] %vm319_vm2, %v11544_v0  ;;  %v282_v5 = vld [vmem:[%s9097_s17 + $0x20] sm:$0xff]  ;;  %v283_v6 = vld [vmem:[%s9097_s17 + $0x28] sm:$0xff] }
  0x1e   : > { %331 = vst.msk [vmem:[#allocation2 + $0x108] sm:$0x1] %vm319_vm2, %v11544_v0  ;;  %332 = vst.msk [vmem:[#allocation2 + $0x120] sm:$0x1] %vm319_vm2, %v11544_v0  ;;  %v421_v7 = vld [vmem:[#allocation2 + $0x1] sm:$0xff]  ;;  %v422_v8 = vld [vmem:[#allocation2 + $0x9] sm:$0xff] }
  0x1f   : > { %333 = vst.msk [vmem:[#allocation2 + $0x138] sm:$0x1] %vm319_vm2, %v11544_v0  ;;  %334 = vst.msk [vmem:[#allocation2 + $0x150] sm:$0x1] %vm319_vm2, %v11544_v0  ;;  %v284_v9 = vld [vmem:[%s9097_s17 + $0x30] sm:$0xff]  ;;  %v7369_v10 = vpack.i.bf16 %v422_v8, %v421_v7  ;;  %v285_v11 = vld [vmem:[%s9097_s17 + $0x38] sm:$0xff] }
  0x20   : > { %335 = vst.msk [vmem:[#allocation2 + $0x168] sm:$0x1] %vm319_vm2, %v11544_v0  ;;  %336 = vst.msk [vmem:[#allocation2 + $0x180] sm:$0x1] %vm319_vm2, %v11544_v0  ;;  %v286_v12 = vld [vmem:[%s9097_s17 + $0x40] sm:$0xff]  ;;  %v287_v13 = vld [vmem:[%s9097_s17 + $0x48] sm:$0xff] }
  0x21   : > { %339 = vst.msk [vmem:[#allocation2 + $0x29] sm:$0x1] %vm319_vm2, %v11544_v0  ;;  %340 = vst.msk [vmem:[#allocation2 + $0x41] sm:$0x1] %vm319_vm2, %v11544_v0  ;;  %v288_v14 = vld [vmem:[%s9097_s17 + $0x50] sm:$0xff]  ;;  %v289_v15 = vld [vmem:[%s9097_s17 + $0x58] sm:$0xff]  ;;  %7370 = vrot.lane.b32.xlu0 %v7369_v10, %s8906_s18 }
  0x22   : > { %341 = vst.msk [vmem:[#allocation2 + $0x59] sm:$0x1] %vm319_vm2, %v11544_v0  ;;  %342 = vst.msk [vmem:[#allocation2 + $0x71] sm:$0x1] %vm319_vm2, %v11544_v0  ;;  %v290_v16 = vld [vmem:[%s9097_s17 + $0x60] sm:$0xff]  ;;  %v291_v17 = vld [vmem:[%s9097_s17 + $0x68] sm:$0xff] }
  0x23   : > { %343 = vst.msk [vmem:[#allocation2 + $0x89] sm:$0x1] %vm319_vm2, %v11544_v0  ;;  %344 = vst.msk [vmem:[#allocation2 + $0xa1] sm:$0x1] %vm319_vm2, %v11544_v0  ;;  %v292_v18 = vld [vmem:[%s9097_s17 + $0x70] sm:$0xff]  ;;  %v293_v19 = vld [vmem:[%s9097_s17 + $0x78] sm:$0xff] }
  0x24   : > { %345 = vst.msk [vmem:[#allocation2 + $0xb9] sm:$0x1] %vm319_vm2, %v11544_v0  ;;  %346 = vst.msk [vmem:[#allocation2 + $0xd1] sm:$0x1] %vm319_vm2, %v11544_v0  ;;  %v294_v20 = vld [vmem:[%s9097_s17 + $0x80] sm:$0xff]  ;;  %v295_v21 = vld [vmem:[%s9097_s17 + $0x88] sm:$0xff] }
  0x25   : > { %347 = vst.msk [vmem:[#allocation2 + $0xe9] sm:$0x1] %vm319_vm2, %v11544_v0  ;;  %348 = vst.msk [vmem:[#allocation2 + $0x101] sm:$0x1] %vm319_vm2, %v11544_v0  ;;  %v296_v22 = vld [vmem:[%s9097_s17 + $0x90] sm:$0xff]  ;;  %v297_v23 = vld [vmem:[%s9097_s17 + $0x98] sm:$0xff] }
  0x26   : > { %349 = vst.msk [vmem:[#allocation2 + $0x119] sm:$0x1] %vm319_vm2, %v11544_v0  ;;  %350 = vst.msk [vmem:[#allocation2 + $0x131] sm:$0x1] %vm319_vm2, %v11544_v0  ;;  %v298_v24 = vld [vmem:[%s9097_s17 + $0xa0] sm:$0xff]  ;;  %v299_v25 = vld [vmem:[%s9097_s17 + $0xa8] sm:$0xff] }
  0x27   : > { %351 = vst.msk [vmem:[#allocation2 + $0x149] sm:$0x1] %vm319_vm2, %v11544_v0  ;;  %352 = vst.msk [vmem:[#allocation2 + $0x161] sm:$0x1] %vm319_vm2, %v11544_v0  ;;  %v300_v35 = vld [vmem:[%s9097_s17 + $0xb0] sm:$0xff]  ;;  %v301_v36 = vld [vmem:[%s9097_s17 + $0xb8] sm:$0xff] }
  0x28   : > { %353 = vst.msk [vmem:[#allocation2 + $0x179] sm:$0x1] %vm319_vm2, %v11544_v0  ;;  %354 = vst.msk [vmem:[#allocation2 + $0x191] sm:$0x1] %vm319_vm2, %v11544_v0  ;;  %v302_v50 = vld [vmem:[%s9097_s17 + $0xc0] sm:$0xff]  ;;  %v303_v51 = vld [vmem:[%s9097_s17 + $0xc8] sm:$0xff] }
  0x29   : > { %338 = vst.msk [vmem:[#allocation2 + $0x11] sm:$0x1] %vm319_vm2, %v11544_v0  ;;  %355 = vst.msk [vmem:[#allocation2 + $0x1a9] sm:$0x1] %vm319_vm2, %v11544_v0  ;;  %v304_v52 = vld [vmem:[%s9097_s17 + $0xd0] sm:$0xff]  ;;  %v305_v53 = vld [vmem:[%s9097_s17 + $0xd8] sm:$0xff] }
  0x2a   : > { %320 = vst.msk [vmem:[#allocation2] sm:$0x1] %vm319_vm2, %v11544_v0  ;;  %337 = vst.msk [vmem:[#allocation2 + $0x198] sm:$0x1] %vm319_vm2, %v11544_v0  ;;  %v306_v54 = vld [vmem:[%s9097_s17 + $0xe0] sm:$0xff]  ;;  %v307_v55 = vld [vmem:[%s9097_s17 + $0xe8] sm:$0xff] }
  0x2b   : > { %359 = vst.msk [vmem:[#allocation2 + $0x31] sm:$0xff] %vm310_vm0, %v280_v1  ;;  %360 = vst.msk [vmem:[#allocation2 + $0x39] sm:$0xff] %vm310_vm0, %v281_v2  ;;  %vm1899_vm9 = vcmask 228352   ;;  %vm1932_vm10 = vcmask 261120   ;;  %vm2008_vm11 = vcmask 293888   ;;  %vm2256_vm12 = vcmask 58368  }
  0x2c   : > { %357 = vst.msk [vmem:[#allocation2 + $0x19] sm:$0xff] %vm310_vm0, %v278_v3  ;;  %358 = vst.msk [vmem:[#allocation2 + $0x21] sm:$0xff] %vm310_vm0, %v279_v4  ;;  %vm2262_vm13 = vcmask 57344   ;;  %s8914_s22 = smov 48   ;;  %s8915_s29 = smov 56   ;;  %vm4013_vm14 = vcmask 1043456  }
  0x2d   : > { %361 = vst.msk [vmem:[#allocation2 + $0x49] sm:$0xff] %vm310_vm0, %v282_v5  ;;  %362 = vst.msk [vmem:[#allocation2 + $0x51] sm:$0xff] %vm310_vm0, %v283_v6  ;;  %s8916_s8 = smov 64   ;;  %vm3773_vm15 = vcmask 326656   ;;  %vm3839_vm1 = vcmask 457728   ;;  %vm3872_vm2 = vcmask 523264  }
  0x2e   : > { %363 = vst.msk [vmem:[#allocation2 + $0x61] sm:$0xff] %vm310_vm0, %v284_v9  ;;  %364 = vst.msk [vmem:[#allocation2 + $0x69] sm:$0xff] %vm310_vm0, %v285_v11 }
  0x2f   : > { %365 = vst.msk [vmem:[#allocation2 + $0x79] sm:$0xff] %vm310_vm0, %v286_v12  ;;  %366 = vst.msk [vmem:[#allocation2 + $0x81] sm:$0xff] %vm310_vm0, %v287_v13 }
  0x30   : > { %367 = vst.msk [vmem:[#allocation2 + $0x91] sm:$0xff] %vm310_vm0, %v288_v14  ;;  %368 = vst.msk [vmem:[#allocation2 + $0x99] sm:$0xff] %vm310_vm0, %v289_v15  ;;  %v453_v15 = vld [vmem:[#allocation2 + $0x2] sm:$0xff] }
  0x31   : > { %369 = vst.msk [vmem:[#allocation2 + $0xa9] sm:$0xff] %vm310_vm0, %v290_v16  ;;  %370 = vst.msk [vmem:[#allocation2 + $0xb1] sm:$0xff] %vm310_vm0, %v291_v17  ;;  %v454_v16 = vld [vmem:[#allocation2 + $0xa] sm:$0xff] }
  0x32   : > { %371 = vst.msk [vmem:[#allocation2 + $0xc1] sm:$0xff] %vm310_vm0, %v292_v18  ;;  %372 = vst.msk [vmem:[#allocation2 + $0xc9] sm:$0xff] %vm310_vm0, %v293_v19  ;;  %v425_v26 = vld [vmem:[#allocation2 + $0x31] sm:$0xff]  ;;  %v426_v27 = vld [vmem:[#allocation2 + $0x39] sm:$0xff]  ;;  %v7449_v18 = vpack.i.bf16 %v454_v16, %v453_v15 }
  0x33   : > { %373 = vst.msk [vmem:[#allocation2 + $0xd9] sm:$0xff] %vm310_vm0, %v294_v20  ;;  %374 = vst.msk [vmem:[#allocation2 + $0xe1] sm:$0xff] %vm310_vm0, %v295_v21  ;;  %v423_v28 = vld [vmem:[#allocation2 + $0x19] sm:$0xff]  ;;  %v9144_v29 = vpack.i.bf16 %v426_v27, %v425_v26  ;;  %v424_v30 = vld [vmem:[#allocation2 + $0x21] sm:$0xff] }
  0x34   : > { %375 = vst.msk [vmem:[#allocation2 + $0xf1] sm:$0xff] %vm310_vm0, %v296_v22  ;;  %376 = vst.msk [vmem:[#allocation2 + $0xf9] sm:$0xff] %vm310_vm0, %v297_v23  ;;  %v427_v31 = vld [vmem:[#allocation2 + $0x49] sm:$0xff]  ;;  %v428_v32 = vld [vmem:[#allocation2 + $0x51] sm:$0xff]  ;;  %v9146_v33 = vpack.i.bf16 %v424_v30, %v423_v28 }
  0x35   : > { %377 = vst.msk [vmem:[#allocation2 + $0x109] sm:$0xff] %vm310_vm0, %v298_v24  ;;  %378 = vst.msk [vmem:[#allocation2 + $0x111] sm:$0xff] %vm310_vm0, %v299_v25  ;;  %v429_v34 = vld [vmem:[#allocation2 + $0x61] sm:$0xff]  ;;  %7380 = vrot.lane.b32.xlu1 %v9144_v29, %s8906_s18  ;;  %v9152_v37 = vpack.i.bf16 %v428_v32, %v427_v31  ;;  %v430_v38 = vld [vmem:[#allocation2 + $0x69] sm:$0xff] }
  0x36   : > { %379 = vst.msk [vmem:[#allocation2 + $0x121] sm:$0xff] %vm310_vm0, %v300_v35  ;;  %380 = vst.msk [vmem:[#allocation2 + $0x129] sm:$0xff] %vm310_vm0, %v301_v36  ;;  %7375 = vrot.lane.b32.xlu0 %v9146_v33, %s8906_s18  ;;  %v9158_v39 = vpack.i.bf16 %v430_v38, %v429_v34  ;;  %v431_v40 = vld [vmem:[#allocation2 + $0x79] sm:$0xff]  ;;  %v432_v41 = vld [vmem:[#allocation2 + $0x81] sm:$0xff] }
  0x37   : > { %v433_v42 = vld [vmem:[#allocation2 + $0x91] sm:$0xff]  ;;  %v434_v43 = vld [vmem:[#allocation2 + $0x99] sm:$0xff]  ;;  %v9162_v45 = vpack.i.bf16 %v432_v41, %v431_v40  ;;  %381 = vst.msk [vmem:[#allocation2 + $0x139] sm:$0xff] %vm310_vm0, %v302_v50  ;;  %382 = vst.msk [vmem:[#allocation2 + $0x141] sm:$0xff] %vm310_vm0, %v303_v51 }
  0x38   : > { %v435_v44 = vld [vmem:[#allocation2 + $0xa9] sm:$0xff]  ;;  %v436_v46 = vld [vmem:[#allocation2 + $0xb1] sm:$0xff]  ;;  %v9166_v49 = vpack.i.bf16 %v434_v43, %v433_v42  ;;  %383 = vst.msk [vmem:[#allocation2 + $0x151] sm:$0xff] %vm310_vm0, %v304_v52  ;;  %384 = vst.msk [vmem:[#allocation2 + $0x159] sm:$0xff] %vm310_vm0, %v305_v53 }
  0x39   : > { %7385 = vrot.lane.b32.xlu1 %v9152_v37, %s8906_s18  ;;  %v437_v47 = vld [vmem:[#allocation2 + $0xc1] sm:$0xff]  ;;  %v438_v48 = vld [vmem:[#allocation2 + $0xc9] sm:$0xff]  ;;  %385 = vst.msk [vmem:[#allocation2 + $0x169] sm:$0xff] %vm310_vm0, %v306_v54  ;;  %386 = vst.msk [vmem:[#allocation2 + $0x171] sm:$0xff] %vm310_vm0, %v307_v55  ;;  %v9182_v56 = vpack.i.bf16 %v436_v46, %v435_v44 }
  0x3a   : > { %7390 = vrot.lane.b32.xlu0 %v9158_v39, %s8906_s18  ;;  %v9186_v57 = vpack.i.bf16 %v438_v48, %v437_v47  ;;  %v439_v58 = vld [vmem:[#allocation2 + $0xd9] sm:$0xff]  ;;  %v440_v59 = vld [vmem:[#allocation2 + $0xe1] sm:$0xff]  ;;  %2254 = vst.msk [vmem:[#allocation3] sm:$0xff] %vm1734_vm3, %v11544_v0  ;;  %2255 = vst.msk [vmem:[#allocation3 + $0x8] sm:$0xff] %vm1734_vm3, %v11544_v0 }
  0x3b   : > { %v441_v60 = vld [vmem:[#allocation2 + $0xf1] sm:$0xff]  ;;  %v442_v61 = vld [vmem:[#allocation2 + $0xf9] sm:$0xff]  ;;  %v9190_v62 = vpack.i.bf16 %v440_v59, %v439_v58  ;;  %2259 = vst.msk [vmem:[#allocation3 + $0x198] sm:$0xff] %vm1734_vm3, %v11544_v0  ;;  %2260 = vst.msk [vmem:[#allocation3 + $0x1a0] sm:$0xff] %vm1734_vm3, %v11544_v0 }
  0x3c   : > { %v7419_v63 = vpack.i.bf16 %v442_v61, %v441_v60  ;;  %v443_v1 = vld [vmem:[#allocation2 + $0x109] sm:$0xff]  ;;  %v444_v2 = vld [vmem:[#allocation2 + $0x111] sm:$0xff]  ;;  %5490 = vst.msk [vmem:[#allocation4] sm:$0xff] %vm1734_vm3, %v11544_v0  ;;  %5493 = vst.msk [vmem:[#allocation4 + $0x90] sm:$0xff] %vm1734_vm3, %v11544_v0 }
  0x3d   : > { %7395 = vrot.lane.b32.xlu1 %v9162_v45, %s8906_s18  ;;  %v445_v3 = vld [vmem:[#allocation2 + $0x121] sm:$0xff]  ;;  %v446_v4 = vld [vmem:[#allocation2 + $0x129] sm:$0xff]  ;;  %v7424_v5 = vpack.i.bf16 %v444_v2, %v443_v1  ;;  %v457_v21 = vld [vmem:[#allocation2 + $0x32] sm:$0xff] }
  0x3e   : > { %7400 = vrot.lane.b32.xlu0 %v9166_v49, %s8906_s18  ;;  %v7429_v6 = vpack.i.bf16 %v446_v4, %v445_v3  ;;  %v447_v7 = vld [vmem:[#allocation2 + $0x139] sm:$0xff]  ;;  %v448_v8 = vld [vmem:[#allocation2 + $0x141] sm:$0xff]  ;;  %v459_v25 = vld [vmem:[#allocation2 + $0x4a] sm:$0xff] }
  0x3f   : > { %v449_v9 = vld [vmem:[#allocation2 + $0x151] sm:$0xff]  ;;  %v450_v10 = vld [vmem:[#allocation2 + $0x159] sm:$0xff]  ;;  %v7434_v11 = vpack.i.bf16 %v448_v8, %v447_v7  ;;  %v456_v20 = vld [vmem:[#allocation2 + $0x22] sm:$0xff] }
  0x40   : > { %v7439_v12 = vpack.i.bf16 %v450_v10, %v449_v9  ;;  %v451_v13 = vld [vmem:[#allocation2 + $0x169] sm:$0xff]  ;;  %v452_v14 = vld [vmem:[#allocation2 + $0x171] sm:$0xff]  ;;  %v455_v19 = vld [vmem:[#allocation2 + $0x1a] sm:$0xff] }
  0x41   : > { %7405 = vrot.lane.b32.xlu1 %v9182_v56, %s8906_s18  ;;  %v7444_v17 = vpack.i.bf16 %v452_v14, %v451_v13  ;;  %v458_v22 = vld [vmem:[#allocation2 + $0x3a] sm:$0xff]  ;;  %v9214_v23 = vpack.i.bf16 %v456_v20, %v455_v19  ;;  %v460_v26 = vld [vmem:[#allocation2 + $0x52] sm:$0xff]  ;;  %v461_v27 = vld [vmem:[#allocation2 + $0x62] sm:$0xff] }
  0x42   : > { %7410 = vrot.lane.b32.xlu0 %v9186_v57, %s8906_s18  ;;  %v9217_v24 = vpack.i.bf16 %v458_v22, %v457_v21  ;;  %v462_v28 = vld [vmem:[#allocation2 + $0x6a] sm:$0xff]  ;;  %v463_v30 = vld [vmem:[#allocation2 + $0x7a] sm:$0xff]  ;;  %v464_v31 = vld [vmem:[#allocation2 + $0x82] sm:$0xff]  ;;  %v9221_v32 = vpack.i.bf16 %v460_v26, %v459_v25 }
  0x43   : > { %v465_v34 = vld [vmem:[#allocation2 + $0x92] sm:$0xff]  ;;  %v466_v35 = vld [vmem:[#allocation2 + $0x9a] sm:$0xff]  ;;  %v9225_v36 = vpack.i.bf16 %v462_v28, %v461_v27  ;;  %v9229_v38 = vpack.i.bf16 %v464_v31, %v463_v30  ;;  %v467_v41 = vld [vmem:[#allocation2 + $0xaa] sm:$0xff] }
  0x44   : > { %v9233_v40 = vpack.i.bf16 %v466_v35, %v465_v34  ;;  %v468_v42 = vld [vmem:[#allocation2 + $0xb2] sm:$0xff]  ;;  %v469_v43 = vld [vmem:[#allocation2 + $0xc2] sm:$0xff]  ;;  %v470_v44 = vld [vmem:[#allocation2 + $0xca] sm:$0xff] }
  0x45   : > { %7415 = vrot.lane.b32.xlu1 %v9190_v62, %s8906_s18  ;;  %v9237_v46 = vpack.i.bf16 %v468_v42, %v467_v41  ;;  %v9241_v47 = vpack.i.bf16 %v470_v44, %v469_v43  ;;  %v471_v48 = vld [vmem:[#allocation2 + $0xda] sm:$0xff]  ;;  %v472_v50 = vld [vmem:[#allocation2 + $0xe2] sm:$0xff]  ;;  %v473_v51 = vld [vmem:[#allocation2 + $0xf2] sm:$0xff] }
  0x46   : > { %7420 = vrot.lane.b32.xlu0 %v7419_v63, %s8906_s18  ;;  %v474_v52 = vld [vmem:[#allocation2 + $0xfa] sm:$0xff]  ;;  %v9245_v53 = vpack.i.bf16 %v472_v50, %v471_v48  ;;  %v475_v55 = vld [vmem:[#allocation2 + $0x10a] sm:$0xff]  ;;  %v476_v58 = vld [vmem:[#allocation2 + $0x112] sm:$0xff] }
  0x47   : > { %v9249_v54 = vpack.i.bf16 %v474_v52, %v473_v51  ;;  %v477_v59 = vld [vmem:[#allocation2 + $0x122] sm:$0xff]  ;;  %v478_v60 = vld [vmem:[#allocation2 + $0x12a] sm:$0xff]  ;;  %v7504_v61 = vpack.i.bf16 %v476_v58, %v475_v55  ;;  %v479_v1 = vld [vmem:[#allocation2 + $0x13a] sm:$0xff] }
  0x48   : > { %v7509_v63 = vpack.i.bf16 %v478_v60, %v477_v59  ;;  %v480_v2 = vld [vmem:[#allocation2 + $0x142] sm:$0xff]  ;;  %v481_v3 = vld [vmem:[#allocation2 + $0x152] sm:$0xff]  ;;  %v482_v4 = vld [vmem:[#allocation2 + $0x15a] sm:$0xff] }
  0x49   : > { %7425 = vrot.lane.b32.xlu1 %v7424_v5, %s8906_s18  ;;  %v7514_v5 = vpack.i.bf16 %v480_v2, %v479_v1  ;;  %v483_v7 = vld [vmem:[#allocation2 + $0x16a] sm:$0xff]  ;;  %v484_v8 = vld [vmem:[#allocation2 + $0x172] sm:$0xff]  ;;  %v9259_v10 = vld [vmem:[#allocation2 + $0x20] sm:$0xff] }
  0x4a   : > { %7430 = vrot.lane.b32.xlu0 %v7429_v6, %s8906_s18  ;;  %v7519_v6 = vpack.i.bf16 %v482_v4, %v481_v3  ;;  %v9257_v9 = vld [vmem:[#allocation2 + $0x18] sm:$0xff]  ;;  %v9265_v13 = vld [vmem:[#allocation2 + $0x30] sm:$0xff]  ;;  %v9269_v15 = vld [vmem:[#allocation2 + $0x48] sm:$0xff] }
  0x4b   : > { %v9267_v14 = vld [vmem:[#allocation2 + $0x38] sm:$0xff]  ;;  %v9271_v16 = vld [vmem:[#allocation2 + $0x50] sm:$0xff]  ;;  %v9283_v19 = vld [vmem:[#allocation2 + $0x60] sm:$0xff] }
  0x4c   : > { %v9285_v20 = vld [vmem:[#allocation2 + $0x68] sm:$0xff]  ;;  %v9287_v21 = vld [vmem:[#allocation2 + $0x78] sm:$0xff]  ;;  %v9289_v22 = vld [vmem:[#allocation2 + $0x80] sm:$0xff] }
  0x4d   : > { %7435 = vrot.lane.b32.xlu1 %v7434_v11, %s8906_s18  ;;  %v7524_v11 = vpack.i.bf16 %v484_v8, %v483_v7  ;;  %v9295_v25 = vpack.i.bf16 %v9285_v20, %v9283_v19  ;;  %v9301_v26 = vpack.i.bf16 %v9289_v22, %v9287_v21  ;;  %v9303_v27 = vld [vmem:[#allocation2 + $0x90] sm:$0xff]  ;;  %v9305_v28 = vld [vmem:[#allocation2 + $0x98] sm:$0xff]  ;;  %v497_v30 = vld [vmem:[#allocation2 + $0xa8] sm:$0xff] }
  0x4e   : > { %7440 = vrot.lane.b32.xlu0 %v7439_v12, %s8906_s18  ;;  %v7529_v12 = vpack.i.bf16 %v9259_v10, %v9257_v9  ;;  %11576 = vst [vmem:[#allocation8_spill] sm:$0xff] %v9303_v27  ;;  %11577 = vst [vmem:[#allocation9_spill] sm:$0xff] %v9305_v28  ;;  %v9307_v31 = vld [vmem:[#allocation2 + $0xb0] sm:$0xff]  ;;  %v9313_v34 = vpack.i.bf16 %v9305_v28, %v9303_v27  ;;  %v499_v41 = vld [vmem:[#allocation2 + $0xc0] sm:$0xff] }
  0x4f   : > { %11578 = vst [vmem:[#allocation10_spill] sm:$0xff] %v9307_v31  ;;  %v9318_v35 = vpack.i.bf16 %v9307_v31, %v497_v30  ;;  %v500_v42 = vld [vmem:[#allocation2 + $0xc8] sm:$0xff]  ;;  %v501_v43 = vld [vmem:[#allocation2 + $0xd8] sm:$0xff]  ;;  %v502_v44 = vld [vmem:[#allocation2 + $0xe0] sm:$0xff] }
  0x50   : > { %v9322_v48 = vpack.i.bf16 %v500_v42, %v499_v41  ;;  %v9326_v50 = vpack.i.bf16 %v502_v44, %v501_v43  ;;  %v503_v51 = vld [vmem:[#allocation2 + $0xf0] sm:$0xff]  ;;  %v504_v52 = vld [vmem:[#allocation2 + $0xf8] sm:$0xff]  ;;  %v505_v55 = vld [vmem:[#allocation2 + $0x108] sm:$0xff] }
  0x51   : > { %7445 = vrot.lane.b32.xlu1 %v7444_v17, %s8906_s18  ;;  %v9276_v17 = vpack.i.bf16 %v9267_v14, %v9265_v13  ;;  %v506_v58 = vld [vmem:[#allocation2 + $0x110] sm:$0xff]  ;;  %v9330_v59 = vpack.i.bf16 %v504_v52, %v503_v51  ;;  %v509_v1 = vld [vmem:[#allocation2 + $0x138] sm:$0xff]  ;;  %v510_v2 = vld [vmem:[#allocation2 + $0x140] sm:$0xff] }
  0x52   : > { %7450 = vrot.lane.b32.xlu0 %v7449_v18, %s8907_s19  ;;  %v9281_v18 = vpack.i.bf16 %v9271_v16, %v9269_v15  ;;  %v9334_v60 = vpack.i.bf16 %v506_v58, %v505_v55  ;;  %v9342_v4 = vpack.i.bf16 %v510_v2, %v509_v1  ;;  %v513_v7 = vld [vmem:[#allocation2 + $0x168] sm:$0xff]  ;;  %v514_v8 = vld [vmem:[#allocation2 + $0x170] sm:$0xff]  ;;  %v8809_v30 = vld [vmem:[%s11537_s1] sm:$0xff]  }
  0x53   : > { %7215 = vmatprep.subr.bf16.mxu0 %v8809_v30  ;;  %v8810_v41 = vld [vmem:[%s11537_s1 + $0x8] sm:$0xff]   ;;  %v308_v42 = vld [vmem:[%s9097_s17 + $0xf0] sm:$0xff]  ;;  %v309_v43 = vld [vmem:[%s9097_s17 + $0xf8] sm:$0xff]  ;;  %s8913_s17 = smov 32  }
  0x54   : > { %7216 = vmatpush3.bf16.msra.mxu0 %v8809_v30  ;;  %387 = vst.msk [vmem:[#allocation2 + $0x181] sm:$0xff] %vm310_vm0, %v308_v42  ;;  %388 = vst.msk [vmem:[#allocation2 + $0x189] sm:$0xff] %vm310_vm0, %v309_v43  ;;  %v632_v42 = vld [vmem:[#allocation2 + $0x109] sm:$0xff]  ;;  %v633_v43 = vld [vmem:[#allocation2 + $0x111] sm:$0xff] }
  0x55   : > { %7455 = vrot.lane.b32.xlu1 %v9214_v23, %s8907_s19  ;;  %7217 = vmatprep.subr.bf16.mxu0 %v8810_v41 }
  0x56   : > { %7460 = vrot.lane.b32.xlu0 %v9217_v24, %s8907_s19 }
  0x58   : > { %7218 = vmatpush3.bf16.msra.mxu0 %v8810_v41 }
  0x59   : > { %7465 = vrot.lane.b32.xlu1 %v9221_v32, %s8907_s19 }
  0x5a   : > { %7470 = vrot.lane.b32.xlu0 %v9225_v36, %s8907_s19 }
  0x5d   : > { %7475 = vrot.lane.b32.xlu1 %v9229_v38, %s8907_s19 }
  0x5e   : > { %7480 = vrot.lane.b32.xlu0 %v9233_v40, %s8907_s19 }
  0x61   : > { %7485 = vrot.lane.b32.xlu1 %v9237_v46, %s8907_s19 }
  0x62   : > { %7490 = vrot.lane.b32.xlu0 %v9241_v47, %s8907_s19 }
  0x65   : > { %7495 = vrot.lane.b32.xlu1 %v9245_v53, %s8907_s19 }
  0x66   : > { %7500 = vrot.lane.b32.xlu0 %v9249_v54, %s8907_s19 }
  0x69   : > { %7505 = vrot.lane.b32.xlu1 %v7504_v61, %s8907_s19  ;;  %v507_v61 = vld [vmem:[#allocation2 + $0x120] sm:$0xff] }
  0x6a   : > { %7510 = vrot.lane.b32.xlu0 %v7509_v63, %s8907_s19  ;;  %v508_v63 = vld [vmem:[#allocation2 + $0x128] sm:$0xff] }
  0x6b   : > { %v9338_v3 = vpack.i.bf16 %v508_v63, %v507_v61 }
  0x6d   : > { %7515 = vrot.lane.b32.xlu1 %v7514_v5, %s8907_s19  ;;  %v511_v5 = vld [vmem:[#allocation2 + $0x150] sm:$0xff] }
  0x6e   : > { %7520 = vrot.lane.b32.xlu0 %v7519_v6, %s8907_s19  ;;  %v512_v6 = vld [vmem:[#allocation2 + $0x158] sm:$0xff] }
  0x71   : > { %7525 = vrot.lane.b32.xlu1 %v7524_v11, %s8907_s19  ;;  %v7594_v11 = vpack.i.bf16 %v512_v6, %v511_v5  ;;  %v534_v6 = vld [vmem:[#allocation2 + $0xe1] sm:$0xff] }
  0x72   : > { %7530 = vrot.lane.b32.xlu0 %v7529_v12, %s8908_s20  ;;  %v7599_v12 = vpack.i.bf16 %v514_v8, %v513_v7  ;;  %v535_v8 = vld [vmem:[#allocation2 + $0xf1] sm:$0xff] }
  0x75   : > { %7535 = vrot.lane.b32.xlu1 %v9276_v17, %s8908_s20 }
  0x76   : > { %7540 = vrot.lane.b32.xlu0 %v9281_v18, %s8908_s20 }
  0x79   : > { %7545 = vrot.lane.b32.xlu1 %v9295_v25, %s8908_s20 }
  0x7a   : > { %7550 = vrot.lane.b32.xlu0 %v9301_v26, %s8908_s20 }
  0x7d   : > { %7555 = vrot.lane.b32.xlu1 %v9313_v34, %s8908_s20 }
  0x7e   : > { %7560 = vrot.lane.b32.xlu0 %v9318_v35, %s8908_s20 }
  0x81   : > { %7565 = vrot.lane.b32.xlu1 %v9322_v48, %s8908_s20 }
  0x82   : > { %7570 = vrot.lane.b32.xlu0 %v9326_v50, %s8908_s20 }
  0x85   : > { %7575 = vrot.lane.b32.xlu1 %v9330_v59, %s8908_s20 }
  0x86   : > { %7580 = vrot.lane.b32.xlu0 %v9334_v60, %s8908_s20 }
  0x89   : > { %7585 = vrot.lane.b32.xlu1 %v9338_v3, %s8908_s20 }
  0x8a   : > { %7590 = vrot.lane.b32.xlu0 %v9342_v4, %s8908_s20 }
  0x8d   : > { %7595 = vrot.lane.b32.xlu1 %v7594_v11, %s8908_s20  ;;  %v536_v11 = vld [vmem:[#allocation2 + $0xf9] sm:$0xff] }
  0x8e   : > { %7600 = vrot.lane.b32.xlu0 %v7599_v12, %s8908_s20  ;;  %v7809_v12 = vpack.i.bf16 %v536_v11, %v535_v8  ;;  %v665_v11 = vld [vmem:[#allocation2 + $0x112] sm:$0xff] }
  0x91   : > { %7605 = vrot.lane.b32.xlu1 %v9146_v33, %s8909_s23  ;;  %v8811_v33 = vld [vmem:[%s11537_s1 + $0x10] ss:$0 sps:$4 sm:$0x33]  }
  0x92   : > { %7610 = vrot.lane.b32.xlu0 %v9144_v29, %s8909_s23  ;;  %7313 = vmatprep.subr.msk.bf16.mxu0 %vm2057_vm4, %v8811_v33  ;;  %v2059_v44 = vsel %vm2057_vm4, %v8811_v33, 0  ;;  %vm11573_vm4 = vcmask 588800  }
  0x93   : > { %7220 = vmatpush3.bf16.msra.mxu0 %v2059_v44  ;;  %v7839_v44 = vpack.i.bf16 %v633_v43, %v632_v42 }
  0x95   : > { %7615 = vrot.lane.b32.xlu1 %v9214_v23, %s8910_s9  ;;  %v9383_v23 = vpop.permute.xlu0 %7370 }
  0x96   : > { %7620 = vrot.lane.b32.xlu0 %v9217_v24, %s8910_s9 }
  0x99   : > { %7625 = vrot.lane.b32.xlu1 %v9276_v17, %s8911_s15 }
  0x9a   : > { %7630 = vrot.lane.b32.xlu0 %v9281_v18, %s8911_s15 }
  0x9d   : > { %7635 = vrot.lane.b32.xlu1 %v9144_v29, %s8912_s16 }
  0x9e   : > { %7640 = vrot.lane.b32.xlu0 %v9152_v37, %s8912_s16 }
  0xa1   : > { %7645 = vrot.lane.b32.xlu1 %v9217_v24, %s8913_s17 }
  0xa2   : > { %7650 = vrot.lane.b32.xlu0 %v9221_v32, %s8913_s17 }
  0xa5   : > { %7655 = vrot.lane.b32.xlu1 %v9152_v37, %s8909_s23 }
  0xa6   : > { %7660 = vrot.lane.b32.xlu0 %v9158_v39, %s8909_s23 }
  0xa7   : > { %v9389_v17 = vpop.permute.xlu1 %7380 }
  0xa8   : > { %v9391_v29 = vpop.permute.xlu0 %7375 }
  0xa9   : > { %7665 = vrot.lane.b32.xlu1 %v9221_v32, %s8910_s9 }
  0xaa   : > { %7670 = vrot.lane.b32.xlu0 %v9225_v36, %s8910_s9 }
  0xab   : > { %v9397_v24 = vpop.permute.xlu1 %7385 }
  0xac   : > { %v9399_v18 = vpop.permute.xlu0 %7390 }
  0xad   : > { %7675 = vrot.lane.b32.xlu1 %v9295_v25, %s8911_s15 }
  0xae   : > { %7680 = vrot.lane.b32.xlu0 %v9301_v26, %s8911_s15 }
  0xaf   : > { %v9405_v37 = vpop.permute.xlu1 %7395 }
  0xb0   : > { %v9407_v51 = vpop.permute.xlu0 %7400 }
  0xb1   : > { %7685 = vrot.lane.b32.xlu1 %v9158_v39, %s8912_s16 }
  0xb2   : > { %7690 = vrot.lane.b32.xlu0 %v9162_v45, %s8912_s16 }
  0xb3   : > { %v9413_v32 = vpop.permute.xlu1 %7405 }
  0xb4   : > { %v9415_v52 = vpop.permute.xlu0 %7410 }
  0xb5   : > { %11579 = vst [vmem:[#allocation11_spill] sm:$0xff] %v9415_v52  ;;  %7695 = vrot.lane.b32.xlu1 %v9225_v36, %s8913_s17 }
  0xb6   : > { %7700 = vrot.lane.b32.xlu0 %v9229_v38, %s8913_s17 }
  0xb7   : > { %v9421_v25 = vpop.permute.xlu1 %7415 }
  0xb8   : > { %11580 = vst [vmem:[#allocation12_spill] sm:$0xff] %v9421_v25  ;;  %v9423_v26 = vpop.permute.xlu0 %7420 }
  0xb9   : > { %11581 = vst [vmem:[#allocation13_spill] sm:$0xff] %v9423_v26  ;;  %7705 = vrot.lane.b32.xlu1 %v9162_v45, %s8909_s23  ;;  %v673_v26 = vld [vmem:[#allocation2 + $0x172] sm:$0xff] }
  0xba   : > { %7710 = vrot.lane.b32.xlu0 %v9166_v49, %s8909_s23 }
  0xbb   : > { %v9429_v39 = vpop.permute.xlu1 %7425 }
  0xbc   : > { %11582 = vst [vmem:[#allocation14_spill] sm:$0xff] %v9429_v39  ;;  %v9431_v55 = vpop.permute.xlu0 %7430  ;;  %v672_v39 = vld [vmem:[#allocation2 + $0x16a] sm:$0xff] }
  0xbd   : > { %11583 = vst [vmem:[#allocation15_spill] sm:$0xff] %v9431_v55  ;;  %7715 = vrot.lane.b32.xlu1 %v9229_v38, %s8910_s9  ;;  %v544_v55 = vld [vmem:[#allocation2 + $0x159] sm:$0xff] }
  0xbe   : > { %7720 = vrot.lane.b32.xlu0 %v9233_v40, %s8910_s9 }
  0xbf   : > { %v9437_v36 = vpop.permute.xlu1 %7435 }
  0xc0   : > { %11584 = vst [vmem:[#allocation16_spill] sm:$0xff] %v9437_v36  ;;  %v9439_v58 = vpop.permute.xlu0 %7440  ;;  %v543_v36 = vld [vmem:[#allocation2 + $0x151] sm:$0xff] }
  0xc1   : > { %11585 = vst [vmem:[#allocation17_spill] sm:$0xff] %v9439_v58  ;;  %7725 = vrot.lane.b32.xlu1 %v9313_v34, %s8911_s15  ;;  %v572_v58 = vld [vmem:[#allocation2 + $0x12a] sm:$0xff] }
  0xc2   : > { %7730 = vrot.lane.b32.xlu0 %v9318_v35, %s8911_s15 }
  0xc3   : > { %v9445_v45 = vpop.permute.xlu1 %7445 }
  0xc4   : > { %11586 = vst [vmem:[#allocation18_spill] sm:$0xff] %v9445_v45  ;;  %v9447_v61 = vpop.permute.xlu0 %7450  ;;  %v571_v45 = vld [vmem:[#allocation2 + $0x122] sm:$0xff] }
  0xc5   : > { %7735 = vrot.lane.b32.xlu1 %v9166_v49, %s8912_s16  ;;  %v7452_v25 = vunpack.i.l.bf16 %v9447_v61 }
  0xc6   : > { %7740 = vrot.lane.b32.xlu0 %v9182_v56, %s8912_s16 }
  0xc7   : > { %v9453_v38 = vpop.permute.xlu1 %7455 }
  0xc8   : > { %v9455_v63 = vpop.permute.xlu0 %7460 }
  0xc9   : > { %7745 = vrot.lane.b32.xlu1 %v9233_v40, %s8913_s17 }
  0xca   : > { %7750 = vrot.lane.b32.xlu0 %v9237_v46, %s8913_s17 }
  0xcb   : > { %v9461_v34 = vpop.permute.xlu1 %7465 }
  0xcc   : > { %v9463_v35 = vpop.permute.xlu0 %7470 }
  0xcd   : > { %7755 = vrot.lane.b32.xlu1 %v9182_v56, %s8909_s23 }
  0xce   : > { %7760 = vrot.lane.b32.xlu0 %v9186_v57, %s8909_s23 }
  0xcf   : > { %v9469_v49 = vpop.permute.xlu1 %7475 }
  0xd0   : > { %v9471_v1 = vpop.permute.xlu0 %7480 }
  0xd1   : > { %7765 = vrot.lane.b32.xlu1 %v9237_v46, %s8910_s9  ;;  %v533_v46 = vld [vmem:[#allocation2 + $0xd9] sm:$0xff] }
  0xd2   : > { %7770 = vrot.lane.b32.xlu0 %v9241_v47, %s8910_s9 }
  0xd3   : > { %v9477_v40 = vpop.permute.xlu1 %7485 }
  0xd4   : > { %v9479_v2 = vpop.permute.xlu0 %7490 }
  0xd5   : > { %11587 = vst [vmem:[#allocation19_spill] sm:$0xff] %v9479_v2  ;;  %7775 = vrot.lane.b32.xlu1 %v9322_v48, %s8911_s15  ;;  %v7453_v2 = vunpack.i.h.bf16 %v9447_v61 }
  0xd6   : > { %7780 = vrot.lane.b32.xlu0 %v9326_v50, %s8911_s15  ;;  %v7804_v50 = vpack.i.bf16 %v534_v6, %v533_v46  ;;  %v662_v46 = vld [vmem:[#allocation2 + $0xf2] sm:$0xff]  ;;  %v663_v6 = vld [vmem:[#allocation2 + $0xfa] sm:$0xff] }
  0xd7   : > { %v9485_v56 = vpop.permute.xlu1 %7495 }
  0xd8   : > { %11588 = vst [vmem:[#allocation20_spill] sm:$0xff] %v9485_v56  ;;  %v9487_v5 = vpop.permute.xlu0 %7500  ;;  %v7377_v56 = vunpack.i.l.bf16 %v9391_v29 }
  0xd9   : > { %11589 = vst [vmem:[#allocation21_spill] sm:$0xff] %v9487_v5  ;;  %7785 = vrot.lane.b32.xlu1 %v9186_v57, %s8912_s16  ;;  %v641_v5 = vld [vmem:[#allocation2 + $0x171] sm:$0xff] }
  0xda   : > { %7790 = vrot.lane.b32.xlu0 %v9190_v62, %s8912_s16 }
  0xdb   : > { %v9493_v7 = vpop.permute.xlu1 %7505 }
  0xdc   : > { %11590 = vst [vmem:[#allocation22_spill] sm:$0xff] %v9493_v7  ;;  %v9495_v48 = vpop.permute.xlu0 %7510 }
  0xdd   : > { %11591 = vst [vmem:[#allocation23_spill] sm:$0xff] %v9495_v48  ;;  %7795 = vrot.lane.b32.xlu1 %v9241_v47, %s8913_s17 }
  0xde   : > { %7800 = vrot.lane.b32.xlu0 %v9245_v53, %s8913_s17 }
  0xdf   : > { %v9501_v57 = vpop.permute.xlu1 %7515 }
  0xe0   : > { %11592 = vst [vmem:[#allocation24_spill] sm:$0xff] %v9501_v57  ;;  %v9503_v30 = vpop.permute.xlu0 %7520  ;;  %v669_v57 = vld [vmem:[#allocation2 + $0x142] sm:$0xff] }
  0xe1   : > { %11593 = vst [vmem:[#allocation25_spill] sm:$0xff] %v9503_v30  ;;  %7805 = vrot.lane.b32.xlu1 %v7804_v50, %s8909_s23  ;;  %v7844_v50 = vpack.i.bf16 %v663_v6, %v662_v46  ;;  %v540_v30 = vld [vmem:[#allocation2 + $0x129] sm:$0xff]  ;;  %v7869_v46 = vpack.i.bf16 %v572_v58, %v571_v45 }
  0xe2   : > { %7810 = vrot.lane.b32.xlu0 %v7809_v12, %s8909_s23 }
  0xe3   : > { %v9507_v62 = vpop.permute.xlu1 %7525 }
  0xe4   : > { %11594 = vst [vmem:[#allocation26_spill] sm:$0xff] %v9507_v62  ;;  %v9509_v41 = vpop.permute.xlu0 %7530 }
  0xe5   : > { %7815 = vrot.lane.b32.xlu1 %v9245_v53, %s8910_s9  ;;  %v664_v53 = vld [vmem:[#allocation2 + $0x10a] sm:$0xff]  ;;  %v7532_v31 = vunpack.i.l.bf16 %v9509_v41 }
  0xe6   : > { %7820 = vrot.lane.b32.xlu0 %v9249_v54, %s8910_s9  ;;  %v7849_v0 = vpack.i.bf16 %v665_v11, %v664_v53  ;;  %v636_v11 = vld [vmem:[#allocation2 + $0x139] sm:$0xff] }
  0xe7   : > { %v9515_v47 = vpop.permute.xlu1 %7535 }
  0xe8   : > { %v9517_v33 = vpop.permute.xlu0 %7540  ;;  %v7538_v28 = vunpack.i.h.bf16 %v9515_v47 }
  0xe9   : > { %7825 = vrot.lane.b32.xlu1 %v9330_v59, %s8911_s15  ;;  %v539_v59 = vld [vmem:[#allocation2 + $0x121] sm:$0xff] }
  0xea   : > { %7830 = vrot.lane.b32.xlu0 %v9334_v60, %s8911_s15  ;;  %v7859_v42 = vpack.i.bf16 %v540_v30, %v539_v59 }
  0xeb   : > { %v9523_v8 = vpop.permute.xlu1 %7545 }
  0xec   : > { %v9525_v54 = vpop.permute.xlu0 %7550 }
  0xed   : > { %7835 = vrot.lane.b32.xlu1 %v7809_v12, %s8912_s16 }
  0xee   : > { %7840 = vrot.lane.b32.xlu0 %v7839_v44, %s8912_s16 }
  0xef   : > { %v9529_v62 = vpop.permute.xlu1 %7555 }
  0xf0   : > { %v9531_v60 = vpop.permute.xlu0 %7560 }
  0xf1   : > { %7845 = vrot.lane.b32.xlu1 %v7844_v50, %s8913_s17  ;;  %v637_v50 = vld [vmem:[#allocation2 + $0x141] sm:$0xff] }
  0xf2   : > { %7850 = vrot.lane.b32.xlu0 %v7849_v0, %s8913_s17  ;;  %v7889_v58 = vpack.i.bf16 %v637_v50, %v636_v11  ;;  %v9567_v11 = vld [vmem:[#allocation2 + $0x158] sm:$0xff]  ;;  %v9572_v50 = vld [vmem:[#allocation2 + $0x170] sm:$0xff] }
  0xf3   : > { %v9535_v43 = vpop.permute.xlu1 %7565 }
  0xf4   : > { %11595 = vst [vmem:[#allocation27_spill] sm:$0xff] %v9535_v43  ;;  %v9537_v12 = vpop.permute.xlu0 %7570  ;;  %v9596_v43 = vpack.i.bf16 %v673_v26, %v672_v39 }
  0xf5   : > { %11596 = vst [vmem:[#allocation28_spill] sm:$0xff] %v9537_v12  ;;  %7855 = vrot.lane.b32.xlu1 %v7839_v44, %s8909_s23  ;;  %v668_v44 = vld [vmem:[#allocation2 + $0x13a] sm:$0xff]  ;;  %v7378_v12 = vunpack.i.h.bf16 %v9391_v29  ;;  %v7533_v29 = vunpack.i.h.bf16 %v9509_v41  ;;  %v1704_v41 = vsel %vm310_vm0, %v9257_v9, %v7377_v56 }
  0xf6   : > { %7860 = vrot.lane.b32.xlu0 %v7859_v42, %s8909_s23  ;;  %v7899_v48 = vpack.i.bf16 %v669_v57, %v668_v44  ;;  %v640_v57 = vld [vmem:[#allocation2 + $0x169] sm:$0xff]  ;;  %v7373_v44 = vunpack.i.h.bf16 %v9383_v23 }
  0xf7   : > { %v9541_v6 = vpop.permute.xlu1 %7575  ;;  %v9594_v61 = vpack.i.bf16 %v641_v5, %v640_v57  ;;  %v1705_v5 = vsel %vm310_vm0, %v9259_v10, %v7378_v12 }
  0xf8   : > { %11597 = vst [vmem:[#allocation29_spill] sm:$0xff] %v9541_v6  ;;  %v9543_v53 = vpop.permute.xlu0 %7580  ;;  %v390_v6 = vld [vmem:[#allocation2 + $0x8] sm:$0xff] }
  0xf9   : > { %11598 = vst [vmem:[#allocation30_spill] sm:$0xff] %v9543_v53  ;;  %7865 = vrot.lane.b32.xlu1 %v7849_v0, %s8910_s9 }
  0xfa   : > { %7870 = vrot.lane.b32.xlu0 %v7869_v46, %s8910_s9 }
  0xfb   : > { %v9547_v30 = vpop.permute.xlu1 %7585 }
  0xfc   : > { %11599 = vst [vmem:[#allocation31_spill] sm:$0xff] %v9547_v30  ;;  %v9549_v59 = vpop.permute.xlu0 %7590  ;;  %v576_v30 = vld [vmem:[#allocation2 + $0x15a] sm:$0xff] }
  0xfd   : > { %11600 = vst [vmem:[#allocation32_spill] sm:$0xff] %v9549_v59  ;;  %7875 = vrot.lane.b32.xlu1 %v9338_v3, %s8911_s15  ;;  %v575_v3 = vld [vmem:[#allocation2 + $0x152] sm:$0xff] }
  0xfe   : > { %7880 = vrot.lane.b32.xlu0 %v9342_v4, %s8911_s15  ;;  %v9565_v4 = vld [vmem:[#allocation2 + $0x150] sm:$0xff]  ;;  %v9579_v7 = vpack.i.bf16 %v576_v30, %v575_v3 }
  0xff   : > { %v9555_v45 = vpop.permute.xlu1 %7595  ;;  %v7924_v3 = vpack.i.bf16 %v9567_v11, %v9565_v4  ;;  %v7537_v4 = vunpack.i.l.bf16 %v9515_v47 }
 0x100   : > { %11601 = vst [vmem:[#allocation33_spill] sm:$0xff] %v9555_v45  ;;  %v9557_v0 = vpop.permute.xlu0 %7600  ;;  %v9577_v45 = vpack.i.bf16 %v544_v55, %v543_v36  ;;  %v7458_v55 = vunpack.i.h.bf16 %v9453_v38  ;;  %v7457_v36 = vunpack.i.l.bf16 %v9453_v38  ;;  %v1703_v38 = vsel %vm310_vm0, %v390_v6, %v7373_v44 }
 0x101   : > { %11602 = vst [vmem:[#allocation34_spill] sm:$0xff] %v9557_v0  ;;  %7885 = vrot.lane.b32.xlu1 %v7859_v42, %s8912_s16  ;;  %v9570_v42 = vld [vmem:[#allocation2 + $0x168] sm:$0xff]  ;;  %v7372_v0 = vunpack.i.l.bf16 %v9383_v23  ;;  %v1736_v26 = vsel %vm1734_vm3, %v1703_v38, %v7453_v2 }
 0x102   : > { %7890 = vrot.lane.b32.xlu0 %v7889_v58, %s8912_s16  ;;  %v7929_v52 = vpack.i.bf16 %v9572_v50, %v9570_v42  ;;  %v1738_v47 = vsel %vm1734_vm3, %v1705_v5, %v7458_v55  ;;  %v1769_v56 = vsel %vm1767_vm5, %v1736_v26, %v7533_v29 }
 0x103   : > { %v9561_v59 = vpop.permute.xlu1 %7605 }
 0x104   : > { %v9563_v53 = vpop.permute.xlu0 %7610  ;;  %v7607_v11 = vunpack.i.l.bf16 %v9561_v59 }
 0x105   : > { %7895 = vrot.lane.b32.xlu1 %v7869_v46, %s8913_s17  ;;  %v389_v46 = vld [vmem:[#allocation2] sm:$0xff]  ;;  %v7613_v10 = vunpack.i.h.bf16 %v9563_v53  ;;  %v7612_v2 = vunpack.i.l.bf16 %v9563_v53 }
 0x106   : > { %7900 = vrot.lane.b32.xlu0 %v7899_v48, %s8913_s17  ;;  %v1702_v27 = vsel %vm310_vm0, %v389_v46, %v7372_v0  ;;  %v7608_v0 = vunpack.i.h.bf16 %v9561_v59 }
 0x107   : > { %v7616_v23 = vpop.permute.xlu1 %7615  ;;  %v1735_v39 = vsel %vm1734_vm3, %v1702_v27, %v7452_v25  ;;  %v1771_v25 = vsel %vm1767_vm5, %v1738_v47, %v7538_v28 }
 0x108   : > { %v7621_v30 = vpop.permute.xlu0 %7620  ;;  %v1768_v9 = vsel %vm1767_vm5, %v1735_v39, %v7532_v31  ;;  %v7618_v12 = vunpack.i.h.bf16 %v7616_v23  ;;  %v7617_v50 = vunpack.i.l.bf16 %v7616_v23  ;;  %v1802_v53 = vsel %vm1800_vm6, %v1769_v56, %v7608_v0 }
 0x109   : > { %7905 = vrot.lane.b32.xlu1 %v7889_v58, %s8909_s23  ;;  %v1737_v58 = vsel %vm1734_vm3, %v1704_v41, %v7457_v36  ;;  %v7623_v59 = vunpack.i.h.bf16 %v7621_v30  ;;  %v7622_v31 = vunpack.i.l.bf16 %v7621_v30  ;;  %v1801_v55 = vsel %vm1800_vm6, %v1768_v9, %v7607_v11 }
 0x10a   : > { %7910 = vrot.lane.b32.xlu0 %v9577_v45, %s8909_s23  ;;  %v1770_v27 = vsel %vm1767_vm5, %v1737_v58, %v7537_v4  ;;  %v1804_v23 = vsel %vm1800_vm6, %v1771_v25, %v7613_v10  ;;  %v1834_v30 = vsel %vm1833_vm7, %v1801_v55, %v7617_v50  ;;  %v1835_v41 = vsel %vm1833_vm7, %v1802_v53, %v7618_v12 }
 0x10b   : > { %v7626_v6 = vpop.permute.xlu1 %7625  ;;  %v1803_v28 = vsel %vm1800_vm6, %v1770_v27, %v7612_v2 }
 0x10c   : > { %v7631_v42 = vpop.permute.xlu0 %7630  ;;  %v7628_v57 = vunpack.i.h.bf16 %v7626_v6  ;;  %v7627_v44 = vunpack.i.l.bf16 %v7626_v6  ;;  %v1836_v39 = vsel %vm1833_vm7, %v1803_v28, %v7622_v31  ;;  %v1837_v6 = vsel %vm1833_vm7, %v1804_v23, %v7623_v59  ;;  %v515_v31 = vld [vmem:[#allocation2 + $0x180] sm:$0xff]  ;;  %v548_v23 = vld [vmem:[#allocation2 + $0x189] sm:$0xff] }
 0x10d   : > { %7915 = vrot.lane.b32.xlu1 %v7899_v48, %s8910_s9  ;;  %v7633_v48 = vunpack.i.h.bf16 %v7631_v42  ;;  %v7632_v36 = vunpack.i.l.bf16 %v7631_v42 }
 0x10e   : > { %7920 = vrot.lane.b32.xlu0 %v9579_v7, %s8910_s9  ;;  %v1867_v47 = vsel %vm1866_vm8, %v1834_v30, %v7627_v44  ;;  %v1868_v0 = vsel %vm1866_vm8, %v1835_v41, %v7628_v57  ;;  %v516_v57 = vld [vmem:[#allocation2 + $0x188] sm:$0xff]  ;;  %v7383_v30 = vunpack.i.h.bf16 %v9389_v17  ;;  %v9663_v41 = vld [vmem:[#allocation2 + $0x198] sm:$0xff] }
 0x10f   : > { %v7636_v46 = vpop.permute.xlu1 %7635  ;;  %v1869_v11 = vsel %vm1866_vm8, %v1836_v39, %v7632_v36  ;;  %v547_v36 = vld [vmem:[#allocation2 + $0x181] sm:$0xff]  ;;  %v9657_v28 = vpack.i.bf16 %v516_v57, %v515_v31  ;;  %v7463_v39 = vunpack.i.h.bf16 %v9455_v63 }
 0x110   : > { %v7641_v29 = vpop.permute.xlu0 %7640  ;;  %v7638_v38 = vunpack.i.h.bf16 %v7636_v46  ;;  %v7637_v4 = vunpack.i.l.bf16 %v7636_v46 }
 0x111   : > { %7925 = vrot.lane.b32.xlu1 %v7924_v3, %s8911_s15  ;;  %v7643_v5 = vunpack.i.h.bf16 %v7641_v29  ;;  %v7642_v26 = vunpack.i.l.bf16 %v7641_v29  ;;  %v1870_v3 = vsel %vm1866_vm8, %v1837_v6, %v7633_v48  ;;  %v7382_v29 = vunpack.i.l.bf16 %v9389_v17  ;;  %v9673_v17 = vld [vmem:[#allocation2 + $0x1a1] sm:$0xff] }
 0x112   : > { %7930 = vrot.lane.b32.xlu0 %v7929_v52, %s8911_s15  ;;  %v1900_v52 = vsel %vm1899_vm9, %v1867_v47, %v7637_v4  ;;  %v1901_v27 = vsel %vm1899_vm9, %v1868_v0, %v7638_v38  ;;  %v579_v38 = vld [vmem:[#allocation2 + $0x182] sm:$0xff]  ;;  %v580_v4 = vld [vmem:[#allocation2 + $0x18a] sm:$0xff]  ;;  %v7462_v6 = vunpack.i.l.bf16 %v9455_v63  ;;  %v9671_v47 = vld [vmem:[#allocation2 + $0x199] sm:$0xff]  ;;  %v7468_v0 = vunpack.i.h.bf16 %v9461_v34 }
 0x113   : > { %v7646_v58 = vpop.permute.xlu1 %7645  ;;  %v1902_v25 = vsel %vm1899_vm9, %v1869_v11, %v7642_v26  ;;  %v1903_v12 = vsel %vm1899_vm9, %v1870_v3, %v7643_v5  ;;  %v9665_v5 = vld [vmem:[#allocation2 + $0x1a0] sm:$0xff]  ;;  %v7387_v26 = vunpack.i.l.bf16 %v9397_v24  ;;  %v7467_v11 = vunpack.i.l.bf16 %v9461_v34 }
 0x114   : > { %v7648_v42 = vunpack.i.h.bf16 %v7646_v58  ;;  %v7647_v9 = vunpack.i.l.bf16 %v7646_v58  ;;  %v7651_v56 = vpop.permute.xlu0 %7650  ;;  %v7542_v63 = vunpack.i.l.bf16 %v9517_v33  ;;  %v1707_v34 = vsel %vm310_vm0, %v9267_v14, %v7383_v30 }
 0x115   : > { %v7653_v10 = vunpack.i.h.bf16 %v7651_v56  ;;  %v7652_v2 = vunpack.i.l.bf16 %v7651_v56  ;;  %7935 = vrot.lane.b32.xlu1 %v9577_v45, %s8912_s16  ;;  %v7543_v56 = vunpack.i.h.bf16 %v9517_v33 }
 0x116   : > { %7940 = vrot.lane.b32.xlu0 %v9594_v61, %s8912_s16  ;;  %v1933_v50 = vsel %vm1932_vm10, %v1900_v52, %v7647_v9  ;;  %v1934_v59 = vsel %vm1932_vm10, %v1901_v27, %v7648_v42  ;;  %v9677_v42 = vpack.i.bf16 %v548_v23, %v547_v36  ;;  %v9679_v9 = vpack.i.bf16 %v580_v4, %v579_v38 }
 0x117   : > { %v1935_v44 = vsel %vm1932_vm10, %v1902_v25, %v7652_v2  ;;  %v1936_v45 = vsel %vm1932_vm10, %v1903_v12, %v7653_v10  ;;  %v9649_v46 = vpop.permute.xlu1 %7655  ;;  %v1965_v55 = vpack.c.bf16 %v1934_v59, %v1933_v50  ;;  %v7984_v10 = vpack.i.bf16 %v9665_v5, %v9663_v41 }
 0x118   : > { %v9651_v53 = vpop.permute.xlu0 %7660  ;;  %v1966_v48 = vpack.c.bf16 %v1936_v45, %v1935_v44  ;;  %v7548_v2 = vunpack.i.h.bf16 %v9523_v8  ;;  %v7547_v52 = vunpack.i.l.bf16 %v9523_v8  ;;  %v1708_v27 = vsel %vm310_vm0, %v9269_v15, %v7387_v26 }
 0x119   : > { %7945 = vrot.lane.b32.xlu1 %v9579_v7, %s8913_s17  ;;  %7221 = vmatprep.mubr.msk.bf16.mxu0 %vm2008_vm11, %v1965_v55  ;;  %v7388_v7 = vunpack.i.h.bf16 %v9397_v24  ;;  %v1706_v24 = vsel %vm310_vm0, %v9265_v13, %v7382_v29  ;;  %v7994_v13 = vpack.i.bf16 %v9673_v17, %v9671_v47  ;;  %v1740_v25 = vsel %vm1734_vm3, %v1707_v34, %v7463_v39 }
 0x11a   : > { %7950 = vrot.lane.b32.xlu0 %v9596_v43, %s8913_s17  ;;  %7222 = vmatmul.mubr.msk.bf16.vlgmr.msra.gmra.mrb[0].mxu0 %vm2008_vm11, %v1966_v48  ;;  %v1739_v14 = vsel %vm1734_vm3, %v1706_v24, %v7462_v6  ;;  %v1741_v8 = vsel %vm1734_vm3, %v1708_v27, %v7467_v11  ;;  %v7657_v59 = vunpack.i.l.bf16 %v9649_v46  ;;  %v7663_v15 = vunpack.i.h.bf16 %v9651_v53 }
 0x11b   : > { %v7666_v58 = vpop.permute.xlu1 %7665  ;;  %v1709_v33 = vsel %vm310_vm0, %v9271_v16, %v7388_v7  ;;  %v1772_v57 = vsel %vm1767_vm5, %v1739_v14, %v7542_v63  ;;  %v1773_v16 = vsel %vm1767_vm5, %v1740_v25, %v7543_v56  ;;  %v7662_v44 = vunpack.i.l.bf16 %v9651_v53 }
 0x11c   : > { %v7671_v3 = vpop.permute.xlu0 %7670  ;;  %v1742_v50 = vsel %vm1734_vm3, %v1709_v33, %v7468_v0  ;;  %v1774_v45 = vsel %vm1767_vm5, %v1741_v8, %v7547_v52  ;;  %v7668_v48 = vunpack.i.h.bf16 %v7666_v58  ;;  %v7667_v36 = vunpack.i.l.bf16 %v7666_v58 }
 0x11d   : > { %7955 = vrot.lane.b32.xlu1 %v9657_v28, %s8908_s20  ;;  %v1775_v55 = vsel %vm1767_vm5, %v1742_v50, %v7548_v2  ;;  %v7672_v29 = vunpack.i.l.bf16 %v7671_v3  ;;  %v1805_v30 = vsel %vm1800_vm6, %v1772_v57, %v7657_v59  ;;  %v1807_v39 = vsel %vm1800_vm6, %v1774_v45, %v7662_v44  ;;  %s8919_s20 = smov [#allocation5]  }
 0x11e   : > { %7960 = vrot.lane.b32.xlu0 %v9594_v61, %s8909_s23  ;;  %v7658_v61 = vunpack.i.h.bf16 %v9649_v46  ;;  %v7673_v46 = vunpack.i.h.bf16 %v7671_v3  ;;  %v1808_v26 = vsel %vm1800_vm6, %v1775_v55, %v7663_v15  ;;  %v677_v15 = vld [vmem:[#allocation2 + $0x1a2] sm:$0xff]  ;;  %v7472_v47 = vunpack.i.l.bf16 %v9463_v35 }
 0x11f   : > { %v7676_v12 = vpop.permute.xlu1 %7675  ;;  %v1840_v24 = vsel %vm1833_vm7, %v1807_v39, %v7672_v29  ;;  %v7392_v29 = vunpack.i.l.bf16 %v9399_v18 }
 0x120   : > { %v7681_v31 = vpop.permute.xlu0 %7680  ;;  %v7678_v23 = vunpack.i.h.bf16 %v7676_v12  ;;  %v7677_v38 = vunpack.i.l.bf16 %v7676_v12  ;;  %v1806_v53 = vsel %vm1800_vm6, %v1773_v16, %v7658_v61  ;;  %v1841_v56 = vsel %vm1833_vm7, %v1808_v26, %v7673_v46  ;;  %v676_v16 = vld [vmem:[#allocation2 + $0x19a] sm:$0xff] }
 0x121   : > { %7965 = vrot.lane.b32.xlu1 %v9677_v42, %s8909_s23  ;;  %v7683_v41 = vunpack.i.h.bf16 %v7681_v31  ;;  %v7682_v5 = vunpack.i.l.bf16 %v7681_v31  ;;  %v1839_v0 = vsel %vm1833_vm7, %v1806_v53, %v7668_v48  ;;  %v8004_v46 = vpack.i.bf16 %v677_v15, %v676_v16 }
 0x122   : > { %7970 = vrot.lane.b32.xlu0 %v9596_v43, %s8910_s9  ;;  %v1838_v43 = vsel %vm1833_vm7, %v1805_v30, %v7667_v36  ;;  %v1872_v34 = vsel %vm1866_vm8, %v1839_v0, %v7678_v23  ;;  %v7398_v23 = vunpack.i.h.bf16 %v9405_v37  ;;  %v7477_v30 = vunpack.i.l.bf16 %v9469_v49 }
 0x123   : > { %v7686_v4 = vpop.permute.xlu1 %7685  ;;  %v1871_v63 = vsel %vm1866_vm8, %v1838_v43, %v7677_v38  ;;  %v1873_v52 = vsel %vm1866_vm8, %v1840_v24, %v7682_v5  ;;  %v1874_v33 = vsel %vm1866_vm8, %v1841_v56, %v7683_v41  ;;  %v7397_v38 = vunpack.i.l.bf16 %v9405_v37 }
 0x124   : > { %v7691_v7 = vpop.permute.xlu0 %7690  ;;  %v7688_v6 = vunpack.i.h.bf16 %v7686_v4  ;;  %v7687_v58 = vunpack.i.l.bf16 %v7686_v4  ;;  %v7473_v4 = vunpack.i.h.bf16 %v9463_v35  ;;  %v1710_v37 = vsel %vm310_vm0, %v9283_v19, %v7392_v29 }
 0x125   : > { %7975 = vrot.lane.b32.xlu1 %v9679_v9, %s8910_s9  ;;  %v7693_v11 = vunpack.i.h.bf16 %v7691_v7  ;;  %v7692_v3 = vunpack.i.l.bf16 %v7691_v7  ;;  %v7558_v35 = vunpack.i.h.bf16 %v9529_v62  ;;  %v7557_v5 = vunpack.i.l.bf16 %v9529_v62  ;;  %s8917_s9 = smov 40  }
 0x126   : > { %7980 = vrot.lane.b32.xlu0 %v9657_v28, %s8911_s15  ;;  %v1904_v12 = vsel %vm1899_vm9, %v1871_v63, %v7687_v58  ;;  %v1905_v28 = vsel %vm1899_vm9, %v1872_v34, %v7688_v6  ;;  %v1712_v7 = vsel %vm310_vm0, %v9287_v21, %v7397_v38 }
 0x127   : > { %v7696_v2 = vpop.permute.xlu1 %7695  ;;  %v1906_v61 = vsel %vm1899_vm9, %v1873_v52, %v7692_v3  ;;  %v1907_v59 = vsel %vm1899_vm9, %v1874_v33, %v7693_v11  ;;  %v1745_v6 = vsel %vm1734_vm3, %v1712_v7, %v7477_v30  ;;  %v7403_v7 = vunpack.i.h.bf16 %v9407_v51 }
 0x128   : > { %v7698_v27 = vunpack.i.h.bf16 %v7696_v2  ;;  %v7697_v25 = vunpack.i.l.bf16 %v7696_v2  ;;  %v7701_v14 = vpop.permute.xlu0 %7700  ;;  %v1778_v21 = vsel %vm1767_vm5, %v1745_v6, %v7557_v5  ;;  %v7482_v6 = vunpack.i.l.bf16 %v9471_v1 }
 0x129   : > { %v7703_v50 = vunpack.i.h.bf16 %v7701_v14  ;;  %v7702_v8 = vunpack.i.l.bf16 %v7701_v14  ;;  %7985 = vrot.lane.b32.xlu1 %v7984_v10, %s8911_s15 }
 0x12a   : > { %v1937_v31 = vsel %vm1932_vm10, %v1904_v12, %v7697_v25  ;;  %v1938_v57 = vsel %vm1932_vm10, %v1905_v28, %v7698_v27  ;;  %7990 = vrot.lane.b32.xlu0 %v9677_v42, %s8912_s16  ;;  %v7393_v42 = vunpack.i.h.bf16 %v9399_v18  ;;  %v7553_v18 = vunpack.i.h.bf16 %v9525_v54 }
 0x12b   : > { %v1939_v44 = vsel %vm1932_vm10, %v1906_v61, %v7702_v8  ;;  %v1940_v45 = vsel %vm1932_vm10, %v1907_v59, %v7703_v50  ;;  %v7706_v55 = vpop.permute.xlu1 %7705  ;;  %v1967_v48 = vpack.c.bf16 %v1938_v57, %v1937_v31 }
 0x12c   : > { %v7711_v10 = vpop.permute.xlu0 %7710  ;;  %v1968_v36 = vpack.c.bf16 %v1940_v45, %v1939_v44  ;;  %v1711_v41 = vsel %vm310_vm0, %v9285_v20, %v7393_v42  ;;  %v7708_v19 = vunpack.i.h.bf16 %v7706_v55  ;;  %v7707_v58 = vunpack.i.l.bf16 %v7706_v55 }
 0x12d   : > { %7995 = vrot.lane.b32.xlu1 %v7994_v13, %s8912_s16  ;;  %7225 = vmatprep.mubr.msk.bf16.mxu0 %vm2008_vm11, %v1967_v48  ;;  %v7478_v13 = vunpack.i.h.bf16 %v9469_v49  ;;  %v1713_v49 = vsel %vm310_vm0, %v9289_v22, %v7398_v23  ;;  %v1744_v26 = vsel %vm1734_vm3, %v1711_v41, %v7473_v4  ;;  %v7713_v22 = vunpack.i.h.bf16 %v7711_v10 }
 0x12e   : > { %8000 = vrot.lane.b32.xlu0 %v9679_v9, %s8913_s17  ;;  %7226 = vmatmul.mubr.msk.bf16.gmra.mrb[4].mxu0 %vm2008_vm11, %v1968_v36  ;;  %v7552_v9 = vunpack.i.l.bf16 %v9525_v54  ;;  %v1743_v54 = vsel %vm1734_vm3, %v1710_v37, %v7472_v47  ;;  %v1777_v0 = vsel %vm1767_vm5, %v1744_v26, %v7553_v18  ;;  %v7712_v11 = vunpack.i.l.bf16 %v7711_v10 }
 0x12f   : > { %v7716_v17 = vpop.permute.xlu1 %7715  ;;  %v1746_v20 = vsel %vm1734_vm3, %v1713_v49, %v7478_v13  ;;  %v1810_v25 = vsel %vm1800_vm6, %v1777_v0, %v7708_v19  ;;  %v7408_v26 = vunpack.i.h.bf16 %v9413_v32  ;;  %v7563_v0 = vunpack.i.h.bf16 %v9531_v60 }
 0x130   : > { %v7721_v53 = vpop.permute.xlu0 %7720  ;;  %v1776_v62 = vsel %vm1767_vm5, %v1743_v54, %v7552_v9  ;;  %v1779_v3 = vsel %vm1767_vm5, %v1746_v20, %v7558_v35  ;;  %v7718_v24 = vunpack.i.h.bf16 %v7716_v17  ;;  %v7717_v56 = vunpack.i.l.bf16 %v7716_v17 }
 0x131   : > { %8005 = vrot.lane.b32.xlu1 %v8004_v46, %s8913_s17  ;;  %v7723_v63 = vunpack.i.h.bf16 %v7721_v53  ;;  %v7722_v34 = vunpack.i.l.bf16 %v7721_v53  ;;  %v1809_v27 = vsel %vm1800_vm6, %v1776_v62, %v7707_v58  ;;  %v1812_v50 = vsel %vm1800_vm6, %v1779_v3, %v7713_v22  ;;  %v11603_v22 = vld [vmem:[#allocation9_spill] sm:$0xff]  ;;  %v11605_v3 = vld [vmem:[#allocation27_spill] sm:$0xff] }
 0x132   : > { %v1811_v8 = vsel %vm1800_vm6, %v1778_v21, %v7712_v11  ;;  %v1842_v31 = vsel %vm1833_vm7, %v1809_v27, %v7717_v56  ;;  %v1843_v57 = vsel %vm1833_vm7, %v1810_v25, %v7718_v24  ;;  %v7402_v54 = vunpack.i.l.bf16 %v9407_v51  ;;  %v11604_v21 = vld [vmem:[#allocation8_spill] sm:$0xff]  ;;  %v11606_v56 = vld [vmem:[#allocation10_spill] sm:$0xff] }
 0x133   : > { %v7726_v39 = vpop.permute.xlu1 %7725  ;;  %v1844_v44 = vsel %vm1833_vm7, %v1811_v8, %v7722_v34  ;;  %v1845_v45 = vsel %vm1833_vm7, %v1812_v50, %v7723_v63  ;;  %v7483_v20 = vunpack.i.h.bf16 %v9471_v1  ;;  %v7488_v58 = vunpack.i.h.bf16 %v9477_v40  ;;  %v8822_v34 = vld [vmem:[#allocation2 + $0xa8] sm:$0xff] }
 0x134   : > { %v7731_v43 = vpop.permute.xlu0 %7730  ;;  %v7728_v2 = vunpack.i.h.bf16 %v7726_v39  ;;  %v7727_v52 = vunpack.i.l.bf16 %v7726_v39  ;;  %v7407_v39 = vunpack.i.l.bf16 %v9413_v32  ;;  %v7562_v51 = vunpack.i.l.bf16 %v9531_v60 }
 0x135   : > { %v7733_v14 = vunpack.i.h.bf16 %v7731_v43  ;;  %v7732_v12 = vunpack.i.l.bf16 %v7731_v43  ;;  %v7487_v43 = vunpack.i.l.bf16 %v9477_v40  ;;  %v1715_v11 = vsel %vm310_vm0, %v11603_v22, %v7403_v7 }
 0x136   : > { %v1875_v55 = vsel %vm1866_vm8, %v1842_v31, %v7727_v52  ;;  %v1876_v48 = vsel %vm1866_vm8, %v1843_v57, %v7728_v2  ;;  %v1714_v32 = vsel %vm310_vm0, %v11604_v21, %v7402_v54  ;;  %v7568_v24 = vunpack.i.h.bf16 %v11605_v3 }
 0x137   : > { %v7736_v33 = vpop.permute.xlu1 %7735  ;;  %v1877_v36 = vsel %vm1866_vm8, %v1844_v44, %v7732_v12  ;;  %v1878_v46 = vsel %vm1866_vm8, %v1845_v45, %v7733_v14  ;;  %v7567_v1 = vunpack.i.l.bf16 %v11605_v3  ;;  %v1717_v63 = vsel %vm310_vm0, %v11606_v56, %v7408_v26 }
 0x138   : > { %v7741_v28 = vpop.permute.xlu0 %7740  ;;  %v7738_v61 = vunpack.i.h.bf16 %v7736_v33  ;;  %v7737_v59 = vunpack.i.l.bf16 %v7736_v33  ;;  %v1716_v40 = vsel %vm310_vm0, %v8822_v34, %v7407_v39  ;;  %v1747_v2 = vsel %vm1734_vm3, %v1714_v32, %v7482_v6 }
 0x139   : > { %v7743_v16 = vunpack.i.h.bf16 %v7741_v28  ;;  %v7742_v15 = vunpack.i.l.bf16 %v7741_v28  ;;  %v1748_v60 = vsel %vm1734_vm3, %v1715_v11, %v7483_v20  ;;  %v1750_v33 = vsel %vm1734_vm3, %v1717_v63, %v7488_v58  ;;  %v11608_v63 = vld [vmem:[#allocation12_spill] sm:$0xff] }
 0x13a   : > { %v1908_v38 = vsel %vm1899_vm9, %v1875_v55, %v7737_v59  ;;  %v1909_v4 = vsel %vm1899_vm9, %v1876_v48, %v7738_v61  ;;  %v1749_v27 = vsel %vm1734_vm3, %v1716_v40, %v7487_v43  ;;  %v1780_v28 = vsel %vm1767_vm5, %v1747_v2, %v7562_v51  ;;  %v11609_v2 = vld [vmem:[#allocation19_spill] sm:$0xff] }
 0x13b   : > { %v7746_v10 = vpop.permute.xlu1 %7745  ;;  %v1910_v13 = vsel %vm1899_vm9, %v1877_v36, %v7742_v15  ;;  %v1911_v30 = vsel %vm1899_vm9, %v1878_v46, %v7743_v16  ;;  %v1781_v50 = vsel %vm1767_vm5, %v1748_v60, %v7563_v0  ;;  %v1782_v59 = vsel %vm1767_vm5, %v1749_v27, %v7567_v1  ;;  %v11610_v27 = vld [vmem:[#allocation20_spill] sm:$0xff] }
 0x13c   : > { %v7748_v42 = vunpack.i.h.bf16 %v7746_v10  ;;  %v7747_v29 = vunpack.i.l.bf16 %v7746_v10  ;;  %v7751_v23 = vpop.permute.xlu0 %7750  ;;  %v1783_v31 = vsel %vm1767_vm5, %v1750_v33, %v7568_v24  ;;  %v11607_v24 = vld [vmem:[#allocation11_spill] sm:$0xff]  ;;  %v7418_v34 = vunpack.i.h.bf16 %v11608_v63 }
 0x13d   : > { %v7753_v47 = vunpack.i.h.bf16 %v7751_v23  ;;  %v7752_v17 = vunpack.i.l.bf16 %v7751_v23  ;;  %v7413_v1 = vunpack.i.h.bf16 %v11607_v24  ;;  %v7412_v56 = vunpack.i.l.bf16 %v11607_v24 }
 0x13e   : > { %v1941_v53 = vsel %vm1932_vm10, %v1908_v38, %v7747_v29  ;;  %v1942_v18 = vsel %vm1932_vm10, %v1909_v4, %v7748_v42  ;;  %v7417_v40 = vunpack.i.l.bf16 %v11608_v63  ;;  %v7493_v60 = vunpack.i.h.bf16 %v11609_v2 }
 0x13f   : > { %v1943_v9 = vsel %vm1932_vm10, %v1910_v13, %v7752_v17  ;;  %v1944_v41 = vsel %vm1932_vm10, %v1911_v30, %v7753_v47  ;;  %v7756_v37 = vpop.permute.xlu1 %7755  ;;  %v1969_v35 = vpack.c.bf16 %v1942_v18, %v1941_v53 }
 0x140   : > { %v7761_v5 = vpop.permute.xlu0 %7760  ;;  %v1970_v49 = vpack.c.bf16 %v1944_v41, %v1943_v9  ;;  %v7758_v25 = vunpack.i.h.bf16 %v7756_v37  ;;  %v7757_v14 = vunpack.i.l.bf16 %v7756_v37 }
 0x141   : > { %7229 = vmatprep.mubr.msk.bf16.mxu0 %vm2008_vm11, %v1969_v35  ;;  %v7763_v8 = vunpack.i.h.bf16 %v7761_v5  ;;  %v7762_v61 = vunpack.i.l.bf16 %v7761_v5 }
 0x142   : > { %7230 = vmatmul.mubr.msk.bf16.gmra.mrb[8].mxu0 %vm2008_vm11, %v1970_v49  ;;  %v1813_v10 = vsel %vm1800_vm6, %v1780_v28, %v7757_v14  ;;  %v1814_v36 = vsel %vm1800_vm6, %v1781_v50, %v7758_v25  ;;  %v7498_v25 = vunpack.i.h.bf16 %v11610_v27  ;;  %v7497_v14 = vunpack.i.l.bf16 %v11610_v27  ;;  %v11611_v28 = vld [vmem:[#allocation28_spill] sm:$0xff] }
 0x143   : > { %v7766_v19 = vpop.permute.xlu1 %7765  ;;  %v1816_v23 = vsel %vm1800_vm6, %v1783_v31, %v7763_v8  ;;  %v1815_v38 = vsel %vm1800_vm6, %v1782_v59, %v7762_v61  ;;  %v7573_v50 = vunpack.i.h.bf16 %v11611_v28  ;;  %v7572_v8 = vunpack.i.l.bf16 %v11611_v28  ;;  %v8823_v61 = vld [vmem:[#allocation2 + $0xc8] sm:$0xff]  ;;  %v8824_v31 = vld [vmem:[#allocation2 + $0xc0] sm:$0xff] }
 0x144   : > { %v7771_v62 = vpop.permute.xlu0 %7770  ;;  %v7768_v57 = vunpack.i.h.bf16 %v7766_v19  ;;  %v7767_v16 = vunpack.i.l.bf16 %v7766_v19  ;;  %v1719_v59 = vsel %vm310_vm0, %v8823_v61, %v7413_v1 }
 0x145   : > { %v7773_v15 = vunpack.i.h.bf16 %v7771_v62  ;;  %v7772_v44 = vunpack.i.l.bf16 %v7771_v62 }
 0x146   : > { %v1846_v17 = vsel %vm1833_vm7, %v1813_v10, %v7767_v16  ;;  %v1847_v13 = vsel %vm1833_vm7, %v1814_v36, %v7768_v57  ;;  %v1718_v57 = vsel %vm310_vm0, %v8824_v31, %v7412_v56  ;;  %v11612_v16 = vld [vmem:[#allocation29_spill] sm:$0xff] }
 0x147   : > { %v7776_v52 = vpop.permute.xlu1 %7775  ;;  %v1848_v18 = vsel %vm1833_vm7, %v1815_v38, %v7772_v44  ;;  %v1849_v9 = vsel %vm1833_vm7, %v1816_v23, %v7773_v15  ;;  %v7578_v15 = vunpack.i.h.bf16 %v11612_v16  ;;  %v7577_v44 = vunpack.i.l.bf16 %v11612_v16 }
 0x148   : > { %v7781_v12 = vpop.permute.xlu0 %7780  ;;  %v7778_v45 = vunpack.i.h.bf16 %v7776_v52  ;;  %v7777_v55 = vunpack.i.l.bf16 %v7776_v52  ;;  %v7492_v52 = vunpack.i.l.bf16 %v11609_v2 }
 0x149   : > { %v7783_v46 = vunpack.i.h.bf16 %v7781_v12  ;;  %v7782_v42 = vunpack.i.l.bf16 %v7781_v12 }
 0x14a   : > { %v1879_v41 = vsel %vm1866_vm8, %v1846_v17, %v7777_v55  ;;  %v1880_v37 = vsel %vm1866_vm8, %v1847_v13, %v7778_v45  ;;  %v8825_v45 = vld [vmem:[#allocation2 + $0xe0] sm:$0xff]  ;;  %v1751_v36 = vsel %vm1734_vm3, %v1718_v57, %v7492_v52 }
 0x14b   : > { %v7786_v48 = vpop.permute.xlu1 %7785  ;;  %v1881_v5 = vsel %vm1866_vm8, %v1848_v18, %v7782_v42  ;;  %v1882_v49 = vsel %vm1866_vm8, %v1849_v9, %v7783_v46  ;;  %v1721_v55 = vsel %vm310_vm0, %v8825_v45, %v7418_v34  ;;  %v1752_v46 = vsel %vm1734_vm3, %v1719_v59, %v7493_v60 }
 0x14c   : > { %v7791_v29 = vpop.permute.xlu0 %7790  ;;  %v7788_v4 = vunpack.i.h.bf16 %v7786_v48  ;;  %v7787_v47 = vunpack.i.l.bf16 %v7786_v48  ;;  %v8826_v48 = vld [vmem:[#allocation2 + $0xd8] sm:$0xff]  ;;  %v1784_v17 = vsel %vm1767_vm5, %v1751_v36, %v7572_v8  ;;  %v1785_v13 = vsel %vm1767_vm5, %v1752_v46, %v7573_v50  ;;  %v11615_v36 = vld [vmem:[#allocation21_spill] sm:$0xff] }
 0x14d   : > { %v7793_v30 = vunpack.i.h.bf16 %v7791_v29  ;;  %v7792_v53 = vunpack.i.l.bf16 %v7791_v29  ;;  %v1720_v10 = vsel %vm310_vm0, %v8826_v48, %v7417_v40  ;;  %v1754_v29 = vsel %vm1734_vm3, %v1721_v55, %v7498_v25  ;;  %v11614_v55 = vld [vmem:[#allocation14_spill] sm:$0xff] }
 0x14e   : > { %v1912_v39 = vsel %vm1899_vm9, %v1879_v41, %v7787_v47  ;;  %v1913_v20 = vsel %vm1899_vm9, %v1880_v37, %v7788_v4  ;;  %v1753_v23 = vsel %vm1734_vm3, %v1720_v10, %v7497_v14  ;;  %v1787_v9 = vsel %vm1767_vm5, %v1754_v29, %v7578_v15  ;;  %v11613_v15 = vld [vmem:[#allocation13_spill] sm:$0xff]  ;;  %v11616_v29 = vld [vmem:[#allocation22_spill] sm:$0xff] }
 0x14f   : > { %v7796_v35 = vpop.permute.xlu1 %7795  ;;  %v1914_v58 = vsel %vm1899_vm9, %v1881_v5, %v7792_v53  ;;  %v1915_v43 = vsel %vm1899_vm9, %v1882_v49, %v7793_v30  ;;  %v1786_v18 = vsel %vm1767_vm5, %v1753_v23, %v7577_v44  ;;  %v7423_v44 = vunpack.i.h.bf16 %v11613_v15 }
 0x150   : > { %v7798_v7 = vunpack.i.h.bf16 %v7796_v35  ;;  %v7797_v54 = vunpack.i.l.bf16 %v7796_v35  ;;  %v7801_v26 = vpop.permute.xlu0 %7800  ;;  %v7422_v45 = vunpack.i.l.bf16 %v11613_v15  ;;  %v7428_v48 = vunpack.i.h.bf16 %v11614_v55 }
 0x151   : > { %v7803_v6 = vunpack.i.h.bf16 %v7801_v26  ;;  %v7802_v19 = vunpack.i.l.bf16 %v7801_v26  ;;  %v7427_v10 = vunpack.i.l.bf16 %v11614_v55  ;;  %v7503_v46 = vunpack.i.h.bf16 %v11615_v36 }
 0x152   : > { %v1945_v62 = vsel %vm1932_vm10, %v1912_v39, %v7797_v54  ;;  %v1946_v0 = vsel %vm1932_vm10, %v1913_v20, %v7798_v7  ;;  %v7508_v23 = vunpack.i.h.bf16 %v11616_v29 }
 0x153   : > { %v1947_v51 = vsel %vm1932_vm10, %v1914_v58, %v7802_v19  ;;  %v1948_v22 = vsel %vm1932_vm10, %v1915_v43, %v7803_v6  ;;  %v7806_v11 = vpop.permute.xlu1 %7805  ;;  %v1971_v21 = vpack.c.bf16 %v1946_v0, %v1945_v62 }
 0x154   : > { %v7811_v32 = vpop.permute.xlu0 %7810  ;;  %v1972_v3 = vpack.c.bf16 %v1948_v22, %v1947_v51  ;;  %v7808_v38 = vunpack.i.h.bf16 %v7806_v11  ;;  %v7807_v4 = vunpack.i.l.bf16 %v7806_v11 }
 0x155   : > { %7233 = vmatprep.mubr.msk.bf16.mxu0 %vm2008_vm11, %v1971_v21  ;;  %v7813_v30 = vunpack.i.h.bf16 %v7811_v32  ;;  %v7812_v53 = vunpack.i.l.bf16 %v7811_v32 }
 0x156   : > { %7234 = vmatmul.mubr.msk.bf16.gmra.mrb[12].mxu0 %vm2008_vm11, %v1972_v3  ;;  %v1817_v26 = vsel %vm1800_vm6, %v1784_v17, %v7807_v4  ;;  %v1818_v39 = vsel %vm1800_vm6, %v1785_v13, %v7808_v38  ;;  %v7507_v38 = vunpack.i.l.bf16 %v11616_v29 }
 0x157   : > { %v7816_v33 = vpop.permute.xlu1 %7815  ;;  %v1820_v58 = vsel %vm1800_vm6, %v1787_v9, %v7813_v30  ;;  %v1819_v43 = vsel %vm1800_vm6, %v1786_v18, %v7812_v53  ;;  %v8827_v30 = vld [vmem:[#allocation2 + $0xf8] sm:$0xff]  ;;  %v8828_v18 = vld [vmem:[#allocation2 + $0xf0] sm:$0xff] }
 0x158   : > { %v7821_v12 = vpop.permute.xlu0 %7820  ;;  %v7818_v41 = vunpack.i.h.bf16 %v7816_v33  ;;  %v7817_v37 = vunpack.i.l.bf16 %v7816_v33  ;;  %v1723_v53 = vsel %vm310_vm0, %v8827_v30, %v7423_v44  ;;  %v1722_v9 = vsel %vm310_vm0, %v8828_v18, %v7422_v45 }
 0x159   : > { %v7823_v35 = vunpack.i.h.bf16 %v7821_v12  ;;  %v7822_v5 = vunpack.i.l.bf16 %v7821_v12 }
 0x15a   : > { %v1850_v51 = vsel %vm1833_vm7, %v1817_v26, %v7817_v37  ;;  %v1851_v22 = vsel %vm1833_vm7, %v1818_v39, %v7818_v41  ;;  %v11618_v37 = vld [vmem:[#allocation31_spill] sm:$0xff] }
 0x15b   : > { %v7826_v42 = vpop.permute.xlu1 %7825  ;;  %v1852_v32 = vsel %vm1833_vm7, %v1819_v43, %v7822_v5  ;;  %v1853_v3 = vsel %vm1833_vm7, %v1820_v58, %v7823_v35  ;;  %v7587_v35 = vunpack.i.l.bf16 %v11618_v37  ;;  %v11619_v5 = vmov 0.0  }
 0x15c   : > { %v7831_v47 = vpop.permute.xlu0 %7830  ;;  %v7828_v49 = vunpack.i.h.bf16 %v7826_v42  ;;  %v7827_v7 = vunpack.i.l.bf16 %v7826_v42  ;;  %v7502_v42 = vunpack.i.l.bf16 %v11615_v36  ;;  %2257 = vst.msk [vmem:[#allocation3 + $0x10] sm:$0x3] %vm2256_vm12, %v11619_v5  ;;  %2261 = vst.msk [vmem:[#allocation3 + $0x1a8] sm:$0x3] %vm2256_vm12, %v11619_v5  ;;  %v7588_v39 = vunpack.i.h.bf16 %v11618_v37 }
 0x15d   : > { %v7833_v20 = vunpack.i.h.bf16 %v7831_v47  ;;  %v7832_v6 = vunpack.i.l.bf16 %v7831_v47  ;;  %v11617_v47 = vld [vmem:[#allocation30_spill] sm:$0xff]  ;;  %5491 = vst.msk [vmem:[#allocation4 + $0x8] sm:$0x3] %vm2256_vm12, %v11619_v5  ;;  %5494 = vst.msk [vmem:[#allocation4 + $0x98] sm:$0x3] %vm2256_vm12, %v11619_v5  ;;  %vm5843_vm12 = vcmask 1045509  }
 0x15e   : > { %v1883_v24 = vsel %vm1866_vm8, %v1850_v51, %v7827_v7  ;;  %v1884_v1 = vsel %vm1866_vm8, %v1851_v22, %v7828_v49  ;;  %v7582_v17 = vunpack.i.l.bf16 %v11617_v47  ;;  %v7583_v41 = vunpack.i.h.bf16 %v11617_v47  ;;  %v8829_v49 = vld [vmem:[#allocation2 + $0x110] sm:$0xff]  ;;  %2281 = vst.msk [vmem:[#allocation3 + $0x11] sm:$0x1] %vm2262_vm13, %v11619_v5  ;;  %2263 = vst.msk [vmem:[#allocation3] sm:$0x1] %vm2262_vm13, %v11619_v5 }
 0x15f   : > { %v7836_v54 = vpop.permute.xlu1 %7835  ;;  %v1885_v63 = vsel %vm1866_vm8, %v1852_v32, %v7832_v6  ;;  %v1886_v34 = vsel %vm1866_vm8, %v1853_v3, %v7833_v20  ;;  %v1725_v7 = vsel %vm310_vm0, %v8829_v49, %v7428_v48  ;;  %v1755_v6 = vsel %vm1734_vm3, %v1722_v9, %v7502_v42  ;;  %2264 = vst.msk [vmem:[#allocation3 + $0x18] sm:$0x1] %vm2262_vm13, %v11619_v5  ;;  %v2396_v48 = vld [vmem:[#allocation3 + $0x2] sm:$0xff] }
 0x160   : > { %v7841_v19 = vpop.permute.xlu0 %7840  ;;  %v7838_v62 = vunpack.i.h.bf16 %v7836_v54  ;;  %v7837_v0 = vunpack.i.l.bf16 %v7836_v54  ;;  %v8830_v54 = vld [vmem:[#allocation2 + $0x108] sm:$0xff]  ;;  %v9930_v58 = vsel %vm1734_vm3, %v1725_v7, %v7508_v23  ;;  %2265 = vst.msk [vmem:[#allocation3 + $0x30] sm:$0x1] %vm2262_vm13, %v11619_v5  ;;  %2266 = vst.msk [vmem:[#allocation3 + $0x48] sm:$0x1] %vm2262_vm13, %v11619_v5 }
 0x161   : > { %v7843_v11 = vunpack.i.h.bf16 %v7841_v19  ;;  %v7842_v21 = vunpack.i.l.bf16 %v7841_v19  ;;  %v1724_v26 = vsel %vm310_vm0, %v8830_v54, %v7427_v10  ;;  %v1756_v19 = vsel %vm1734_vm3, %v1723_v53, %v7503_v46  ;;  %2267 = vst.msk [vmem:[#allocation3 + $0x60] sm:$0x1] %vm2262_vm13, %v11619_v5  ;;  %2268 = vst.msk [vmem:[#allocation3 + $0x78] sm:$0x1] %vm2262_vm13, %v11619_v5 }
 0x162   : > { %v1916_v52 = vsel %vm1899_vm9, %v1883_v24, %v7837_v0  ;;  %v1917_v33 = vsel %vm1899_vm9, %v1884_v1, %v7838_v62  ;;  %v1757_v43 = vsel %vm1734_vm3, %v1724_v26, %v7507_v38  ;;  %v9936_v0 = vsel %vm1767_vm5, %v1755_v6, %v7582_v17  ;;  %2269 = vst.msk [vmem:[#allocation3 + $0x90] sm:$0x1] %vm2262_vm13, %v11619_v5 }
 0x163   : > { %v7846_v56 = vpop.permute.xlu1 %7845  ;;  %v1918_v14 = vsel %vm1899_vm9, %v1885_v63, %v7842_v21  ;;  %v1919_v12 = vsel %vm1899_vm9, %v1886_v34, %v7843_v11  ;;  %v9943_v21 = vsel %vm1767_vm5, %v1756_v19, %v7583_v41  ;;  %v9946_v32 = vsel %vm1767_vm5, %v1757_v43, %v7587_v35  ;;  %2270 = vst.msk [vmem:[#allocation3 + $0xa8] sm:$0x1] %vm2262_vm13, %v11619_v5 }
 0x164   : > { %v7848_v40 = vunpack.i.h.bf16 %v7846_v56  ;;  %v7847_v2 = vunpack.i.l.bf16 %v7846_v56  ;;  %v7851_v60 = vpop.permute.xlu0 %7850  ;;  %2271 = vst.msk [vmem:[#allocation3 + $0xc0] sm:$0x1] %vm2262_vm13, %v11619_v5  ;;  %2272 = vst.msk [vmem:[#allocation3 + $0xd8] sm:$0x1] %vm2262_vm13, %v11619_v5  ;;  %v1791_v1 = vsel %vm1767_vm5, %v9930_v58, %v7588_v39  ;;  %v11621_v58 = vld [vmem:[#allocation16_spill] sm:$0xff] }
 0x165   : > { %v7853_v27 = vunpack.i.h.bf16 %v7851_v60  ;;  %v7852_v25 = vunpack.i.l.bf16 %v7851_v60  ;;  %2273 = vst.msk [vmem:[#allocation3 + $0xf0] sm:$0x1] %vm2262_vm13, %v11619_v5  ;;  %2274 = vst.msk [vmem:[#allocation3 + $0x108] sm:$0x1] %vm2262_vm13, %v11619_v5  ;;  %v2397_v17 = vld [vmem:[#allocation3 + $0xa] sm:$0xff]  ;;  %v7438_v43 = vunpack.i.h.bf16 %v11621_v58 }
 0x166   : > { %v1949_v28 = vsel %vm1932_vm10, %v1916_v52, %v7847_v2  ;;  %v1950_v50 = vsel %vm1932_vm10, %v1917_v33, %v7848_v40  ;;  %2275 = vst.msk [vmem:[#allocation3 + $0x120] sm:$0x1] %vm2262_vm13, %v11619_v5  ;;  %2276 = vst.msk [vmem:[#allocation3 + $0x138] sm:$0x1] %vm2262_vm13, %v11619_v5  ;;  %v8014_v18 = vpack.i.bf16 %v2397_v17, %v2396_v48 }
 0x167   : > { %v1951_v8 = vsel %vm1932_vm10, %v1918_v14, %v7852_v25  ;;  %v1952_v61 = vsel %vm1932_vm10, %v1919_v12, %v7853_v27  ;;  %v9896_v59 = vpop.permute.xlu1 %7855  ;;  %v1973_v31 = vpack.c.bf16 %v1950_v50, %v1949_v28  ;;  %2277 = vst.msk [vmem:[#allocation3 + $0x150] sm:$0x1] %vm2262_vm13, %v11619_v5  ;;  %2278 = vst.msk [vmem:[#allocation3 + $0x168] sm:$0x1] %vm2262_vm13, %v11619_v5  ;;  %v2364_v50 = vld [vmem:[#allocation3 + $0x1] sm:$0xff] }
 0x168   : > { %v9898_v57 = vpop.permute.xlu0 %7860  ;;  %v1974_v16 = vpack.c.bf16 %v1952_v61, %v1951_v8  ;;  %v7857_v20 = vunpack.i.l.bf16 %v9896_v59  ;;  %v7858_v51 = vunpack.i.h.bf16 %v9896_v59  ;;  %2279 = vst.msk [vmem:[#allocation3 + $0x180] sm:$0x1] %vm2262_vm13, %v11619_v5  ;;  %2280 = vst.msk [vmem:[#allocation3 + $0x198] sm:$0x1] %vm2262_vm13, %v11619_v5  ;;  %v2365_v8 = vld [vmem:[#allocation3 + $0x9] sm:$0xff] }
 0x169   : > { %7237 = vmatprep.mubr.msk.bf16.mxu0 %vm2008_vm11, %v1973_v31  ;;  %v7863_v22 = vunpack.i.h.bf16 %v9898_v57  ;;  %v7862_v3 = vunpack.i.l.bf16 %v9898_v57  ;;  %2282 = vst.msk [vmem:[#allocation3 + $0x29] sm:$0x1] %vm2262_vm13, %v11619_v5  ;;  %2283 = vst.msk [vmem:[#allocation3 + $0x41] sm:$0x1] %vm2262_vm13, %v11619_v5 }
 0x16a   : > { %7238 = vmatmul.mubr.msk.bf16.gmra.mrb[16].mxu0 %vm2008_vm11, %v1974_v16  ;;  %2284 = vst.msk [vmem:[#allocation3 + $0x59] sm:$0x1] %vm2262_vm13, %v11619_v5  ;;  %2285 = vst.msk [vmem:[#allocation3 + $0x71] sm:$0x1] %vm2262_vm13, %v11619_v5  ;;  %v1821_v56 = vsel %vm1800_vm6, %v9936_v0, %v7857_v20  ;;  %v1822_v27 = vsel %vm1800_vm6, %v9943_v21, %v7858_v51  ;;  %v8009_v16 = vpack.i.bf16 %v2365_v8, %v2364_v50  ;;  %v11620_v20 = vld [vmem:[#allocation15_spill] sm:$0xff]  ;;  %v11623_v21 = vld [vmem:[#allocation24_spill] sm:$0xff] }
 0x16b   : > { %v9910_v4 = vpop.permute.xlu1 %7865  ;;  %2286 = vst.msk [vmem:[#allocation3 + $0x89] sm:$0x1] %vm2262_vm13, %v11619_v5  ;;  %2287 = vst.msk [vmem:[#allocation3 + $0xa1] sm:$0x1] %vm2262_vm13, %v11619_v5  ;;  %v1824_v25 = vsel %vm1800_vm6, %v1791_v1, %v7863_v22  ;;  %v1823_v61 = vsel %vm1800_vm6, %v9946_v32, %v7862_v3  ;;  %v7433_v6 = vunpack.i.h.bf16 %v11620_v20  ;;  %v7432_v19 = vunpack.i.l.bf16 %v11620_v20  ;;  %v11622_v0 = vld [vmem:[#allocation23_spill] sm:$0xff]  ;;  %v11624_v1 = vld [vmem:[#allocation32_spill] sm:$0xff] }
 0x16c   : > { %v9913_v13 = vpop.permute.xlu0 %7870  ;;  %v7867_v24 = vunpack.i.l.bf16 %v9910_v4  ;;  %2288 = vst.msk [vmem:[#allocation3 + $0xb9] sm:$0x1] %vm2262_vm13, %v11619_v5  ;;  %2289 = vst.msk [vmem:[#allocation3 + $0xd1] sm:$0x1] %vm2262_vm13, %v11619_v5  ;;  %v7868_v63 = vunpack.i.h.bf16 %v9910_v4  ;;  %8010 = vrot.lane.b32.xlu0 %v8009_v16, %s8907_s19  ;;  %v7513_v51 = vunpack.i.h.bf16 %v11622_v0  ;;  %v7512_v22 = vunpack.i.l.bf16 %v11622_v0 }
 0x16d   : > { %2290 = vst.msk [vmem:[#allocation3 + $0xe9] sm:$0x1] %vm2262_vm13, %v11619_v5  ;;  %2291 = vst.msk [vmem:[#allocation3 + $0x101] sm:$0x1] %vm2262_vm13, %v11619_v5  ;;  %v7872_v34 = vunpack.i.l.bf16 %v9913_v13  ;;  %v7873_v40 = vunpack.i.h.bf16 %v9913_v13  ;;  %v7518_v32 = vunpack.i.h.bf16 %v11623_v21  ;;  %v7517_v3 = vunpack.i.l.bf16 %v11623_v21 }
 0x16e   : > { %2292 = vst.msk [vmem:[#allocation3 + $0x119] sm:$0x1] %vm2262_vm13, %v11619_v5  ;;  %2293 = vst.msk [vmem:[#allocation3 + $0x131] sm:$0x1] %vm2262_vm13, %v11619_v5  ;;  %v1854_v59 = vsel %vm1833_vm7, %v1821_v56, %v7867_v24  ;;  %v1855_v15 = vsel %vm1833_vm7, %v1822_v27, %v7868_v63  ;;  %v7593_v56 = vunpack.i.h.bf16 %v11624_v1  ;;  %v7592_v63 = vunpack.i.l.bf16 %v11624_v1 }
 0x16f   : > { %v9933_v62 = vpop.permute.xlu1 %7875  ;;  %2294 = vst.msk [vmem:[#allocation3 + $0x149] sm:$0x1] %vm2262_vm13, %v11619_v5  ;;  %2295 = vst.msk [vmem:[#allocation3 + $0x161] sm:$0x1] %vm2262_vm13, %v11619_v5  ;;  %v1856_v44 = vsel %vm1833_vm7, %v1823_v61, %v7872_v34  ;;  %v1857_v10 = vsel %vm1833_vm7, %v1824_v25, %v7873_v40  ;;  %v8831_v34 = vld [vmem:[#allocation2 + $0x128] sm:$0xff]  ;;  %v8833_v25 = vld [vmem:[#allocation2 + $0x140] sm:$0xff] }
 0x170   : > { %v9940_v11 = vpop.permute.xlu0 %7880  ;;  %2296 = vst.msk [vmem:[#allocation3 + $0x179] sm:$0x1] %vm2262_vm13, %v11619_v5  ;;  %2297 = vst.msk [vmem:[#allocation3 + $0x191] sm:$0x1] %vm2262_vm13, %v11619_v5  ;;  %v7878_v2 = vunpack.i.h.bf16 %v9933_v62  ;;  %v7877_v60 = vunpack.i.l.bf16 %v9933_v62  ;;  %8015 = vrot.lane.b32.xlu0 %v8014_v18, %s8909_s23  ;;  %v7437_v62 = vunpack.i.l.bf16 %v11621_v58  ;;  %v1727_v40 = vsel %vm310_vm0, %v8831_v34, %v7433_v6 }
 0x171   : > { %2298 = vst.msk [vmem:[#allocation3 + $0x1a9] sm:$0x1] %vm2262_vm13, %v11619_v5  ;;  %5495 = vst.msk [vmem:[#allocation4] sm:$0x1] %vm2262_vm13, %v11619_v5  ;;  %v7882_v52 = vunpack.i.l.bf16 %v9940_v11  ;;  %v7883_v14 = vunpack.i.h.bf16 %v9940_v11  ;;  %v1760_v8 = vsel %vm1734_vm3, %v1727_v40, %v7513_v51 }
 0x172   : > { %5496 = vst.msk [vmem:[#allocation4 + $0x10] sm:$0x1] %vm2262_vm13, %v11619_v5  ;;  %5497 = vst.msk [vmem:[#allocation4 + $0x20] sm:$0x1] %vm2262_vm13, %v11619_v5  ;;  %v1887_v57 = vsel %vm1866_vm8, %v1854_v59, %v7877_v60  ;;  %v1888_v36 = vsel %vm1866_vm8, %v1855_v15, %v7878_v2  ;;  %v8832_v2 = vld [vmem:[#allocation2 + $0x120] sm:$0xff] }
 0x173   : > { %5498 = vst.msk [vmem:[#allocation4 + $0x30] sm:$0x1] %vm2262_vm13, %v11619_v5  ;;  %5499 = vst.msk [vmem:[#allocation4 + $0x40] sm:$0x1] %vm2262_vm13, %v11619_v5  ;;  %v7886_v33 = vpop.permute.xlu1 %7885  ;;  %v1889_v46 = vsel %vm1866_vm8, %v1856_v44, %v7882_v52  ;;  %v1890_v29 = vsel %vm1866_vm8, %v1857_v10, %v7883_v14  ;;  %v1726_v60 = vsel %vm310_vm0, %v8832_v2, %v7432_v19  ;;  %v11625_v52 = vld [vmem:[#allocation33_spill] sm:$0xff] }
 0x174   : > { %5500 = vst.msk [vmem:[#allocation4 + $0x50] sm:$0x1] %vm2262_vm13, %v11619_v5  ;;  %5501 = vst.msk [vmem:[#allocation4 + $0x60] sm:$0x1] %vm2262_vm13, %v11619_v5  ;;  %v7887_v12 = vunpack.i.l.bf16 %v7886_v33  ;;  %v7891_v28 = vpop.permute.xlu0 %7890  ;;  %v7888_v31 = vunpack.i.h.bf16 %v7886_v33  ;;  %v7598_v33 = vunpack.i.h.bf16 %v11625_v52  ;;  %v7597_v27 = vunpack.i.l.bf16 %v11625_v52 }
 0x175   : > { %5502 = vst.msk [vmem:[#allocation4 + $0x70] sm:$0x1] %vm2262_vm13, %v11619_v5  ;;  %5503 = vst.msk [vmem:[#allocation4 + $0x80] sm:$0x1] %vm2262_vm13, %v11619_v5  ;;  %v7893_v45 = vunpack.i.h.bf16 %v7891_v28  ;;  %v7892_v55 = vunpack.i.l.bf16 %v7891_v28  ;;  %v1729_v14 = vsel %vm310_vm0, %v8833_v25, %v7438_v43  ;;  %v1759_v50 = vsel %vm1734_vm3, %v1726_v60, %v7512_v22 }
 0x176   : > { %5504 = vst.msk [vmem:[#allocation4 + $0x90] sm:$0x1] %vm2262_vm13, %v11619_v5  ;;  %5505 = vst.msk [vmem:[#allocation4 + $0x9] sm:$0x1] %vm2262_vm13, %v11619_v5  ;;  %v1920_v23 = vsel %vm1899_vm9, %v1887_v57, %v7887_v12  ;;  %v1921_v13 = vsel %vm1899_vm9, %v1888_v36, %v7888_v31  ;;  %v8834_v12 = vld [vmem:[#allocation2 + $0x138] sm:$0xff]  ;;  %v1762_v59 = vsel %vm1734_vm3, %v1729_v14, %v7518_v32 }
 0x177   : > { %5506 = vst.msk [vmem:[#allocation4 + $0x19] sm:$0x1] %vm2262_vm13, %v11619_v5  ;;  %5507 = vst.msk [vmem:[#allocation4 + $0x29] sm:$0x1] %vm2262_vm13, %v11619_v5  ;;  %v7896_v42 = vpop.permute.xlu1 %7895  ;;  %v1922_v9 = vsel %vm1899_vm9, %v1889_v46, %v7892_v55  ;;  %v1923_v41 = vsel %vm1899_vm9, %v1890_v29, %v7893_v45  ;;  %v1728_v28 = vsel %vm310_vm0, %v8834_v12, %v7437_v62  ;;  %v11627_v12 = vld [vmem:[#allocation18_spill] sm:$0xff] }
 0x178   : > { %5508 = vst.msk [vmem:[#allocation4 + $0x39] sm:$0x1] %vm2262_vm13, %v11619_v5  ;;  %5509 = vst.msk [vmem:[#allocation4 + $0x49] sm:$0x1] %vm2262_vm13, %v11619_v5  ;;  %v7898_v38 = vunpack.i.h.bf16 %v7896_v42  ;;  %v7897_v4 = vunpack.i.l.bf16 %v7896_v42  ;;  %v7901_v47 = vpop.permute.xlu0 %7900  ;;  %v1761_v31 = vsel %vm1734_vm3, %v1728_v28, %v7517_v3  ;;  %v1792_v45 = vsel %vm1767_vm5, %v1759_v50, %v7592_v63 }
 0x179   : > { %5510 = vst.msk [vmem:[#allocation4 + $0x59] sm:$0x1] %vm2262_vm13, %v11619_v5  ;;  %5511 = vst.msk [vmem:[#allocation4 + $0x69] sm:$0x1] %vm2262_vm13, %v11619_v5  ;;  %v7903_v30 = vunpack.i.h.bf16 %v7901_v47  ;;  %v7902_v53 = vunpack.i.l.bf16 %v7901_v47  ;;  %v1793_v55 = vsel %vm1767_vm5, %v1760_v8, %v7593_v56  ;;  %v1794_v57 = vsel %vm1767_vm5, %v1761_v31, %v7597_v27  ;;  %v11626_v27 = vld [vmem:[#allocation17_spill] sm:$0xff] }
 0x17a   : > { %5512 = vst.msk [vmem:[#allocation4 + $0x79] sm:$0x1] %vm2262_vm13, %v11619_v5  ;;  %5513 = vst.msk [vmem:[#allocation4 + $0x89] sm:$0x1] %vm2262_vm13, %v11619_v5  ;;  %v1953_v37 = vsel %vm1932_vm10, %v1920_v23, %v7897_v4  ;;  %v1954_v35 = vsel %vm1932_vm10, %v1921_v13, %v7898_v38  ;;  %v1795_v36 = vsel %vm1767_vm5, %v1762_v59, %v7598_v33  ;;  %v7443_v25 = vunpack.i.h.bf16 %v11626_v27 }
 0x17b   : > { %5514 = vst.msk [vmem:[#allocation4 + $0x99] sm:$0x1] %vm2262_vm13, %v11619_v5  ;;  %v1955_v5 = vsel %vm1932_vm10, %v1922_v9, %v7902_v53  ;;  %v1956_v49 = vsel %vm1932_vm10, %v1923_v41, %v7903_v30  ;;  %v7906_v7 = vpop.permute.xlu1 %7905  ;;  %v1975_v54 = vpack.c.bf16 %v1954_v35, %v1953_v37  ;;  %v7442_v14 = vunpack.i.l.bf16 %v11626_v27 }
 0x17c   : > { %v7911_v26 = vpop.permute.xlu0 %7910  ;;  %v1976_v39 = vpack.c.bf16 %v1956_v49, %v1955_v5  ;;  %v7908_v16 = vunpack.i.h.bf16 %v7906_v7  ;;  %v7907_v15 = vunpack.i.l.bf16 %v7906_v7  ;;  %v7448_v28 = vunpack.i.h.bf16 %v11627_v12 }
 0x17d   : > { %7241 = vmatprep.mubr.msk.bf16.mxu0 %vm2008_vm11, %v1975_v54  ;;  %v7913_v48 = vunpack.i.h.bf16 %v7911_v26  ;;  %v7912_v10 = vunpack.i.l.bf16 %v7911_v26  ;;  %v7447_v8 = vunpack.i.l.bf16 %v11627_v12  ;;  %vm5845_vm13 = vcmask 1046534  }
 0x17e   : > { %7242 = vmatmul.mubr.msk.bf16.gmra.mrb[20].mxu0 %vm2008_vm11, %v1976_v39  ;;  %v1825_v17 = vsel %vm1800_vm6, %v1792_v45, %v7907_v15  ;;  %v1826_v13 = vsel %vm1800_vm6, %v1793_v55, %v7908_v16  ;;  %v11629_v16 = vld [vmem:[#allocation26_spill] sm:$0xff] }
 0x17f   : > { %v7916_v11 = vpop.permute.xlu1 %7915  ;;  %v1828_v9 = vsel %vm1800_vm6, %v1795_v36, %v7913_v48  ;;  %v1827_v41 = vsel %vm1800_vm6, %v1794_v57, %v7912_v10  ;;  %v7528_v15 = vunpack.i.h.bf16 %v11629_v16  ;;  %v11630_v45 = vld [vmem:[#allocation34_spill] sm:$0xff]  ;;  %v8835_v10 = vld [vmem:[#allocation2 + $0x158] sm:$0xff] }
 0x180   : > { %v7921_v24 = vpop.permute.xlu0 %7920  ;;  %v7918_v46 = vunpack.i.h.bf16 %v7916_v11  ;;  %v7917_v42 = vunpack.i.l.bf16 %v7916_v11  ;;  %v7602_v55 = vunpack.i.l.bf16 %v11630_v45  ;;  %v1731_v57 = vsel %vm310_vm0, %v8835_v10, %v7443_v25  ;;  %v8836_v36 = vld [vmem:[#allocation2 + $0x150] sm:$0xff] }
 0x181   : > { %v7923_v29 = vunpack.i.h.bf16 %v7921_v24  ;;  %v7922_v23 = vunpack.i.l.bf16 %v7921_v24 }
 0x182   : > { %v1858_v5 = vsel %vm1833_vm7, %v1825_v17, %v7917_v42  ;;  %v1859_v49 = vsel %vm1833_vm7, %v1826_v13, %v7918_v46  ;;  %v1730_v46 = vsel %vm310_vm0, %v8836_v36, %v7442_v14  ;;  %v8837_v42 = vld [vmem:[#allocation2 + $0x170] sm:$0xff] }
 0x183   : > { %v7926_v61 = vpop.permute.xlu1 %7925  ;;  %v1860_v26 = vsel %vm1833_vm7, %v1827_v41, %v7922_v23  ;;  %v1861_v39 = vsel %vm1833_vm7, %v1828_v9, %v7923_v29  ;;  %v1733_v29 = vsel %vm310_vm0, %v8837_v42, %v7448_v28  ;;  %v7603_v23 = vunpack.i.h.bf16 %v11630_v45 }
 0x184   : > { %v7931_v44 = vpop.permute.xlu0 %7930  ;;  %v7928_v38 = vunpack.i.h.bf16 %v7926_v61  ;;  %v7927_v4 = vunpack.i.l.bf16 %v7926_v61  ;;  %v11628_v61 = vld [vmem:[#allocation25_spill] sm:$0xff]  ;;  %v1766_v41 = vsel %vm1734_vm3, %v1733_v29, %v7528_v15 }
 0x185   : > { %v7933_v30 = vunpack.i.h.bf16 %v7931_v44  ;;  %v7932_v53 = vunpack.i.l.bf16 %v7931_v44  ;;  %v7523_v59 = vunpack.i.h.bf16 %v11628_v61  ;;  %v7522_v31 = vunpack.i.l.bf16 %v11628_v61 }
 0x186   : > { %v1891_v20 = vsel %vm1866_vm8, %v1858_v5, %v7927_v4  ;;  %v1892_v6 = vsel %vm1866_vm8, %v1859_v49, %v7928_v38  ;;  %v7527_v44 = vunpack.i.l.bf16 %v11629_v16 }
 0x187   : > { %v7936_v47 = vpop.permute.xlu1 %7935  ;;  %v1893_v58 = vsel %vm1866_vm8, %v1860_v26, %v7932_v53  ;;  %v1894_v43 = vsel %vm1866_vm8, %v1861_v39, %v7933_v30  ;;  %v8838_v30 = vld [vmem:[#allocation2 + $0x168] sm:$0xff]  ;;  %v1764_v9 = vsel %vm1734_vm3, %v1731_v57, %v7523_v59 }
 0x188   : > { %v7941_v18 = vpop.permute.xlu0 %7940  ;;  %v7938_v37 = vunpack.i.h.bf16 %v7936_v47  ;;  %v7937_v35 = vunpack.i.l.bf16 %v7936_v47  ;;  %v1732_v53 = vsel %vm310_vm0, %v8838_v30, %v7447_v8  ;;  %vm3806_vm0 = vcmask 392192  }
 0x189   : > { %v7943_v7 = vunpack.i.h.bf16 %v7941_v18  ;;  %v7942_v54 = vunpack.i.l.bf16 %v7941_v18  ;;  %v1763_v18 = vsel %vm1734_vm3, %v1730_v46, %v7522_v31  ;;  %v10207_v46 = vld [vmem:[%s11538_s2] ss:$0 sm:$0xff] }
 0x18a   : > { %v1924_v22 = vsel %vm1899_vm9, %v1891_v20, %v7937_v35  ;;  %v1925_v11 = vsel %vm1899_vm9, %v1892_v6, %v7938_v37  ;;  %v1765_v37 = vsel %vm1734_vm3, %v1732_v53, %v7527_v44  ;;  %v1796_v35 = vsel %vm1767_vm5, %v1763_v18, %v7602_v55 }
 0x18b   : > { %v7946_v19 = vpop.permute.xlu1 %7945  ;;  %v1926_v3 = vsel %vm1899_vm9, %v1893_v58, %v7942_v54  ;;  %v1927_v24 = vsel %vm1899_vm9, %v1894_v43, %v7943_v7  ;;  %v1797_v54 = vsel %vm1767_vm5, %v1764_v9, %v7603_v23 }
 0x18c   : > { %v7948_v62 = vunpack.i.h.bf16 %v7946_v19  ;;  %v7947_v0 = vunpack.i.l.bf16 %v7946_v19  ;;  %v7951_v51 = vpop.permute.xlu0 %7950 }
 0x18d   : > { %v7953_v21 = vunpack.i.h.bf16 %v7951_v51  ;;  %v7952_v32 = vunpack.i.l.bf16 %v7951_v51 }
 0x18e   : > { %v1957_v1 = vsel %vm1932_vm10, %v1924_v22, %v7947_v0  ;;  %v1958_v56 = vsel %vm1932_vm10, %v1925_v11, %v7948_v62 }
 0x18f   : > { %v1959_v63 = vsel %vm1932_vm10, %v1926_v3, %v7952_v32  ;;  %v1960_v34 = vsel %vm1932_vm10, %v1927_v24, %v7953_v21  ;;  %v7956_v40 = vpop.permute.xlu1 %7955  ;;  %v1977_v2 = vpack.c.bf16 %v1958_v56, %v1957_v1 }
 0x190   : > { %v7961_v60 = vpop.permute.xlu0 %7960  ;;  %v1978_v52 = vpack.c.bf16 %v1960_v34, %v1959_v63  ;;  %v7958_v4 = vunpack.i.h.bf16 %v7956_v40  ;;  %v7957_v47 = vunpack.i.l.bf16 %v7956_v40 }
 0x191   : > { %7245 = vmatprep.mubr.msk.bf16.mxu0 %vm2008_vm11, %v1977_v2  ;;  %v7963_v17 = vunpack.i.h.bf16 %v7961_v60  ;;  %v7962_v13 = vunpack.i.l.bf16 %v7961_v60 }
 0x192   : > { %7246 = vmatmul.mubr.msk.bf16.gmra.mrb[24].mxu0 %vm2008_vm11, %v1978_v52  ;;  %v1798_v19 = vsel %vm1767_vm5, %v1765_v37, %v7957_v47  ;;  %v1799_v58 = vsel %vm1767_vm5, %v1766_v41, %v7958_v4  ;;  %vm5835_vm5 = vcmask 1041409  }
 0x193   : > { %v10156_v33 = vpop.permute.xlu1 %7965  ;;  %v1829_v43 = vsel %vm1800_vm6, %v1796_v35, %v7962_v13  ;;  %v1830_v62 = vsel %vm1800_vm6, %v1797_v54, %v7963_v17 }
 0x194   : > { %v7971_v50 = vpop.permute.xlu0 %7970  ;;  %v7967_v26 = vunpack.i.l.bf16 %v10156_v33  ;;  %v7968_v0 = vunpack.i.h.bf16 %v10156_v33 }
 0x195   : > { %v7973_v5 = vunpack.i.h.bf16 %v7971_v50  ;;  %v7972_v49 = vunpack.i.l.bf16 %v7971_v50 }
 0x196   : > { %v1831_v56 = vsel %vm1800_vm6, %v1798_v19, %v7967_v26  ;;  %v1832_v25 = vsel %vm1800_vm6, %v1799_v58, %v7968_v0 }
 0x197   : > { %v7976_v48 = vpop.permute.xlu1 %7975  ;;  %v1862_v21 = vsel %vm1833_vm7, %v1829_v43, %v7972_v49  ;;  %v1863_v32 = vsel %vm1833_vm7, %v1830_v62, %v7973_v5 }
 0x198   : > { %v7981_v38 = vpop.permute.xlu0 %7980  ;;  %v7977_v51 = vunpack.i.l.bf16 %v7976_v48  ;;  %v7978_v3 = vunpack.i.h.bf16 %v7976_v48 }
 0x199   : > { %v7983_v39 = vunpack.i.h.bf16 %v7981_v38  ;;  %v7982_v20 = vunpack.i.l.bf16 %v7981_v38 }
 0x19a   : > { %v1864_v14 = vsel %vm1833_vm7, %v1831_v56, %v7977_v51  ;;  %v1865_v50 = vsel %vm1833_vm7, %v1832_v25, %v7978_v3  ;;  %vm5837_vm7 = vcmask 1042434  }
 0x19b   : > { %v7986_v7 = vpop.permute.xlu1 %7985  ;;  %v1895_v63 = vsel %vm1866_vm8, %v1862_v21, %v7982_v20  ;;  %v1896_v34 = vsel %vm1866_vm8, %v1863_v32, %v7983_v39 }
 0x19c   : > { %v7991_v6 = vpop.permute.xlu0 %7990  ;;  %v7987_v24 = vunpack.i.l.bf16 %v7986_v7  ;;  %v7988_v40 = vunpack.i.h.bf16 %v7986_v7 }
 0x19d   : > { %v7993_v22 = vunpack.i.h.bf16 %v7991_v6  ;;  %v7992_v11 = vunpack.i.l.bf16 %v7991_v6 }
 0x19e   : > { %v1897_v8 = vsel %vm1866_vm8, %v1864_v14, %v7987_v24  ;;  %v1898_v16 = vsel %vm1866_vm8, %v1865_v50, %v7988_v40 }
 0x19f   : > { %v7996_v1 = vpop.permute.xlu1 %7995  ;;  %v1928_v12 = vsel %vm1899_vm9, %v1895_v63, %v7992_v11  ;;  %v1929_v28 = vsel %vm1899_vm9, %v1896_v34, %v7993_v22 }
 0x1a0   : > { %v8001_v2 = vpop.permute.xlu0 %8000  ;;  %v7998_v60 = vunpack.i.h.bf16 %v7996_v1  ;;  %v7997_v52 = vunpack.i.l.bf16 %v7996_v1 }
 0x1a1   : > { %v8003_v33 = vunpack.i.h.bf16 %v8001_v2  ;;  %v8002_v27 = vunpack.i.l.bf16 %v8001_v2 }
 0x1a2   : > { %v1930_v55 = vsel %vm1899_vm9, %v1897_v8, %v7997_v52  ;;  %v1931_v48 = vsel %vm1899_vm9, %v1898_v16, %v7998_v60  ;;  %v8812_v60 = vld [vmem:[%s11539_s3] sm:$0xff]   ;;  %v8814_v16 = vld [vmem:[%s11539_s3 + $0x10] sm:$0xff]   ;;  %vm5839_vm9 = vcmask 1043459  }
 0x1a3   : > { %v1961_v61 = vsel %vm1932_vm10, %v1928_v12, %v8002_v27  ;;  %v1962_v59 = vsel %vm1932_vm10, %v1929_v28, %v8003_v33  ;;  %v8006_v31 = vpop.permute.xlu1 %8005  ;;  %7253 = vmatprep.subr.bf16.mxu1 %v8812_v60  ;;  %v8813_v27 = vld [vmem:[%s11539_s3 + $0x8] sm:$0xff]  }
 0x1a4   : > { %v8008_v15 = vunpack.i.h.bf16 %v8006_v31  ;;  %v8007_v44 = vunpack.i.l.bf16 %v8006_v31  ;;  %v1979_v45 = vpack.c.bf16 %v1962_v59, %v1961_v61  ;;  %7254 = vmatpush3.bf16.msra.mxu1 %v8812_v60 }
 0x1a5   : > { %7255 = vmatprep.subr.bf16.mxu1 %v8813_v27 }
 0x1a6   : > { %v1963_v10 = vsel %vm1932_vm10, %v1930_v55, %v8007_v44  ;;  %v1964_v57 = vsel %vm1932_vm10, %v1931_v48, %v8008_v15  ;;  %7249 = vmatprep.mubr.msk.bf16.mxu0 %vm2008_vm11, %v1979_v45 }
 0x1a7   : > { %v1980_v36 = vpack.c.bf16 %v1964_v57, %v1963_v10 }
 0x1a8   : > { %7256 = vmatpush3.bf16.msra.mxu1 %v8813_v27 }
 0x1a9   : > { %7250 = vmatmul.mubr.msk.bf16.gmra.mrb[28].mxu0 %vm2008_vm11, %v1980_v36  ;;  %7257 = vmatprep.subr.bf16.mxu1 %v8814_v16  ;;  %vm5841_vm11 = vcmask 1044484  }
 0x1ac   : > { %7258 = vmatpush3.bf16.msra.mxu1 %v8814_v16 }
 0x1ed   : > { %v7223_v42 = vpop.f32.mrb[0].mxu0 }
 0x1ee   : > { %v2104_v29 = vadd.f32 %v7223_v42, %v10207_v46  ;;  %v2095_v23 = vpop.f32.mrb[1].mxu0 }
 0x1ef   : > { %v2096_v38 = vadd.f32 %v10207_v46, %v2095_v23  ;;  %v7224_v4 = vpop.f32.mrb[2].mxu0  ;;  %v8815_v23 = vld [vmem:[%s11539_s3 + $0x18] sm:$0xff]  }
 0x1f0   : > { %v2224_v47 = vmax.f32 %v2104_v29, 0.0  ;;  %v2107_v17 = vadd.f32 %v7224_v4, %v10207_v46  ;;  %v2098_v13 = vpop.f32.mrb[3].mxu0  ;;  %7259 = vmatprep.subr.bf16.mxu1 %v8815_v23  ;;  %v8816_v4 = vld [vmem:[%s11539_s3 + $0x20] ss:$0 sps:$4 sm:$0xff]  }
 0x1f1   : > { %v2222_v30 = vmax.f32 %v2096_v38, 0.0  ;;  %v2099_v53 = vadd.f32 %v10207_v46, %v2098_v13  ;;  %7260 = vmatpush3.bf16.msra.mxu1 %v8815_v23 }
 0x1f2   : > { %2302 = vst.msk [vmem:[#allocation3 + $0x31] sm:$0xff] %vm1734_vm3, %v2224_v47  ;;  %v2225_v18 = vmax.f32 %v2107_v17, 0.0  ;;  %7314 = vmatprep.subr.msk.bf16.mxu1 %vm4013_vm14, %v8816_v4  ;;  %v4015_v17 = vsel %vm4013_vm14, %v8816_v4, 0 }
 0x1f3   : > { %2300 = vst.msk [vmem:[#allocation3 + $0x19] sm:$0xff] %vm1734_vm3, %v2222_v30  ;;  %v2223_v9 = vmax.f32 %v2099_v53, 0.0 }
 0x1f4   : > { %2303 = vst.msk [vmem:[#allocation3 + $0x39] sm:$0xff] %vm1734_vm3, %v2225_v18 }
 0x1f5   : > { %2301 = vst.msk [vmem:[#allocation3 + $0x21] sm:$0xff] %vm1734_vm3, %v2223_v9  ;;  %7262 = vmatpush3.bf16.msra.mxu1 %v4015_v17 }
 0x1f9   : > { %v10217_v41 = vld [vmem:[#allocation3 + $0x30] sm:$0xff] }
 0x1fa   : > { %v2557_v49 = vld [vmem:[#allocation3 + $0x31] sm:$0xff]  ;;  %v2366_v56 = vld [vmem:[#allocation3 + $0x19] sm:$0xff] }
 0x1fb   : > { %v10219_v37 = vld [vmem:[#allocation3 + $0x38] sm:$0xff] }
 0x1fc   : > { %v8034_v35 = vpack.i.bf16 %v10219_v37, %v10217_v41  ;;  %v2558_v5 = vld [vmem:[#allocation3 + $0x39] sm:$0xff]  ;;  %v2367_v24 = vld [vmem:[#allocation3 + $0x21] sm:$0xff] }
 0x1fd   : > { %v8039_v7 = vpack.i.bf16 %v2558_v5, %v2557_v49  ;;  %v2589_v26 = vld [vmem:[#allocation3 + $0x32] sm:$0xff]  ;;  %v2590_v39 = vld [vmem:[#allocation3 + $0x3a] sm:$0xff]  ;;  %v8059_v34 = vpack.i.bf16 %v2367_v24, %v2366_v56  ;;  %v2399_v2 = vld [vmem:[#allocation3 + $0x22] sm:$0xff] }
 0x1fe   : > { %8035 = vrot.lane.b32.xlu0 %v8034_v35, %s8914_s22  ;;  %8020 = vrot.lane.b32.xlu1 %v8034_v35, %s8911_s15  ;;  %v8044_v51 = vpack.i.bf16 %v2590_v39, %v2589_v26  ;;  %v10237_v3 = vld [vmem:[#allocation3 + $0x20] sm:$0xff]  ;;  %v10241_v1 = vld [vmem:[#allocation3 + $0x18] sm:$0xff] }
 0x1ff   : > { %v8069_v63 = vpack.i.bf16 %v10237_v3, %v10241_v1  ;;  %v2398_v40 = vld [vmem:[#allocation3 + $0x1a] sm:$0xff] }
 0x200   : > { %v8064_v52 = vpack.i.bf16 %v2399_v2, %v2398_v40 }
 0x201   : > { %v7227_v54 = vpop.f32.mrb[4].mxu0 }
 0x202   : > { %v2120_v20 = vadd.f32 %v7227_v54, %v10207_v46  ;;  %8040 = vrot.lane.b32.xlu0 %v8039_v7, %s8915_s29  ;;  %8025 = vrot.lane.b32.xlu1 %v8039_v7, %s8913_s17  ;;  %v2111_v6 = vpop.f32.mrb[5].mxu0 }
 0x203   : > { %v2112_v19 = vadd.f32 %v10207_v46, %v2111_v6  ;;  %v7228_v58 = vpop.f32.mrb[6].mxu0 }
 0x204   : > { %v2228_v43 = vmax.f32 %v2120_v20, 0.0  ;;  %v2123_v62 = vadd.f32 %v7228_v58, %v10207_v46  ;;  %v2114_v0 = vpop.f32.mrb[7].mxu0 }
 0x205   : > { %v2226_v22 = vmax.f32 %v2112_v19, 0.0  ;;  %v2115_v11 = vadd.f32 %v10207_v46, %v2114_v0 }
 0x206   : > { %2306 = vst.msk [vmem:[#allocation3 + $0x61] sm:$0xff] %vm1734_vm3, %v2228_v43  ;;  %v2229_v21 = vmax.f32 %v2123_v62, 0.0  ;;  %8045 = vrot.lane.b32.xlu0 %v8044_v51, %s8916_s8  ;;  %8030 = vrot.lane.b32.xlu1 %v8044_v51, %s8917_s9 }
 0x207   : > { %2304 = vst.msk [vmem:[#allocation3 + $0x49] sm:$0xff] %vm1734_vm3, %v2226_v22  ;;  %v2227_v32 = vmax.f32 %v2115_v11, 0.0 }
 0x208   : > { %2307 = vst.msk [vmem:[#allocation3 + $0x69] sm:$0xff] %vm1734_vm3, %v2229_v21 }
 0x209   : > { %2305 = vst.msk [vmem:[#allocation3 + $0x51] sm:$0xff] %vm1734_vm3, %v2227_v32 }
 0x20a   : > { %8055 = vrot.lane.b32.xlu0 %v8044_v51, %s8909_s23  ;;  %8050 = vrot.lane.b32.xlu1 %v8039_v7, %s8907_s19 }
 0x20d   : > { %v10257_v25 = vld [vmem:[#allocation3 + $0x60] sm:$0xff] }
 0x20e   : > { %8070 = vrot.lane.b32.xlu0 %v8069_v63, %s8911_s15  ;;  %8060 = vrot.lane.b32.xlu1 %v8059_v34, %s8907_s19  ;;  %v2466_v31 = vld [vmem:[#allocation3 + $0x61] sm:$0xff]  ;;  %v2559_v35 = vld [vmem:[#allocation3 + $0x49] sm:$0xff] }
 0x20f   : > { %v10250_v33 = vld [vmem:[#allocation3 + $0x68] sm:$0xff] }
 0x210   : > { %v8084_v14 = vpack.i.bf16 %v10250_v33, %v10257_v25  ;;  %v2467_v28 = vld [vmem:[#allocation3 + $0x69] sm:$0xff]  ;;  %v2592_v18 = vld [vmem:[#allocation3 + $0x52] sm:$0xff] }
 0x211   : > { %v8089_v55 = vpack.i.bf16 %v2467_v28, %v2466_v31  ;;  %v2498_v57 = vld [vmem:[#allocation3 + $0x62] sm:$0xff]  ;;  %v2499_v36 = vld [vmem:[#allocation3 + $0x6a] sm:$0xff] }
 0x212   : > { %8075 = vrot.lane.b32.xlu0 %v8059_v34, %s8913_s17  ;;  %8065 = vrot.lane.b32.xlu1 %v8064_v52, %s8909_s23  ;;  %v8094_v38 = vpack.i.bf16 %v2499_v36, %v2498_v57  ;;  %v10284_v47 = vld [vmem:[#allocation3 + $0x50] sm:$0xff]  ;;  %v10290_v13 = vld [vmem:[#allocation3 + $0x48] sm:$0xff] }
 0x213   : > { %v8124_v30 = vpack.i.bf16 %v10284_v47, %v10290_v13  ;;  %v2591_v53 = vld [vmem:[#allocation3 + $0x4a] sm:$0xff] }
 0x214   : > { %v2560_v9 = vld [vmem:[#allocation3 + $0x51] sm:$0xff]  ;;  %v8134_v5 = vpack.i.bf16 %v2592_v18, %v2591_v53 }
 0x215   : > { %v7231_v12 = vpop.f32.mrb[8].mxu0  ;;  %v8129_v49 = vpack.i.bf16 %v2560_v9, %v2559_v35 }
 0x216   : > { %v2136_v50 = vadd.f32 %v7231_v12, %v10207_v46  ;;  %v2127_v8 = vpop.f32.mrb[9].mxu0  ;;  %8080 = vrot.lane.b32.xlu0 %v8064_v52, %s8917_s9  ;;  %8085 = vrot.lane.b32.xlu1 %v8084_v14, %s8911_s15 }
 0x217   : > { %v2128_v61 = vadd.f32 %v10207_v46, %v2127_v8  ;;  %v7232_v59 = vpop.f32.mrb[10].mxu0 }
 0x218   : > { %v2232_v15 = vmax.f32 %v2136_v50, 0.0  ;;  %v2139_v44 = vadd.f32 %v7232_v59, %v10207_v46  ;;  %v2130_v45 = vpop.f32.mrb[11].mxu0 }
 0x219   : > { %v2230_v48 = vmax.f32 %v2128_v61, 0.0  ;;  %v2131_v10 = vadd.f32 %v10207_v46, %v2130_v45 }
 0x21a   : > { %2310 = vst.msk [vmem:[#allocation3 + $0x91] sm:$0xff] %vm1734_vm3, %v2232_v15  ;;  %v2233_v42 = vmax.f32 %v2139_v44, 0.0  ;;  %8100 = vrot.lane.b32.xlu0 %v8084_v14, %s8914_s22  ;;  %8090 = vrot.lane.b32.xlu1 %v8089_v55, %s8913_s17 }
 0x21b   : > { %2308 = vst.msk [vmem:[#allocation3 + $0x79] sm:$0xff] %vm1734_vm3, %v2230_v48  ;;  %v2231_v29 = vmax.f32 %v2131_v10, 0.0 }
 0x21c   : > { %2311 = vst.msk [vmem:[#allocation3 + $0x99] sm:$0xff] %vm1734_vm3, %v2233_v42 }
 0x21d   : > { %2309 = vst.msk [vmem:[#allocation3 + $0x81] sm:$0xff] %vm1734_vm3, %v2231_v29 }
 0x21e   : > { %8105 = vrot.lane.b32.xlu0 %v8089_v55, %s8915_s29  ;;  %8095 = vrot.lane.b32.xlu1 %v8094_v38, %s8917_s9 }
 0x221   : > { %v2438_v11 = vld [vmem:[#allocation3 + $0x90] sm:$0xff] }
 0x222   : > { %8110 = vrot.lane.b32.xlu0 %v8094_v38, %s8916_s8  ;;  %8115 = vrot.lane.b32.xlu1 %v8089_v55, %s8907_s19  ;;  %v2470_v24 = vld [vmem:[#allocation3 + $0x91] sm:$0xff]  ;;  %v2563_v10 = vld [vmem:[#allocation3 + $0x79] sm:$0xff] }
 0x223   : > { %v2439_v22 = vld [vmem:[#allocation3 + $0x98] sm:$0xff] }
 0x224   : > { %v8164_v21 = vpack.i.bf16 %v2439_v22, %v2438_v11  ;;  %v2471_v32 = vld [vmem:[#allocation3 + $0x99] sm:$0xff]  ;;  %v2596_v55 = vld [vmem:[#allocation3 + $0x82] sm:$0xff] }
 0x225   : > { %v8169_v56 = vpack.i.bf16 %v2471_v32, %v2470_v24  ;;  %v2502_v63 = vld [vmem:[#allocation3 + $0x92] sm:$0xff]  ;;  %v2503_v34 = vld [vmem:[#allocation3 + $0x9a] sm:$0xff] }
 0x226   : > { %8120 = vrot.lane.b32.xlu0 %v8094_v38, %s8909_s23  ;;  %8125 = vrot.lane.b32.xlu1 %v8124_v30, %s8914_s22  ;;  %v8174_v40 = vpack.i.bf16 %v2503_v34, %v2502_v63  ;;  %v2532_v59 = vld [vmem:[#allocation3 + $0x80] sm:$0xff]  ;;  %v2531_v15 = vld [vmem:[#allocation3 + $0x78] sm:$0xff] }
 0x227   : > { %v8204_v44 = vpack.i.bf16 %v2532_v59, %v2531_v15  ;;  %v2595_v45 = vld [vmem:[#allocation3 + $0x7a] sm:$0xff] }
 0x228   : > { %v2564_v48 = vld [vmem:[#allocation3 + $0x81] sm:$0xff]  ;;  %v8214_v57 = vpack.i.bf16 %v2596_v55, %v2595_v45 }
 0x229   : > { %v7235_v7 = vpop.f32.mrb[12].mxu0  ;;  %v8209_v36 = vpack.i.bf16 %v2564_v48, %v2563_v10 }
 0x22a   : > { %v2152_v54 = vadd.f32 %v7235_v7, %v10207_v46  ;;  %v2143_v26 = vpop.f32.mrb[13].mxu0  ;;  %8135 = vrot.lane.b32.xlu0 %v8134_v5, %s8916_s8  ;;  %8130 = vrot.lane.b32.xlu1 %v8129_v49, %s8915_s29 }
 0x22b   : > { %v2144_v39 = vadd.f32 %v10207_v46, %v2143_v26  ;;  %v7236_v20 = vpop.f32.mrb[14].mxu0 }
 0x22c   : > { %v2236_v6 = vmax.f32 %v2152_v54, 0.0  ;;  %v2155_v19 = vadd.f32 %v7236_v20, %v10207_v46  ;;  %v2146_v58 = vpop.f32.mrb[15].mxu0 }
 0x22d   : > { %v2234_v43 = vmax.f32 %v2144_v39, 0.0  ;;  %v2147_v62 = vadd.f32 %v10207_v46, %v2146_v58 }
 0x22e   : > { %2314 = vst.msk [vmem:[#allocation3 + $0xc1] sm:$0xff] %vm1734_vm3, %v2236_v6  ;;  %v2237_v0 = vmax.f32 %v2155_v19, 0.0  ;;  %8150 = vrot.lane.b32.xlu0 %v8124_v30, %s8911_s15  ;;  %8140 = vrot.lane.b32.xlu1 %v8129_v49, %s8907_s19 }
 0x22f   : > { %2312 = vst.msk [vmem:[#allocation3 + $0xa9] sm:$0xff] %vm1734_vm3, %v2234_v43  ;;  %v2235_v51 = vmax.f32 %v2147_v62, 0.0 }
 0x230   : > { %2315 = vst.msk [vmem:[#allocation3 + $0xc9] sm:$0xff] %vm1734_vm3, %v2237_v0 }
 0x231   : > { %2313 = vst.msk [vmem:[#allocation3 + $0xb1] sm:$0xff] %vm1734_vm3, %v2235_v51  ;;  %v10350_v51 = vpop.permute.xlu0 %8010 }
 0x232   : > { %8155 = vrot.lane.b32.xlu0 %v8129_v49, %s8913_s17  ;;  %8145 = vrot.lane.b32.xlu1 %v8134_v5, %s8909_s23 }
 0x235   : > { %v2442_v30 = vld [vmem:[#allocation3 + $0xc0] sm:$0xff] }
 0x236   : > { %8160 = vrot.lane.b32.xlu0 %v8134_v5, %s8917_s9  ;;  %8165 = vrot.lane.b32.xlu1 %v8164_v21, %s8911_s15  ;;  %v2474_v39 = vld [vmem:[#allocation3 + $0xc1] sm:$0xff] }
 0x237   : > { %v2443_v29 = vld [vmem:[#allocation3 + $0xc8] sm:$0xff] }
 0x238   : > { %v8244_v35 = vpack.i.bf16 %v2443_v29, %v2442_v30  ;;  %v2475_v7 = vld [vmem:[#allocation3 + $0xc9] sm:$0xff]  ;;  %v2568_v32 = vld [vmem:[#allocation3 + $0xb1] sm:$0xff] }
 0x239   : > { %v8249_v20 = vpack.i.bf16 %v2475_v7, %v2474_v39  ;;  %v2506_v6 = vld [vmem:[#allocation3 + $0xc2] sm:$0xff]  ;;  %v2507_v19 = vld [vmem:[#allocation3 + $0xca] sm:$0xff]  ;;  %v8013_v7 = vunpack.i.h.bf16 %v10350_v51 }
 0x23a   : > { %8180 = vrot.lane.b32.xlu0 %v8164_v21, %s8914_s22  ;;  %8170 = vrot.lane.b32.xlu1 %v8169_v56, %s8913_s17  ;;  %v8254_v58 = vpack.i.bf16 %v2507_v19, %v2506_v6  ;;  %v2536_v43 = vld [vmem:[#allocation3 + $0xb0] sm:$0xff]  ;;  %v2535_v62 = vld [vmem:[#allocation3 + $0xa8] sm:$0xff] }
 0x23b   : > { %v8284_v0 = vpack.i.bf16 %v2536_v43, %v2535_v62  ;;  %v2599_v11 = vld [vmem:[#allocation3 + $0xaa] sm:$0xff]  ;;  %v2600_v21 = vld [vmem:[#allocation3 + $0xb2] sm:$0xff] }
 0x23d   : > { %v7239_v2 = vpop.f32.mrb[16].mxu0 }
 0x23e   : > { %v2168_v60 = vadd.f32 %v7239_v2, %v10207_v46  ;;  %v2159_v52 = vpop.f32.mrb[17].mxu0  ;;  %8185 = vrot.lane.b32.xlu0 %v8169_v56, %s8915_s29  ;;  %8175 = vrot.lane.b32.xlu1 %v8174_v40, %s8917_s9 }
 0x23f   : > { %v2160_v27 = vadd.f32 %v10207_v46, %v2159_v52  ;;  %v7240_v14 = vpop.f32.mrb[18].mxu0 }
 0x240   : > { %v2240_v12 = vmax.f32 %v2168_v60, 0.0  ;;  %v2171_v28 = vadd.f32 %v7240_v14, %v10207_v46  ;;  %v2162_v50 = vpop.f32.mrb[19].mxu0 }
 0x241   : > { %v2238_v8 = vmax.f32 %v2160_v27, 0.0  ;;  %v2163_v61 = vadd.f32 %v10207_v46, %v2162_v50  ;;  %v8294_v27 = vpack.i.bf16 %v2600_v21, %v2599_v11 }
 0x242   : > { %2318 = vst.msk [vmem:[#allocation3 + $0xf1] sm:$0xff] %vm1734_vm3, %v2240_v12  ;;  %v2241_v31 = vmax.f32 %v2171_v28, 0.0  ;;  %8190 = vrot.lane.b32.xlu0 %v8174_v40, %s8916_s8  ;;  %8195 = vrot.lane.b32.xlu1 %v8169_v56, %s8907_s19 }
 0x243   : > { %2316 = vst.msk [vmem:[#allocation3 + $0xd9] sm:$0xff] %vm1734_vm3, %v2238_v8  ;;  %v2239_v16 = vmax.f32 %v2163_v61, 0.0  ;;  %v10361_v8 = vpop.permute.xlu0 %8015 }
 0x244   : > { %2319 = vst.msk [vmem:[#allocation3 + $0xf9] sm:$0xff] %vm1734_vm3, %v2241_v31 }
 0x245   : > { %2317 = vst.msk [vmem:[#allocation3 + $0xe1] sm:$0xff] %vm1734_vm3, %v2239_v16 }
 0x246   : > { %8200 = vrot.lane.b32.xlu0 %v8174_v40, %s8909_s23  ;;  %8205 = vrot.lane.b32.xlu1 %v8204_v44, %s8914_s22  ;;  %v2567_v40 = vld [vmem:[#allocation3 + $0xa9] sm:$0xff] }
 0x247   : > { %v8289_v14 = vpack.i.bf16 %v2568_v32, %v2567_v40 }
 0x249   : > { %v2446_v15 = vld [vmem:[#allocation3 + $0xf0] sm:$0xff] }
 0x24a   : > { %8215 = vrot.lane.b32.xlu0 %v8214_v57, %s8916_s8  ;;  %8210 = vrot.lane.b32.xlu1 %v8209_v36, %s8915_s29  ;;  %v2476_v39 = vld [vmem:[#allocation3 + $0xd9] sm:$0xff] }
 0x24b   : > { %v2447_v16 = vld [vmem:[#allocation3 + $0xf8] sm:$0xff] }
 0x24c   : > { %v10378_v55 = vpack.i.bf16 %v2447_v16, %v2446_v15  ;;  %v2603_v48 = vld [vmem:[#allocation3 + $0xda] sm:$0xff]  ;;  %v2604_v10 = vld [vmem:[#allocation3 + $0xe2] sm:$0xff] }
 0x24e   : > { %8230 = vrot.lane.b32.xlu0 %v8204_v44, %s8911_s15  ;;  %8220 = vrot.lane.b32.xlu1 %v8209_v36, %s8907_s19 }
 0x251   : > { %v7243_v42 = vpop.f32.mrb[20].mxu0 }
 0x252   : > { %v2184_v23 = vadd.f32 %v7243_v42, %v10207_v46  ;;  %v2175_v38 = vpop.f32.mrb[21].mxu0  ;;  %8235 = vrot.lane.b32.xlu0 %v8209_v36, %s8913_s17  ;;  %8225 = vrot.lane.b32.xlu1 %v8214_v57, %s8909_s23  ;;  %v2478_v36 = vld [vmem:[#allocation3 + $0xf1] sm:$0xff] }
 0x253   : > { %v2176_v4 = vadd.f32 %v10207_v46, %v2175_v38  ;;  %v7244_v17 = vpop.f32.mrb[22].mxu0 }
 0x254   : > { %v2244_v53 = vmax.f32 %v2184_v23, 0.0  ;;  %v2187_v18 = vadd.f32 %v7244_v17, %v10207_v46  ;;  %v2178_v9 = vpop.f32.mrb[23].mxu0  ;;  %v10387_v23 = vpack.i.bf16 %v2604_v10, %v2603_v48  ;;  %v2444_v17 = vld [vmem:[#allocation3 + $0xd8] sm:$0xff] }
 0x255   : > { %v2242_v5 = vmax.f32 %v2176_v4, 0.0  ;;  %v2179_v49 = vadd.f32 %v10207_v46, %v2178_v9  ;;  %v2445_v4 = vld [vmem:[#allocation3 + $0xe0] sm:$0xff] }
 0x256   : > { %2322 = vst.msk [vmem:[#allocation3 + $0x121] sm:$0xff] %vm1734_vm3, %v2244_v53  ;;  %v2245_v54 = vmax.f32 %v2187_v18, 0.0  ;;  %8240 = vrot.lane.b32.xlu0 %v8214_v57, %s8917_s9  ;;  %8245 = vrot.lane.b32.xlu1 %v8244_v35, %s8911_s15  ;;  %v2479_v57 = vld [vmem:[#allocation3 + $0xf9] sm:$0xff]  ;;  %v8359_v18 = vpack.i.bf16 %v2445_v4, %v2444_v17 }
 0x257   : > { %2320 = vst.msk [vmem:[#allocation3 + $0x109] sm:$0xff] %vm1734_vm3, %v2242_v5  ;;  %v2243_v26 = vmax.f32 %v2179_v49, 0.0  ;;  %v10389_v38 = vpack.i.bf16 %v2479_v57, %v2478_v36 }
 0x258   : > { %2323 = vst.msk [vmem:[#allocation3 + $0x129] sm:$0xff] %vm1734_vm3, %v2245_v54 }
 0x259   : > { %2321 = vst.msk [vmem:[#allocation3 + $0x111] sm:$0xff] %vm1734_vm3, %v2243_v26 }
 0x25a   : > { %8260 = vrot.lane.b32.xlu0 %v8244_v35, %s8914_s22  ;;  %8250 = vrot.lane.b32.xlu1 %v8249_v20, %s8913_s17  ;;  %v2477_v35 = vld [vmem:[#allocation3 + $0xe1] sm:$0xff] }
 0x25b   : > { %v8364_v62 = vpack.i.bf16 %v2477_v35, %v2476_v39 }
 0x25e   : > { %8265 = vrot.lane.b32.xlu0 %v8249_v20, %s8915_s29  ;;  %8255 = vrot.lane.b32.xlu1 %v8254_v58, %s8917_s9 }
 0x262   : > { %8270 = vrot.lane.b32.xlu0 %v8254_v58, %s8916_s8  ;;  %8275 = vrot.lane.b32.xlu1 %v8249_v20, %s8907_s19  ;;  %v8012_v20 = vunpack.i.l.bf16 %v10350_v51  ;;  %v8018_v51 = vunpack.i.h.bf16 %v10361_v8 }
 0x265   : > { %v7247_v22 = vpop.f32.mrb[24].mxu0 }
 0x266   : > { %v2200_v24 = vadd.f32 %v7247_v22, %v10207_v46  ;;  %v2191_v56 = vpop.f32.mrb[25].mxu0  ;;  %8280 = vrot.lane.b32.xlu0 %v8254_v58, %s8909_s23  ;;  %8285 = vrot.lane.b32.xlu1 %v8284_v0, %s8914_s22  ;;  %v2333_v22 = vld [vmem:[#allocation3 + $0x8] sm:$0xff] }
 0x267   : > { %v2192_v63 = vadd.f32 %v10207_v46, %v2191_v56  ;;  %v7248_v34 = vpop.f32.mrb[26].mxu0  ;;  %v8017_v56 = vunpack.i.l.bf16 %v10361_v8 }
 0x268   : > { %v2248_v2 = vmax.f32 %v2200_v24, 0.0  ;;  %v2203_v60 = vadd.f32 %v7248_v34, %v10207_v46  ;;  %v2194_v52 = vpop.f32.mrb[27].mxu0  ;;  %v3646_v34 = vsel %vm1734_vm3, %v2333_v22, %v8013_v7 }
 0x269   : > { %v2246_v12 = vmax.f32 %v2192_v63, 0.0  ;;  %v2195_v28 = vadd.f32 %v10207_v46, %v2194_v52  ;;  %v3678_v8 = vsel %vm1800_vm6, %v3646_v34, %v8018_v51  ;;  %v2576_v34 = vld [vmem:[#allocation3 + $0x111] sm:$0xff] }
 0x26a   : > { %2326 = vst.msk [vmem:[#allocation3 + $0x151] sm:$0xff] %vm1734_vm3, %v2248_v2  ;;  %v2249_v50 = vmax.f32 %v2203_v60, 0.0  ;;  %8295 = vrot.lane.b32.xlu0 %v8294_v27, %s8916_s8  ;;  %8290 = vrot.lane.b32.xlu1 %v8289_v14, %s8915_s29 }
 0x26b   : > { %2324 = vst.msk [vmem:[#allocation3 + $0x139] sm:$0xff] %vm1734_vm3, %v2246_v12  ;;  %v2247_v61 = vmax.f32 %v2195_v28, 0.0 }
 0x26c   : > { %2327 = vst.msk [vmem:[#allocation3 + $0x159] sm:$0xff] %vm1734_vm3, %v2249_v50 }
 0x26d   : > { %2325 = vst.msk [vmem:[#allocation3 + $0x141] sm:$0xff] %vm1734_vm3, %v2247_v61 }
 0x26e   : > { %8310 = vrot.lane.b32.xlu0 %v8284_v0, %s8911_s15  ;;  %8300 = vrot.lane.b32.xlu1 %v8289_v14, %s8907_s19  ;;  %v2332_v0 = vld [vmem:[#allocation3] sm:$0xff] }
 0x270   : > { %v10368_v59 = vpop.permute.xlu0 %8035  ;;  %v10370_v31 = vpop.permute.xlu1 %8020 }
 0x271   : > { %v8038_v4 = vunpack.i.h.bf16 %v10368_v59  ;;  %v8037_v17 = vunpack.i.l.bf16 %v10368_v59 }
 0x272   : > { %8315 = vrot.lane.b32.xlu0 %v8289_v14, %s8913_s17  ;;  %8305 = vrot.lane.b32.xlu1 %v8294_v27, %s8909_s23  ;;  %v2511_v14 = vld [vmem:[#allocation3 + $0xfa] sm:$0xff] }
 0x274   : > { %v10374_v44 = vpop.permute.xlu0 %8040  ;;  %v10376_v45 = vpop.permute.xlu1 %8025 }
 0x275   : > { %v8043_v35 = vunpack.i.h.bf16 %v10374_v44 }
 0x276   : > { %8320 = vrot.lane.b32.xlu0 %v8294_v27, %s8917_s9  ;;  %8325 = vrot.lane.b32.xlu1 %v10378_v55, %s8911_s15  ;;  %v2510_v27 = vld [vmem:[#allocation3 + $0xf2] sm:$0xff] }
 0x277   : > { %v10426_v16 = vpack.i.bf16 %v2511_v14, %v2510_v27 }
 0x278   : > { %v10383_v42 = vpop.permute.xlu0 %8045  ;;  %v10385_v29 = vpop.permute.xlu1 %8030 }
 0x279   : > { %v8048_v59 = vunpack.i.h.bf16 %v10383_v42 }
 0x27a   : > { %8345 = vrot.lane.b32.xlu0 %v10387_v23, %s8916_s8  ;;  %8330 = vrot.lane.b32.xlu1 %v10389_v38, %s8913_s17 }
 0x27c   : > { %v10395_v30 = vpop.permute.xlu0 %8055  ;;  %v10397_v53 = vpop.permute.xlu1 %8050 }
 0x27d   : > { %v7251_v9 = vpop.f32.mrb[28].mxu0 }
 0x27e   : > { %v2216_v5 = vadd.f32 %v7251_v9, %v10207_v46  ;;  %v2207_v49 = vpop.f32.mrb[29].mxu0  ;;  %8360 = vrot.lane.b32.xlu0 %v8359_v18, %s8911_s15  ;;  %8335 = vrot.lane.b32.xlu1 %v8359_v18, %s8914_s22 }
 0x27f   : > { %v2208_v54 = vadd.f32 %v10207_v46, %v2207_v49  ;;  %v7252_v26 = vpop.f32.mrb[30].mxu0 }
 0x280   : > { %v2252_v6 = vmax.f32 %v2216_v5, 0.0  ;;  %v2219_v19 = vadd.f32 %v7252_v26, %v10207_v46  ;;  %v2210_v58 = vpop.f32.mrb[31].mxu0  ;;  %v8071_v43 = vpop.permute.xlu0 %8070  ;;  %v8042_v5 = vunpack.i.l.bf16 %v10374_v44 }
 0x281   : > { %v2250_v11 = vmax.f32 %v2208_v54, 0.0  ;;  %v2211_v21 = vadd.f32 %v10207_v46, %v2210_v58  ;;  %v10407_v32 = vpop.permute.xlu1 %8060  ;;  %v3645_v46 = vsel %vm1734_vm3, %v2332_v0, %v8012_v20  ;;  %v8073_v2 = vunpack.i.h.bf16 %v8071_v43 }
 0x282   : > { %2330 = vst.msk [vmem:[#allocation3 + $0x181] sm:$0xff] %vm1734_vm3, %v2252_v6  ;;  %v2253_v24 = vmax.f32 %v2219_v19, 0.0  ;;  %8365 = vrot.lane.b32.xlu0 %v8364_v62, %s8913_s17  ;;  %8340 = vrot.lane.b32.xlu1 %v8364_v62, %s8915_s29  ;;  %v8072_v60 = vunpack.i.l.bf16 %v8071_v43  ;;  %v3677_v50 = vsel %vm1800_vm6, %v3645_v46, %v8017_v56  ;;  %v8047_v54 = vunpack.i.l.bf16 %v10383_v42  ;;  %v2544_v6 = vld [vmem:[#allocation3 + $0x110] sm:$0xff]  ;;  %v2543_v43 = vld [vmem:[#allocation3 + $0x108] sm:$0xff] }
 0x283   : > { %2328 = vst.msk [vmem:[#allocation3 + $0x169] sm:$0xff] %vm1734_vm3, %v2250_v11  ;;  %v2251_v63 = vmax.f32 %v2211_v21, 0.0  ;;  %v3710_v15 = vsel %vm1866_vm8, %v3678_v8, %v8073_v2  ;;  %v8062_v0 = vunpack.i.l.bf16 %v10407_v32  ;;  %v8389_v11 = vpack.i.bf16 %v2544_v6, %v2543_v43  ;;  %v2607_v56 = vld [vmem:[#allocation3 + $0x10a] sm:$0xff] }
 0x284   : > { %2331 = vst.msk [vmem:[#allocation3 + $0x189] sm:$0xff] %vm1734_vm3, %v2253_v24  ;;  %v8076_v40 = vpop.permute.xlu0 %8075  ;;  %v3709_v48 = vsel %vm1866_vm8, %v3677_v50, %v8072_v60  ;;  %v8022_v50 = vunpack.i.l.bf16 %v10370_v31 }
 0x285   : > { %2329 = vst.msk [vmem:[#allocation3 + $0x171] sm:$0xff] %vm1734_vm3, %v2251_v63  ;;  %v10419_v52 = vpop.permute.xlu1 %8065  ;;  %v8078_v12 = vunpack.i.h.bf16 %v8076_v40  ;;  %v8077_v28 = vunpack.i.l.bf16 %v8076_v40  ;;  %v2608_v63 = vld [vmem:[#allocation3 + $0x112] sm:$0xff]  ;;  %v3647_v46 = vsel %vm1734_vm3, %v10241_v1, %v8062_v0  ;;  %v8058_v0 = vunpack.i.h.bf16 %v10395_v30 }
 0x286   : > { %8370 = vrot.lane.b32.xlu0 %v10387_v23, %s8917_s9  ;;  %8350 = vrot.lane.b32.xlu1 %v8364_v62, %s8907_s19  ;;  %v8063_v62 = vunpack.i.h.bf16 %v10407_v32  ;;  %v8068_v21 = vunpack.i.h.bf16 %v10419_v52  ;;  %v8067_v24 = vunpack.i.l.bf16 %v10419_v52  ;;  %v2575_v32 = vld [vmem:[#allocation3 + $0x109] sm:$0xff]  ;;  %v8409_v60 = vpack.i.bf16 %v2608_v63, %v2607_v56 }
 0x287   : > { %v3741_v18 = vsel %vm1932_vm10, %v3709_v48, %v8077_v28  ;;  %v3742_v9 = vsel %vm1932_vm10, %v3710_v15, %v8078_v12  ;;  %v8394_v52 = vpack.i.bf16 %v2576_v34, %v2575_v32  ;;  %v8023_v28 = vunpack.i.h.bf16 %v10370_v31 }
 0x288   : > { %v8081_v61 = vpop.permute.xlu0 %8080  ;;  %v3648_v40 = vsel %vm1734_vm3, %v10237_v3, %v8063_v62  ;;  %v3679_v27 = vsel %vm1800_vm6, %v3647_v46, %v8067_v24  ;;  %v8027_v15 = vunpack.i.l.bf16 %v10376_v45  ;;  %v2450_v62 = vld [vmem:[#allocation3 + $0x120] sm:$0xff]  ;;  %v2483_v46 = vld [vmem:[#allocation3 + $0x129] sm:$0xff] }
 0x289   : > { %v8083_v10 = vunpack.i.h.bf16 %v8081_v61  ;;  %v8082_v57 = vunpack.i.l.bf16 %v8081_v61  ;;  %v10430_v36 = vpop.permute.xlu1 %8085  ;;  %v3680_v14 = vsel %vm1800_vm6, %v3648_v40, %v8068_v21  ;;  %v3711_v3 = vsel %vm1866_vm8, %v3679_v27, %v8022_v50  ;;  %v2514_v40 = vld [vmem:[#allocation3 + $0x122] sm:$0xff] }
 0x28a   : > { %8380 = vrot.lane.b32.xlu0 %v10378_v55, %s8914_s22  ;;  %8355 = vrot.lane.b32.xlu1 %v10387_v23, %s8909_s23  ;;  %v3712_v1 = vsel %vm1866_vm8, %v3680_v14, %v8023_v28  ;;  %v8028_v61 = vunpack.i.h.bf16 %v10376_v45 }
 0x28b   : > { %v3774_v49 = vsel %vm3773_vm15, %v3741_v18, %v8082_v57  ;;  %v3775_v7 = vsel %vm3773_vm15, %v3742_v9, %v8083_v10  ;;  %v3743_v57 = vsel %vm1932_vm10, %v3711_v3, %v8027_v15  ;;  %v8032_v18 = vunpack.i.l.bf16 %v10385_v29 }
 0x28c   : > { %v10446_v26 = vpop.permute.xlu0 %8100  ;;  %v3807_v39 = vsel %vm3806_vm0, %v3774_v49, %v8037_v17  ;;  %v3808_v55 = vsel %vm3806_vm0, %v3775_v7, %v8038_v4  ;;  %v3744_v4 = vsel %vm1932_vm10, %v3712_v1, %v8028_v61  ;;  %v8033_v17 = vunpack.i.h.bf16 %v10385_v29 }
 0x28d   : > { %v10450_v20 = vpop.permute.xlu1 %8090  ;;  %v3840_v23 = vsel %vm3839_vm1, %v3807_v39, %v8042_v5  ;;  %v3841_v44 = vsel %vm3839_vm1, %v3808_v55, %v8043_v35  ;;  %v3776_v49 = vsel %vm3773_vm15, %v3743_v57, %v8032_v18 }
 0x28e   : > { %8385 = vrot.lane.b32.xlu0 %v10389_v38, %s8915_s29  ;;  %8375 = vrot.lane.b32.xlu1 %v10426_v16, %s8917_s9  ;;  %v3873_v42 = vsel %vm3872_vm2, %v3840_v23, %v8047_v54  ;;  %v3874_v19 = vsel %vm3872_vm2, %v3841_v44, %v8048_v59  ;;  %v8053_v23 = vunpack.i.h.bf16 %v10397_v53  ;;  %v8052_v44 = vunpack.i.l.bf16 %v10397_v53 }
 0x28f   : > { %v3905_v58 = vpack.c.bf16 %v3874_v19, %v3873_v42 }
 0x290   : > { %v10462_v22 = vpop.permute.xlu0 %8105  ;;  %v3649_v24 = vsel %vm1734_vm3, %v10217_v41, %v8052_v44  ;;  %v3650_v56 = vsel %vm1734_vm3, %v10219_v37, %v8053_v23 }
 0x291   : > { %v10466_v51 = vpop.permute.xlu1 %8095  ;;  %7263 = vmatprep.mubr.msk.bf16.mxu1 %vm11573_vm4, %v3905_v58  ;;  %v2451_v58 = vld [vmem:[#allocation3 + $0x128] sm:$0xff]  ;;  %v3682_v41 = vsel %vm1800_vm6, %v3650_v56, %v8058_v0  ;;  %v8107_v18 = vunpack.i.l.bf16 %v10462_v22 }
 0x292   : > { %8400 = vrot.lane.b32.xlu0 %v10426_v16, %s8916_s8  ;;  %8390 = vrot.lane.b32.xlu1 %v8389_v11, %s8914_s22  ;;  %v8434_v21 = vpack.i.bf16 %v2451_v58, %v2450_v62  ;;  %v2611_v62 = vld [vmem:[#allocation3 + $0x13a] sm:$0xff]  ;;  %v2612_v0 = vld [vmem:[#allocation3 + $0x142] sm:$0xff] }
 0x293   : > { %v8489_v56 = vpack.i.bf16 %v2612_v0, %v2611_v62  ;;  %v2487_v0 = vld [vmem:[#allocation3 + $0x159] sm:$0xff] }
 0x294   : > { %v10476_v2 = vpop.permute.xlu0 %8110 }
 0x295   : > { %v10480_v12 = vpop.permute.xlu1 %8115 }
 0x296   : > { %8410 = vrot.lane.b32.xlu0 %v8409_v60, %s8916_s8  ;;  %8395 = vrot.lane.b32.xlu1 %v8394_v52, %s8915_s29 }
 0x298   : > { %v10488_v8 = vpop.permute.xlu0 %8120 }
 0x299   : > { %v8126_v48 = vpop.permute.xlu1 %8125 }
 0x29a   : > { %8420 = vrot.lane.b32.xlu0 %v10426_v16, %s8909_s23  ;;  %8405 = vrot.lane.b32.xlu1 %v10389_v38, %s8907_s19  ;;  %v8128_v31 = vunpack.i.h.bf16 %v8126_v48  ;;  %v8127_v10 = vunpack.i.l.bf16 %v8126_v48  ;;  %v3777_v16 = vsel %vm3773_vm15, %v3744_v4, %v8033_v17  ;;  %v8108_v17 = vunpack.i.h.bf16 %v10462_v22 }
 0x29c   : > { %v8136_v9 = vpop.permute.xlu0 %8135  ;;  %v3809_v59 = vsel %vm3806_vm0, %v3776_v49, %v8127_v10  ;;  %v3810_v54 = vsel %vm3806_vm0, %v3777_v16, %v8128_v31  ;;  %v8102_v10 = vunpack.i.l.bf16 %v10446_v26 }
 0x29d   : > { %v8138_v35 = vunpack.i.h.bf16 %v8136_v9  ;;  %v8137_v45 = vunpack.i.l.bf16 %v8136_v9  ;;  %v8131_v5 = vpop.permute.xlu1 %8130 }
 0x29e   : > { %v8133_v7 = vunpack.i.h.bf16 %v8131_v5  ;;  %v8132_v38 = vunpack.i.l.bf16 %v8131_v5  ;;  %8430 = vrot.lane.b32.xlu0 %v8389_v11, %s8911_s15  ;;  %8415 = vrot.lane.b32.xlu1 %v8394_v52, %s8907_s19  ;;  %v8057_v11 = vunpack.i.l.bf16 %v10395_v30  ;;  %v2482_v30 = vld [vmem:[#allocation3 + $0x121] sm:$0xff] }
 0x29f   : > { %v10529_v37 = vpack.i.bf16 %v2483_v46, %v2482_v30  ;;  %v8092_v30 = vunpack.i.l.bf16 %v10450_v20 }
 0x2a0   : > { %v3842_v29 = vsel %vm3839_vm1, %v3809_v59, %v8132_v38  ;;  %v3843_v39 = vsel %vm3839_vm1, %v3810_v54, %v8133_v7  ;;  %v8151_v55 = vpop.permute.xlu0 %8150  ;;  %v3681_v28 = vsel %vm1800_vm6, %v3649_v24, %v8057_v11  ;;  %v10556_v59 = vld [vmem:[#allocation3 + $0x140] sm:$0xff] }
 0x2a1   : > { %v10510_v6 = vpop.permute.xlu1 %8140  ;;  %v3875_v42 = vsel %vm3872_vm2, %v3842_v29, %v8137_v45  ;;  %v3876_v19 = vsel %vm3872_vm2, %v3843_v39, %v8138_v35  ;;  %v8153_v63 = vunpack.i.h.bf16 %v8151_v55  ;;  %v8152_v34 = vunpack.i.l.bf16 %v8151_v55  ;;  %v10563_v39 = vld [vmem:[#allocation3 + $0x138] sm:$0xff]  ;;  %v2580_v11 = vld [vmem:[#allocation3 + $0x141] sm:$0xff] }
 0x2a2   : > { %8440 = vrot.lane.b32.xlu0 %v8394_v52, %s8913_s17  ;;  %8425 = vrot.lane.b32.xlu1 %v8409_v60, %s8909_s23  ;;  %v3906_v43 = vpack.c.bf16 %v3876_v19, %v3875_v42  ;;  %v2515_v52 = vld [vmem:[#allocation3 + $0x12a] sm:$0xff]  ;;  %v8113_v45 = vunpack.i.h.bf16 %v10476_v2  ;;  %v8143_v55 = vunpack.i.h.bf16 %v10510_v6  ;;  %v8142_v23 = vunpack.i.l.bf16 %v10510_v6  ;;  %v2579_v6 = vld [vmem:[#allocation3 + $0x139] sm:$0xff] }
 0x2a3   : > { %v8454_v3 = vpack.i.bf16 %v2515_v52, %v2514_v40  ;;  %v3714_v1 = vsel %vm1866_vm8, %v3682_v41, %v8153_v63  ;;  %v3713_v61 = vsel %vm1866_vm8, %v3681_v28, %v8152_v34  ;;  %v8464_v42 = vpack.i.bf16 %v10556_v59, %v10563_v39 }
 0x2a4   : > { %7264 = vmatmul.mubr.msk.bf16.vlgmr.msra.gmra.mrb[0].mxu1 %vm11573_vm4, %v3906_v43  ;;  %v8156_v53 = vpop.permute.xlu0 %8155  ;;  %v8474_v63 = vpack.i.bf16 %v2580_v11, %v2579_v6  ;;  %v8088_v40 = vunpack.i.h.bf16 %v10430_v36  ;;  %v8087_v52 = vunpack.i.l.bf16 %v10430_v36  ;;  %v2518_v11 = vld [vmem:[#allocation3 + $0x152] sm:$0xff]  ;;  %v2519_v6 = vld [vmem:[#allocation3 + $0x15a] sm:$0xff] }
 0x2a5   : > { %v10523_v32 = vpop.permute.xlu1 %8145  ;;  %v8158_v27 = vunpack.i.h.bf16 %v8156_v53  ;;  %v8157_v14 = vunpack.i.l.bf16 %v8156_v53  ;;  %v3652_v53 = vsel %vm1734_vm3, %v10284_v47, %v8143_v55  ;;  %v8122_v55 = vunpack.i.l.bf16 %v10488_v8 }
 0x2a6   : > { %8450 = vrot.lane.b32.xlu0 %v8409_v60, %s8917_s9  ;;  %8435 = vrot.lane.b32.xlu1 %v8434_v21, %s8911_s15  ;;  %v8103_v60 = vunpack.i.h.bf16 %v10446_v26  ;;  %v8112_v26 = vunpack.i.l.bf16 %v10476_v2  ;;  %v8148_v19 = vunpack.i.h.bf16 %v10523_v32  ;;  %v8147_v58 = vunpack.i.l.bf16 %v10523_v32 }
 0x2a7   : > { %v3745_v57 = vsel %vm1932_vm10, %v3713_v61, %v8157_v14  ;;  %v3746_v4 = vsel %vm1932_vm10, %v3714_v1, %v8158_v27  ;;  %v8093_v14 = vunpack.i.h.bf16 %v10450_v20  ;;  %v8098_v61 = vunpack.i.h.bf16 %v10466_v51 }
 0x2a8   : > { %v8161_v50 = vpop.permute.xlu0 %8160  ;;  %v3684_v32 = vsel %vm1800_vm6, %v3652_v53, %v8148_v19 }
 0x2a9   : > { %v8163_v15 = vunpack.i.h.bf16 %v8161_v50  ;;  %v8162_v48 = vunpack.i.l.bf16 %v8161_v50  ;;  %v10533_v31 = vpop.permute.xlu1 %8165 }
 0x2aa   : > { %8460 = vrot.lane.b32.xlu0 %v8434_v21, %s8914_s22  ;;  %8445 = vrot.lane.b32.xlu1 %v10529_v37, %s8913_s17  ;;  %v3651_v21 = vsel %vm1734_vm3, %v10290_v13, %v8142_v23  ;;  %v3716_v13 = vsel %vm1866_vm8, %v3684_v32, %v8088_v40 }
 0x2ab   : > { %v3778_v9 = vsel %vm3773_vm15, %v3745_v57, %v8162_v48  ;;  %v3779_v35 = vsel %vm3773_vm15, %v3746_v4, %v8163_v15  ;;  %v3683_v34 = vsel %vm1800_vm6, %v3651_v21, %v8147_v58  ;;  %v3748_v1 = vsel %vm1932_vm10, %v3716_v13, %v8093_v14 }
 0x2ac   : > { %v3811_v5 = vsel %vm3806_vm0, %v3778_v9, %v8102_v10  ;;  %v3812_v49 = vsel %vm3806_vm0, %v3779_v35, %v8103_v60  ;;  %v10550_v16 = vpop.permute.xlu0 %8180  ;;  %v3715_v47 = vsel %vm1866_vm8, %v3683_v34, %v8087_v52  ;;  %v8097_v15 = vunpack.i.l.bf16 %v10466_v51 }
 0x2ad   : > { %v10552_v7 = vpop.permute.xlu1 %8170  ;;  %v3844_v38 = vsel %vm3839_vm1, %v3811_v5, %v8107_v18  ;;  %v3845_v22 = vsel %vm3839_vm1, %v3812_v49, %v8108_v17  ;;  %v3747_v50 = vsel %vm1932_vm10, %v3715_v47, %v8092_v30  ;;  %v10617_v49 = vld [vmem:[#allocation3 + $0x158] sm:$0xff]  ;;  %v10642_v47 = vpack.i.bf16 %v2519_v6, %v2518_v11 }
 0x2ae   : > { %8470 = vrot.lane.b32.xlu0 %v10529_v37, %s8915_s29  ;;  %8455 = vrot.lane.b32.xlu1 %v8454_v3, %s8917_s9  ;;  %v3877_v2 = vsel %vm3872_vm2, %v3844_v38, %v8112_v26  ;;  %v3878_v54 = vsel %vm3872_vm2, %v3845_v22, %v8113_v45  ;;  %v3780_v57 = vsel %vm3773_vm15, %v3747_v50, %v8097_v15  ;;  %v8118_v22 = vunpack.i.h.bf16 %v10480_v12 }
 0x2af   : > { %v3907_v29 = vpack.c.bf16 %v3878_v54, %v3877_v2  ;;  %v8117_v2 = vunpack.i.l.bf16 %v10480_v12  ;;  %v10623_v54 = vld [vmem:[#allocation3 + $0x150] sm:$0xff] }
 0x2b0   : > { %v10567_v44 = vpop.permute.xlu0 %8185 }
 0x2b1   : > { %v10573_v43 = vpop.permute.xlu1 %8175  ;;  %7267 = vmatprep.mubr.msk.bf16.mxu1 %vm11573_vm4, %v3907_v29  ;;  %v8123_v29 = vunpack.i.h.bf16 %v10488_v8  ;;  %v3654_v8 = vsel %vm1734_vm3, %v10250_v33, %v8118_v22  ;;  %v3653_v21 = vsel %vm1734_vm3, %v10257_v25, %v8117_v2  ;;  %v8183_v25 = vunpack.i.h.bf16 %v10550_v16  ;;  %v2615_v2 = vld [vmem:[#allocation3 + $0x16a] sm:$0xff] }
 0x2b2   : > { %8480 = vrot.lane.b32.xlu0 %v8454_v3, %s8916_s8  ;;  %8465 = vrot.lane.b32.xlu1 %v8464_v42, %s8914_s22  ;;  %v3685_v34 = vsel %vm1800_vm6, %v3653_v21, %v8122_v55  ;;  %v8188_v50 = vunpack.i.h.bf16 %v10567_v44  ;;  %v2584_v55 = vld [vmem:[#allocation3 + $0x171] sm:$0xff]  ;;  %v8167_v21 = vunpack.i.l.bf16 %v10533_v31 }
 0x2b3   : > { %v3686_v32 = vsel %vm1800_vm6, %v3654_v8, %v8123_v29  ;;  %v2616_v29 = vld [vmem:[#allocation3 + $0x172] sm:$0xff]  ;;  %v8168_v8 = vunpack.i.h.bf16 %v10533_v31 }
 0x2b4   : > { %v10582_v24 = vpop.permute.xlu0 %8190 }
 0x2b5   : > { %v10586_v46 = vpop.permute.xlu1 %8195 }
 0x2b6   : > { %8490 = vrot.lane.b32.xlu0 %v8489_v56, %s8916_s8  ;;  %8475 = vrot.lane.b32.xlu1 %v8474_v63, %s8915_s29 }
 0x2b8   : > { %v10594_v27 = vpop.permute.xlu0 %8200 }
 0x2b9   : > { %v8206_v28 = vpop.permute.xlu1 %8205 }
 0x2ba   : > { %8500 = vrot.lane.b32.xlu0 %v8454_v3, %s8909_s23  ;;  %8485 = vrot.lane.b32.xlu1 %v10529_v37, %s8907_s19  ;;  %v8208_v36 = vunpack.i.h.bf16 %v8206_v28  ;;  %v8207_v41 = vunpack.i.l.bf16 %v8206_v28  ;;  %v3781_v3 = vsel %vm3773_vm15, %v3748_v1, %v8098_v61  ;;  %v8182_v28 = vunpack.i.l.bf16 %v10550_v16 }
 0x2bb   : > { %v8187_v1 = vunpack.i.l.bf16 %v10567_v44  ;;  %v8192_v16 = vunpack.i.l.bf16 %v10582_v24 }
 0x2bc   : > { %v8216_v48 = vpop.permute.xlu0 %8215  ;;  %v3813_v17 = vsel %vm3806_vm0, %v3780_v57, %v8207_v41  ;;  %v3814_v18 = vsel %vm3806_vm0, %v3781_v3, %v8208_v36 }
 0x2bd   : > { %v8218_v60 = vunpack.i.h.bf16 %v8216_v48  ;;  %v8217_v10 = vunpack.i.l.bf16 %v8216_v48  ;;  %v8211_v20 = vpop.permute.xlu1 %8210  ;;  %v8193_v48 = vunpack.i.h.bf16 %v10582_v24 }
 0x2be   : > { %v8213_v4 = vunpack.i.h.bf16 %v8211_v20  ;;  %v8212_v37 = vunpack.i.l.bf16 %v8211_v20  ;;  %8510 = vrot.lane.b32.xlu0 %v8464_v42, %s8911_s15  ;;  %8495 = vrot.lane.b32.xlu1 %v8474_v63, %s8907_s19  ;;  %v8514_v42 = vpack.i.bf16 %v10617_v49, %v10623_v54 }
 0x2c0   : > { %v3846_v51 = vsel %vm3839_vm1, %v3813_v17, %v8212_v37  ;;  %v3847_v9 = vsel %vm3839_vm1, %v3814_v18, %v8213_v4  ;;  %v8231_v35 = vpop.permute.xlu0 %8230  ;;  %v10669_v4 = vld [vmem:[#allocation3 + $0x170] sm:$0xff]  ;;  %v10677_v18 = vld [vmem:[#allocation3 + $0x168] sm:$0xff] }
 0x2c1   : > { %v10613_v45 = vpop.permute.xlu1 %8220  ;;  %v3879_v26 = vsel %vm3872_vm2, %v3846_v51, %v8217_v10  ;;  %v3880_v5 = vsel %vm3872_vm2, %v3847_v9, %v8218_v60  ;;  %v8233_v19 = vunpack.i.h.bf16 %v8231_v35  ;;  %v8232_v58 = vunpack.i.l.bf16 %v8231_v35 }
 0x2c2   : > { %8520 = vrot.lane.b32.xlu0 %v8474_v63, %s8913_s17  ;;  %8505 = vrot.lane.b32.xlu1 %v8489_v56, %s8909_s23  ;;  %v3908_v38 = vpack.c.bf16 %v3880_v5, %v3879_v26  ;;  %v2486_v63 = vld [vmem:[#allocation3 + $0x151] sm:$0xff]  ;;  %v8223_v51 = vunpack.i.h.bf16 %v10613_v45  ;;  %v8222_v9 = vunpack.i.l.bf16 %v10613_v45  ;;  %v8544_v26 = vpack.i.bf16 %v10669_v4, %v10677_v18 }
 0x2c3   : > { %v10640_v52 = vpack.i.bf16 %v2487_v0, %v2486_v63  ;;  %v3718_v13 = vsel %vm1866_vm8, %v3686_v32, %v8233_v19  ;;  %v2342_v45 = vld [vmem:[#allocation3 + $0x78] sm:$0xff]  ;;  %v10697_v0 = vpack.i.bf16 %v2616_v29, %v2615_v2  ;;  %v2522_v2 = vld [vmem:[#allocation3 + $0x182] sm:$0xff]  ;;  %v2523_v29 = vld [vmem:[#allocation3 + $0x18a] sm:$0xff] }
 0x2c4   : > { %7268 = vmatmul.mubr.msk.bf16.gmra.mrb[4].mxu1 %vm11573_vm4, %v3908_v38  ;;  %v8236_v23 = vpop.permute.xlu0 %8235 }
 0x2c5   : > { %v10630_v62 = vpop.permute.xlu1 %8225  ;;  %v8238_v12 = vunpack.i.h.bf16 %v8236_v23  ;;  %v8237_v53 = vunpack.i.l.bf16 %v8236_v23  ;;  %v2343_v23 = vld [vmem:[#allocation3 + $0x80] sm:$0xff] }
 0x2c6   : > { %8530 = vrot.lane.b32.xlu0 %v8489_v56, %s8917_s9  ;;  %8515 = vrot.lane.b32.xlu1 %v8514_v42, %s8911_s15  ;;  %v3717_v56 = vsel %vm1866_vm8, %v3685_v34, %v8232_v58  ;;  %v8228_v5 = vunpack.i.h.bf16 %v10630_v62  ;;  %v8227_v38 = vunpack.i.l.bf16 %v10630_v62  ;;  %v3656_v19 = vsel %vm1734_vm3, %v2343_v23, %v8223_v51  ;;  %v10736_v51 = vld [vmem:[#allocation3 + $0x1a0] sm:$0xff] }
 0x2c7   : > { %v3749_v36 = vsel %vm1932_vm10, %v3717_v56, %v8237_v53  ;;  %v3750_v41 = vsel %vm1932_vm10, %v3718_v13, %v8238_v12  ;;  %v3655_v58 = vsel %vm1734_vm3, %v2342_v45, %v8222_v9  ;;  %v8172_v56 = vunpack.i.l.bf16 %v10552_v7  ;;  %v2458_v23 = vld [vmem:[#allocation3 + $0x180] sm:$0xff] }
 0x2c8   : > { %v8241_v40 = vpop.permute.xlu0 %8240  ;;  %v3687_v6 = vsel %vm1800_vm6, %v3655_v58, %v8227_v38  ;;  %v3688_v12 = vsel %vm1800_vm6, %v3656_v19, %v8228_v5  ;;  %v8198_v9 = vunpack.i.h.bf16 %v10586_v46  ;;  %v2491_v38 = vld [vmem:[#allocation3 + $0x189] sm:$0xff]  ;;  %v8202_v45 = vunpack.i.l.bf16 %v10594_v27 }
 0x2c9   : > { %v8243_v14 = vunpack.i.h.bf16 %v8241_v40  ;;  %v8242_v30 = vunpack.i.l.bf16 %v8241_v40  ;;  %v10646_v33 = vpop.permute.xlu1 %8245  ;;  %v3719_v63 = vsel %vm1866_vm8, %v3687_v6, %v8167_v21  ;;  %v3720_v34 = vsel %vm1866_vm8, %v3688_v12, %v8168_v8  ;;  %v2490_v6 = vld [vmem:[#allocation3 + $0x181] sm:$0xff]  ;;  %v2345_v12 = vld [vmem:[#allocation3 + $0x98] sm:$0xff] }
 0x2ca   : > { %8540 = vrot.lane.b32.xlu0 %v8514_v42, %s8914_s22  ;;  %8525 = vrot.lane.b32.xlu1 %v10640_v52, %s8913_s17  ;;  %v2583_v42 = vld [vmem:[#allocation3 + $0x169] sm:$0xff]  ;;  %v8173_v40 = vunpack.i.h.bf16 %v10552_v7  ;;  %v8604_v21 = vpack.i.bf16 %v2491_v38, %v2490_v6 }
 0x2cb   : > { %v3782_v61 = vsel %vm3773_vm15, %v3749_v36, %v8242_v30  ;;  %v3783_v15 = vsel %vm3773_vm15, %v3750_v41, %v8243_v14  ;;  %v8554_v11 = vpack.i.bf16 %v2584_v55, %v2583_v42  ;;  %v3751_v30 = vsel %vm1932_vm10, %v3719_v63, %v8172_v56 }
 0x2cc   : > { %v3815_v60 = vsel %vm3806_vm0, %v3782_v61, %v8182_v28  ;;  %v3816_v10 = vsel %vm3806_vm0, %v3783_v15, %v8183_v25  ;;  %v10663_v20 = vpop.permute.xlu0 %8260  ;;  %v3752_v25 = vsel %vm1932_vm10, %v3720_v34, %v8173_v40  ;;  %v8178_v28 = vunpack.i.h.bf16 %v10573_v43 }
 0x2cd   : > { %v10665_v57 = vpop.permute.xlu1 %8250  ;;  %v3848_v3 = vsel %vm3839_vm1, %v3815_v60, %v8187_v1  ;;  %v3849_v44 = vsel %vm3839_vm1, %v3816_v10, %v8188_v50  ;;  %v8177_v36 = vunpack.i.l.bf16 %v10573_v43  ;;  %v8203_v55 = vunpack.i.h.bf16 %v10594_v27 }
 0x2ce   : > { %8550 = vrot.lane.b32.xlu0 %v10640_v52, %s8915_s29  ;;  %8535 = vrot.lane.b32.xlu1 %v10642_v47, %s8917_s9  ;;  %v3881_v24 = vsel %vm3872_vm2, %v3848_v3, %v8192_v16  ;;  %v3882_v37 = vsel %vm3872_vm2, %v3849_v44, %v8193_v48  ;;  %v8614_v63 = vpack.i.bf16 %v2523_v29, %v2522_v2  ;;  %v8248_v29 = vunpack.i.h.bf16 %v10646_v33 }
 0x2cf   : > { %v3909_v17 = vpack.c.bf16 %v3882_v37, %v3881_v24  ;;  %v3784_v61 = vsel %vm3773_vm15, %v3751_v30, %v8177_v36  ;;  %v2459_v37 = vld [vmem:[#allocation3 + $0x188] sm:$0xff]  ;;  %v3658_v40 = vsel %vm1734_vm3, %v2345_v12, %v8198_v9  ;;  %v8263_v30 = vunpack.i.h.bf16 %v10663_v20 }
 0x2d0   : > { %v10681_v35 = vpop.permute.xlu0 %8265  ;;  %v8253_v12 = vunpack.i.h.bf16 %v10665_v57 }
 0x2d1   : > { %v10687_v22 = vpop.permute.xlu1 %8255  ;;  %7271 = vmatprep.mubr.msk.bf16.mxu1 %vm11573_vm4, %v3909_v17  ;;  %v10734_v17 = vld [vmem:[#allocation3 + $0x198] sm:$0xff] }
 0x2d2   : > { %8560 = vrot.lane.b32.xlu0 %v10642_v47, %s8916_s8  ;;  %8545 = vrot.lane.b32.xlu1 %v8544_v26, %s8914_s22  ;;  %v8624_v34 = vpack.i.bf16 %v10736_v51, %v10734_v17 }
 0x2d4   : > { %v10695_v62 = vpop.permute.xlu0 %8270 }
 0x2d5   : > { %v10701_v53 = vpop.permute.xlu1 %8275 }
 0x2d6   : > { %8570 = vrot.lane.b32.xlu0 %v10697_v0, %s8916_s8  ;;  %8555 = vrot.lane.b32.xlu1 %v8554_v11, %s8915_s29 }
 0x2d8   : > { %v10710_v32 = vpop.permute.xlu0 %8280 }
 0x2d9   : > { %v8286_v13 = vpop.permute.xlu1 %8285 }
 0x2da   : > { %8580 = vrot.lane.b32.xlu0 %v10642_v47, %s8909_s23  ;;  %8565 = vrot.lane.b32.xlu1 %v10640_v52, %s8907_s19  ;;  %v8288_v31 = vunpack.i.h.bf16 %v8286_v13  ;;  %v8287_v14 = vunpack.i.l.bf16 %v8286_v13  ;;  %v3785_v47 = vsel %vm3773_vm15, %v3752_v25, %v8178_v28  ;;  %v8262_v25 = vunpack.i.l.bf16 %v10663_v20 }
 0x2dc   : > { %v8296_v41 = vpop.permute.xlu0 %8295  ;;  %v3817_v48 = vsel %vm3806_vm0, %v3784_v61, %v8287_v14  ;;  %v3818_v16 = vsel %vm3806_vm0, %v3785_v47, %v8288_v31  ;;  %v3690_v14 = vsel %vm1800_vm6, %v3658_v40, %v8203_v55  ;;  %v8247_v55 = vunpack.i.l.bf16 %v10646_v33  ;;  %v2619_v40 = vld [vmem:[#allocation3 + $0x19a] sm:$0xff] }
 0x2dd   : > { %v8298_v50 = vunpack.i.h.bf16 %v8296_v41  ;;  %v8297_v7 = vunpack.i.l.bf16 %v8296_v41  ;;  %v8291_v1 = vpop.permute.xlu1 %8290  ;;  %v8252_v33 = vunpack.i.l.bf16 %v10665_v57  ;;  %v8257_v57 = vunpack.i.l.bf16 %v10687_v22 }
 0x2de   : > { %v8293_v15 = vunpack.i.h.bf16 %v8291_v1  ;;  %v8292_v52 = vunpack.i.l.bf16 %v8291_v1  ;;  %8590 = vrot.lane.b32.xlu0 %v8544_v26, %s8911_s15  ;;  %8575 = vrot.lane.b32.xlu1 %v8554_v11, %s8907_s19  ;;  %v8197_v26 = vunpack.i.l.bf16 %v10586_v46  ;;  %v8594_v46 = vpack.i.bf16 %v2459_v37, %v2458_v23 }
 0x2e0   : > { %v3850_v43 = vsel %vm3839_vm1, %v3817_v48, %v8292_v52  ;;  %v3851_v60 = vsel %vm3839_vm1, %v3818_v16, %v8293_v15  ;;  %v8311_v10 = vpop.permute.xlu0 %8310  ;;  %v8268_v52 = vunpack.i.h.bf16 %v10681_v35  ;;  %v8267_v48 = vunpack.i.l.bf16 %v10681_v35 }
 0x2e1   : > { %v10730_v3 = vpop.permute.xlu1 %8300  ;;  %v3883_v44 = vsel %vm3872_vm2, %v3850_v43, %v8297_v7  ;;  %v3884_v24 = vsel %vm3872_vm2, %v3851_v60, %v8298_v50  ;;  %v8313_v42 = vunpack.i.h.bf16 %v8311_v10  ;;  %v8312_v19 = vunpack.i.l.bf16 %v8311_v10  ;;  %v2346_v10 = vld [vmem:[#allocation3 + $0xa8] sm:$0xff] }
 0x2e2   : > { %8600 = vrot.lane.b32.xlu0 %v8554_v11, %s8913_s17  ;;  %8585 = vrot.lane.b32.xlu1 %v10697_v0, %s8909_s23  ;;  %v3910_v5 = vpack.c.bf16 %v3884_v24, %v3883_v44  ;;  %v2344_v11 = vld [vmem:[#allocation3 + $0x90] sm:$0xff]  ;;  %v8303_v41 = vunpack.i.h.bf16 %v10730_v3  ;;  %v8302_v50 = vunpack.i.l.bf16 %v10730_v3  ;;  %v8273_v43 = vunpack.i.h.bf16 %v10695_v62 }
 0x2e3   : > { %v3657_v27 = vsel %vm1734_vm3, %v2344_v11, %v8197_v26  ;;  %v3722_v36 = vsel %vm1866_vm8, %v3690_v14, %v8313_v42  ;;  %v8272_v60 = vunpack.i.l.bf16 %v10695_v62  ;;  %v2347_v3 = vld [vmem:[#allocation3 + $0xb0] sm:$0xff] }
 0x2e4   : > { %7272 = vmatmul.mubr.msk.bf16.gmra.mrb[8].mxu1 %vm11573_vm4, %v3910_v5  ;;  %v8316_v58 = vpop.permute.xlu0 %8315  ;;  %v3689_v31 = vsel %vm1800_vm6, %v3657_v27, %v8202_v45  ;;  %v3660_v35 = vsel %vm1734_vm3, %v2347_v3, %v8303_v41  ;;  %v3659_v37 = vsel %vm1734_vm3, %v2346_v10, %v8302_v50  ;;  %v2620_v27 = vld [vmem:[#allocation3 + $0x1a2] sm:$0xff] }
 0x2e5   : > { %v8306_v8 = vpop.permute.xlu1 %8305  ;;  %v8318_v56 = vunpack.i.h.bf16 %v8316_v58  ;;  %v8317_v13 = vunpack.i.l.bf16 %v8316_v58  ;;  %v3721_v28 = vsel %vm1866_vm8, %v3689_v31, %v8312_v19  ;;  %v2587_v19 = vld [vmem:[#allocation3 + $0x199] sm:$0xff]  ;;  %v2588_v58 = vld [vmem:[#allocation3 + $0x1a1] sm:$0xff] }
 0x2e6   : > { %8610 = vrot.lane.b32.xlu0 %v10697_v0, %s8917_s9  ;;  %8595 = vrot.lane.b32.xlu1 %v8594_v46, %s8911_s15  ;;  %v8308_v0 = vunpack.i.h.bf16 %v8306_v8  ;;  %v8307_v1 = vunpack.i.l.bf16 %v8306_v8 }
 0x2e7   : > { %v3753_v20 = vsel %vm1932_vm10, %v3721_v28, %v8317_v13  ;;  %v3754_v16 = vsel %vm1932_vm10, %v3722_v36, %v8318_v56  ;;  %v8644_v36 = vpack.i.bf16 %v2620_v27, %v2619_v40 }
 0x2e8   : > { %v8321_v7 = vpop.permute.xlu0 %8320  ;;  %v3691_v26 = vsel %vm1800_vm6, %v3659_v37, %v8307_v1  ;;  %v3692_v5 = vsel %vm1800_vm6, %v3660_v35, %v8308_v0  ;;  %v2349_v35 = vld [vmem:[#allocation3 + $0xc8] sm:$0xff] }
 0x2e9   : > { %v8323_v61 = vunpack.i.h.bf16 %v8321_v7  ;;  %v8322_v47 = vunpack.i.l.bf16 %v8321_v7  ;;  %v10761_v15 = vpop.permute.xlu1 %8325  ;;  %v3724_v6 = vsel %vm1866_vm8, %v3692_v5, %v8248_v29 }
 0x2ea   : > { %8620 = vrot.lane.b32.xlu0 %v8594_v46, %s8914_s22  ;;  %8605 = vrot.lane.b32.xlu1 %v8604_v21, %s8913_s17  ;;  %v3723_v46 = vsel %vm1866_vm8, %v3691_v26, %v8247_v55  ;;  %v3756_v14 = vsel %vm1932_vm10, %v3724_v6, %v8253_v12  ;;  %v8328_v27 = vunpack.i.h.bf16 %v10761_v15 }
 0x2eb   : > { %v3786_v44 = vsel %vm3773_vm15, %v3753_v20, %v8322_v47  ;;  %v3787_v24 = vsel %vm3773_vm15, %v3754_v16, %v8323_v61  ;;  %v3755_v31 = vsel %vm1932_vm10, %v3723_v46, %v8252_v33  ;;  %v8278_v47 = vunpack.i.h.bf16 %v10701_v53 }
 0x2ec   : > { %v3819_v17 = vsel %vm3806_vm0, %v3786_v44, %v8262_v25  ;;  %v3820_v51 = vsel %vm3806_vm0, %v3787_v24, %v8263_v30  ;;  %v8346_v9 = vpop.permute.xlu0 %8345  ;;  %v8258_v30 = vunpack.i.h.bf16 %v10687_v22  ;;  %v8277_v22 = vunpack.i.l.bf16 %v10701_v53  ;;  %v2348_v24 = vld [vmem:[#allocation3 + $0xc0] sm:$0xff] }
 0x2ed   : > { %v10779_v62 = vpop.permute.xlu1 %8330  ;;  %v3852_v38 = vsel %vm3839_vm1, %v3819_v17, %v8267_v48  ;;  %v3853_v2 = vsel %vm3839_vm1, %v3820_v51, %v8268_v52  ;;  %v8348_v7 = vunpack.i.h.bf16 %v8346_v9  ;;  %v8347_v0 = vunpack.i.l.bf16 %v8346_v9 }
 0x2ee   : > { %8630 = vrot.lane.b32.xlu0 %v8604_v21, %s8915_s29  ;;  %8615 = vrot.lane.b32.xlu1 %v8614_v63, %s8917_s9  ;;  %v3885_v45 = vsel %vm3872_vm2, %v3852_v38, %v8272_v60  ;;  %v3886_v23 = vsel %vm3872_vm2, %v3853_v2, %v8273_v43  ;;  %v8634_v21 = vpack.i.bf16 %v2588_v58, %v2587_v19  ;;  %v8283_v16 = vunpack.i.h.bf16 %v10710_v32 }
 0x2ef   : > { %v3911_v42 = vpack.c.bf16 %v3886_v23, %v3885_v45  ;;  %v8282_v43 = vunpack.i.l.bf16 %v10710_v32  ;;  %v3662_v17 = vsel %vm1734_vm3, %v2349_v35, %v8278_v47  ;;  %v3661_v51 = vsel %vm1734_vm3, %v2348_v24, %v8277_v22  ;;  %v2350_v45 = vld [vmem:[#allocation3 + $0xd8] sm:$0xff]  ;;  %v2351_v23 = vld [vmem:[#allocation3 + $0xe0] sm:$0xff] }
 0x2f0   : > { %v10791_v11 = vpop.permute.xlu0 %8360  ;;  %v3694_v26 = vsel %vm1800_vm6, %v3662_v17, %v8283_v16 }
 0x2f1   : > { %v8336_v8 = vpop.permute.xlu1 %8335  ;;  %7275 = vmatprep.mubr.msk.bf16.mxu1 %vm11573_vm4, %v3911_v42  ;;  %v3693_v32 = vsel %vm1800_vm6, %v3661_v51, %v8282_v43  ;;  %v8363_v5 = vunpack.i.h.bf16 %v10791_v11  ;;  %v8362_v38 = vunpack.i.l.bf16 %v10791_v11 }
 0x2f2   : > { %8640 = vrot.lane.b32.xlu0 %v8614_v63, %s8916_s8  ;;  %8625 = vrot.lane.b32.xlu1 %v8624_v34, %s8914_s22  ;;  %v8338_v56 = vunpack.i.h.bf16 %v8336_v8  ;;  %v8337_v13 = vunpack.i.l.bf16 %v8336_v8  ;;  %v3788_v63 = vsel %vm3773_vm15, %v3755_v31, %v8257_v57  ;;  %v3789_v34 = vsel %vm3773_vm15, %v3756_v14, %v8258_v30 }
 0x2f3   : > { %v3726_v31 = vsel %vm1866_vm8, %v3694_v26, %v8363_v5 }
 0x2f4   : > { %v8366_v25 = vpop.permute.xlu0 %8365  ;;  %v3821_v1 = vsel %vm3806_vm0, %v3788_v63, %v8337_v13  ;;  %v3822_v61 = vsel %vm3806_vm0, %v3789_v34, %v8338_v56  ;;  %v8327_v56 = vunpack.i.l.bf16 %v10761_v15  ;;  %v3725_v13 = vsel %vm1866_vm8, %v3693_v32, %v8362_v38 }
 0x2f5   : > { %v8341_v28 = vpop.permute.xlu1 %8340  ;;  %v8368_v29 = vunpack.i.h.bf16 %v8366_v25  ;;  %v8367_v55 = vunpack.i.l.bf16 %v8366_v25  ;;  %v8333_v15 = vunpack.i.h.bf16 %v10779_v62 }
 0x2f6   : > { %v8343_v41 = vunpack.i.h.bf16 %v8341_v28  ;;  %v8342_v50 = vunpack.i.l.bf16 %v8341_v28  ;;  %8635 = vrot.lane.b32.xlu1 %v8634_v21, %s8915_s29 }
 0x2f7   : > { %v3757_v30 = vsel %vm1932_vm10, %v3725_v13, %v8367_v55  ;;  %v3758_v57 = vsel %vm1932_vm10, %v3726_v31, %v8368_v29  ;;  %v2353_v13 = vld [vmem:[#allocation3 + $0xf8] sm:$0xff] }
 0x2f8   : > { %v3854_v52 = vsel %vm3839_vm1, %v3821_v1, %v8342_v50  ;;  %v3855_v48 = vsel %vm3839_vm1, %v3822_v61, %v8343_v41  ;;  %v8371_v20 = vpop.permute.xlu0 %8370  ;;  %v8332_v50 = vunpack.i.l.bf16 %v10779_v62 }
 0x2f9   : > { %v8351_v60 = vpop.permute.xlu1 %8350  ;;  %v3887_v10 = vsel %vm3872_vm2, %v3854_v52, %v8347_v0  ;;  %v3888_v3 = vsel %vm3872_vm2, %v3855_v48, %v8348_v7  ;;  %v8373_v58 = vunpack.i.h.bf16 %v8371_v20  ;;  %v8372_v46 = vunpack.i.l.bf16 %v8371_v20 }
 0x2fa   : > { %8645 = vrot.lane.b32.xlu1 %v8644_v36, %s8916_s8  ;;  %v3912_v44 = vpack.c.bf16 %v3888_v3, %v3887_v10  ;;  %v8353_v53 = vunpack.i.h.bf16 %v8351_v60  ;;  %v8352_v37 = vunpack.i.l.bf16 %v8351_v60 }
 0x2fb   : > { %v3790_v36 = vsel %vm3773_vm15, %v3757_v30, %v8372_v46  ;;  %v3791_v63 = vsel %vm3773_vm15, %v3758_v57, %v8373_v58 }
 0x2fc   : > { %7276 = vmatmul.mubr.msk.bf16.gmra.mrb[12].mxu1 %vm11573_vm4, %v3912_v44  ;;  %v8381_v9 = vpop.permute.xlu0 %8380  ;;  %v3664_v6 = vsel %vm1734_vm3, %v2351_v23, %v8353_v53  ;;  %v3663_v12 = vsel %vm1734_vm3, %v2350_v45, %v8352_v37 }
 0x2fd   : > { %v8356_v2 = vpop.permute.xlu1 %8355  ;;  %v8383_v33 = vunpack.i.h.bf16 %v8381_v9  ;;  %v8382_v8 = vunpack.i.l.bf16 %v8381_v9 }
 0x2fe   : > { %v8358_v42 = vunpack.i.h.bf16 %v8356_v2  ;;  %v8357_v19 = vunpack.i.l.bf16 %v8356_v2 }
 0x2ff   : > { %v3823_v7 = vsel %vm3806_vm0, %v3790_v36, %v8382_v8  ;;  %v3824_v0 = vsel %vm3806_vm0, %v3791_v63, %v8383_v33 }
 0x300   : > { %v3695_v21 = vsel %vm1800_vm6, %v3663_v12, %v8357_v19  ;;  %v3696_v40 = vsel %vm1800_vm6, %v3664_v6, %v8358_v42  ;;  %v8386_v11 = vpop.permute.xlu0 %8385 }
 0x301   : > { %v8376_v14 = vpop.permute.xlu1 %8375  ;;  %v8388_v25 = vunpack.i.h.bf16 %v8386_v11  ;;  %v8387_v28 = vunpack.i.l.bf16 %v8386_v11  ;;  %v3727_v34 = vsel %vm1866_vm8, %v3695_v21, %v8327_v56  ;;  %v3728_v41 = vsel %vm1866_vm8, %v3696_v40, %v8328_v27  ;;  %v2352_v56 = vld [vmem:[#allocation3 + $0xf0] sm:$0xff] }
 0x302   : > { %v8378_v61 = vunpack.i.h.bf16 %v8376_v14  ;;  %v8377_v47 = vunpack.i.l.bf16 %v8376_v14  ;;  %v3759_v43 = vsel %vm1932_vm10, %v3727_v34, %v8332_v50  ;;  %v3760_v60 = vsel %vm1932_vm10, %v3728_v41, %v8333_v15 }
 0x303   : > { %v3856_v20 = vsel %vm3839_vm1, %v3823_v7, %v8387_v28  ;;  %v3857_v16 = vsel %vm3839_vm1, %v3824_v0, %v8388_v25 }
 0x304   : > { %v8401_v1 = vpop.permute.xlu0 %8400  ;;  %v3792_v51 = vsel %vm3773_vm15, %v3759_v43, %v8377_v47  ;;  %v3793_v9 = vsel %vm3773_vm15, %v3760_v60, %v8378_v61  ;;  %v2354_v47 = vld [vmem:[#allocation3 + $0x108] sm:$0xff] }
 0x305   : > { %v8403_v22 = vunpack.i.h.bf16 %v8401_v1  ;;  %v8402_v52 = vunpack.i.l.bf16 %v8401_v1  ;;  %v8391_v48 = vpop.permute.xlu1 %8390 }
 0x306   : > { %v8393_v3 = vunpack.i.h.bf16 %v8391_v48  ;;  %v8392_v44 = vunpack.i.l.bf16 %v8391_v48 }
 0x307   : > { %v3889_v62 = vsel %vm3872_vm2, %v3856_v20, %v8402_v52  ;;  %v3890_v10 = vsel %vm3872_vm2, %v3857_v16, %v8403_v22  ;;  %v2355_v22 = vld [vmem:[#allocation3 + $0x110] sm:$0xff] }
 0x308   : > { %v3913_v24 = vpack.c.bf16 %v3890_v10, %v3889_v62  ;;  %v8411_v35 = vpop.permute.xlu0 %8410  ;;  %v3825_v5 = vsel %vm3806_vm0, %v3792_v51, %v8392_v44  ;;  %v3826_v38 = vsel %vm3806_vm0, %v3793_v9, %v8393_v3 }
 0x309   : > { %v8413_v53 = vunpack.i.h.bf16 %v8411_v35  ;;  %v8412_v37 = vunpack.i.l.bf16 %v8411_v35  ;;  %v8396_v17 = vpop.permute.xlu1 %8395 }
 0x30a   : > { %v8398_v32 = vunpack.i.h.bf16 %v8396_v17  ;;  %v8397_v26 = vunpack.i.l.bf16 %v8396_v17  ;;  %7279 = vmatprep.mubr.msk.bf16.mxu1 %vm11573_vm4, %v3913_v24 }
 0x30c   : > { %v3858_v2 = vsel %vm3839_vm1, %v3825_v5, %v8397_v26  ;;  %v3859_v29 = vsel %vm3839_vm1, %v3826_v38, %v8398_v32  ;;  %v8421_v55 = vpop.permute.xlu0 %8420 }
 0x30d   : > { %v8406_v45 = vpop.permute.xlu1 %8405  ;;  %v3891_v23 = vsel %vm3872_vm2, %v3858_v2, %v8412_v37  ;;  %v3892_v42 = vsel %vm3872_vm2, %v3859_v29, %v8413_v53  ;;  %v8423_v11 = vunpack.i.h.bf16 %v8421_v55  ;;  %v8422_v27 = vunpack.i.l.bf16 %v8421_v55 }
 0x30e   : > { %v3914_v19 = vpack.c.bf16 %v3892_v42, %v3891_v23  ;;  %v8408_v33 = vunpack.i.h.bf16 %v8406_v45  ;;  %v8407_v8 = vunpack.i.l.bf16 %v8406_v45 }
 0x310   : > { %7280 = vmatmul.mubr.msk.bf16.gmra.mrb[16].mxu1 %vm11573_vm4, %v3914_v19  ;;  %v8431_v58 = vpop.permute.xlu0 %8430  ;;  %v3666_v31 = vsel %vm1734_vm3, %v2353_v13, %v8408_v33  ;;  %v3665_v14 = vsel %vm1734_vm3, %v2352_v56, %v8407_v8 }
 0x311   : > { %v8416_v46 = vpop.permute.xlu1 %8415  ;;  %v8433_v30 = vunpack.i.h.bf16 %v8431_v58  ;;  %v8432_v57 = vunpack.i.l.bf16 %v8431_v58  ;;  %v3697_v15 = vsel %vm1800_vm6, %v3665_v14, %v8422_v27  ;;  %v3698_v50 = vsel %vm1800_vm6, %v3666_v31, %v8423_v11 }
 0x312   : > { %v8418_v28 = vunpack.i.h.bf16 %v8416_v46  ;;  %v8417_v36 = vunpack.i.l.bf16 %v8416_v46 }
 0x313   : > { %v3729_v1 = vsel %vm1866_vm8, %v3697_v15, %v8432_v57  ;;  %v3730_v61 = vsel %vm1866_vm8, %v3698_v50, %v8433_v30 }
 0x314   : > { %v8441_v6 = vpop.permute.xlu0 %8440  ;;  %v3668_v16 = vsel %vm1734_vm3, %v2355_v22, %v8418_v28  ;;  %v3667_v43 = vsel %vm1734_vm3, %v2354_v47, %v8417_v36 }
 0x315   : > { %v8426_v12 = vpop.permute.xlu1 %8425  ;;  %v8443_v34 = vunpack.i.h.bf16 %v8441_v6  ;;  %v8442_v41 = vunpack.i.l.bf16 %v8441_v6 }
 0x316   : > { %v8428_v7 = vunpack.i.h.bf16 %v8426_v12  ;;  %v8427_v0 = vunpack.i.l.bf16 %v8426_v12 }
 0x317   : > { %v3761_v3 = vsel %vm1932_vm10, %v3729_v1, %v8442_v41  ;;  %v3762_v44 = vsel %vm1932_vm10, %v3730_v61, %v8443_v34 }
 0x318   : > { %v8451_v21 = vpop.permute.xlu0 %8450  ;;  %v3699_v53 = vsel %vm1800_vm6, %v3667_v43, %v8427_v0  ;;  %v3700_v37 = vsel %vm1800_vm6, %v3668_v16, %v8428_v7 }
 0x319   : > { %v8436_v40 = vpop.permute.xlu1 %8435  ;;  %v8453_v52 = vunpack.i.h.bf16 %v8451_v21  ;;  %v8452_v48 = vunpack.i.l.bf16 %v8451_v21 }
 0x31a   : > { %v8438_v17 = vunpack.i.h.bf16 %v8436_v40  ;;  %v8437_v51 = vunpack.i.l.bf16 %v8436_v40 }
 0x31b   : > { %v3794_v9 = vsel %vm3773_vm15, %v3761_v3, %v8452_v48  ;;  %v3795_v32 = vsel %vm3773_vm15, %v3762_v44, %v8453_v52  ;;  %v2356_v3 = vld [vmem:[#allocation3 + $0x120] sm:$0xff]  ;;  %v2357_v44 = vld [vmem:[#allocation3 + $0x128] sm:$0xff] }
 0x31c   : > { %v8461_v25 = vpop.permute.xlu0 %8460  ;;  %v3731_v21 = vsel %vm1866_vm8, %v3699_v53, %v8437_v51  ;;  %v3732_v40 = vsel %vm1866_vm8, %v3700_v37, %v8438_v17 }
 0x31d   : > { %v8446_v63 = vpop.permute.xlu1 %8445  ;;  %v8463_v60 = vunpack.i.h.bf16 %v8461_v25  ;;  %v8462_v62 = vunpack.i.l.bf16 %v8461_v25 }
 0x31e   : > { %v8448_v26 = vunpack.i.h.bf16 %v8446_v63  ;;  %v8447_v5 = vunpack.i.l.bf16 %v8446_v63 }
 0x31f   : > { %v3827_v2 = vsel %vm3806_vm0, %v3794_v9, %v8462_v62  ;;  %v3828_v29 = vsel %vm3806_vm0, %v3795_v32, %v8463_v60 }
 0x320   : > { %v8471_v20 = vpop.permute.xlu0 %8470  ;;  %v3763_v56 = vsel %vm1932_vm10, %v3731_v21, %v8447_v5  ;;  %v3764_v13 = vsel %vm1932_vm10, %v3732_v40, %v8448_v26 }
 0x321   : > { %v8456_v10 = vpop.permute.xlu1 %8455  ;;  %v8473_v24 = vunpack.i.h.bf16 %v8471_v20  ;;  %v8472_v35 = vunpack.i.l.bf16 %v8471_v20 }
 0x322   : > { %v8458_v58 = vunpack.i.h.bf16 %v8456_v10  ;;  %v8457_v46 = vunpack.i.l.bf16 %v8456_v10 }
 0x323   : > { %v3860_v42 = vsel %vm3839_vm1, %v3827_v2, %v8472_v35  ;;  %v3861_v19 = vsel %vm3839_vm1, %v3828_v29, %v8473_v24 }
 0x324   : > { %v8481_v38 = vpop.permute.xlu0 %8480  ;;  %v3796_v57 = vsel %vm3773_vm15, %v3763_v56, %v8457_v46  ;;  %v3797_v25 = vsel %vm3773_vm15, %v3764_v13, %v8458_v58 }
 0x325   : > { %v8483_v55 = vunpack.i.h.bf16 %v8481_v38  ;;  %v8482_v45 = vunpack.i.l.bf16 %v8481_v38  ;;  %v8466_v23 = vpop.permute.xlu1 %8465 }
 0x326   : > { %v8468_v33 = vunpack.i.h.bf16 %v8466_v23  ;;  %v8467_v8 = vunpack.i.l.bf16 %v8466_v23 }
 0x327   : > { %v3893_v6 = vsel %vm3872_vm2, %v3860_v42, %v8482_v45  ;;  %v3894_v12 = vsel %vm3872_vm2, %v3861_v19, %v8483_v55 }
 0x328   : > { %v3915_v11 = vpack.c.bf16 %v3894_v12, %v3893_v6  ;;  %v8491_v27 = vpop.permute.xlu0 %8490  ;;  %v3829_v63 = vsel %vm3806_vm0, %v3796_v57, %v8467_v8  ;;  %v3830_v34 = vsel %vm3806_vm0, %v3797_v25, %v8468_v33 }
 0x329   : > { %v8493_v31 = vunpack.i.h.bf16 %v8491_v27  ;;  %v8492_v14 = vunpack.i.l.bf16 %v8491_v27  ;;  %v8476_v30 = vpop.permute.xlu1 %8475 }
 0x32a   : > { %v8478_v28 = vunpack.i.h.bf16 %v8476_v30  ;;  %v8477_v36 = vunpack.i.l.bf16 %v8476_v30  ;;  %7283 = vmatprep.mubr.msk.bf16.mxu1 %vm11573_vm4, %v3915_v11 }
 0x32c   : > { %v3862_v41 = vsel %vm3839_vm1, %v3829_v63, %v8477_v36  ;;  %v3863_v15 = vsel %vm3839_vm1, %v3830_v34, %v8478_v28  ;;  %v8501_v50 = vpop.permute.xlu0 %8500 }
 0x32d   : > { %v8486_v7 = vpop.permute.xlu1 %8485  ;;  %v3895_v0 = vsel %vm3872_vm2, %v3862_v41, %v8492_v14  ;;  %v3896_v1 = vsel %vm3872_vm2, %v3863_v15, %v8493_v31  ;;  %v8503_v62 = vunpack.i.h.bf16 %v8501_v50  ;;  %v8502_v10 = vunpack.i.l.bf16 %v8501_v50 }
 0x32e   : > { %v3916_v61 = vpack.c.bf16 %v3896_v1, %v3895_v0  ;;  %v8488_v20 = vunpack.i.h.bf16 %v8486_v7  ;;  %v8487_v16 = vunpack.i.l.bf16 %v8486_v7 }
 0x330   : > { %7284 = vmatmul.mubr.msk.bf16.gmra.mrb[20].mxu1 %vm11573_vm4, %v3916_v61  ;;  %v8511_v47 = vpop.permute.xlu0 %8510  ;;  %v3670_v24 = vsel %vm1734_vm3, %v2357_v44, %v8488_v20  ;;  %v3669_v35 = vsel %vm1734_vm3, %v2356_v3, %v8487_v16 }
 0x331   : > { %v8496_v22 = vpop.permute.xlu1 %8495  ;;  %v8513_v53 = vunpack.i.h.bf16 %v8511_v47  ;;  %v8512_v37 = vunpack.i.l.bf16 %v8511_v47  ;;  %v3701_v38 = vsel %vm1800_vm6, %v3669_v35, %v8502_v10  ;;  %v3702_v2 = vsel %vm1800_vm6, %v3670_v24, %v8503_v62 }
 0x332   : > { %v8498_v51 = vunpack.i.h.bf16 %v8496_v22  ;;  %v8497_v9 = vunpack.i.l.bf16 %v8496_v22 }
 0x333   : > { %v3733_v45 = vsel %vm1866_vm8, %v3701_v38, %v8512_v37  ;;  %v3734_v23 = vsel %vm1866_vm8, %v3702_v2, %v8513_v53 }
 0x334   : > { %v8521_v52 = vpop.permute.xlu0 %8520  ;;  %v3672_v46 = vsel %vm1734_vm3, %v10556_v59, %v8498_v51  ;;  %v3671_v6 = vsel %vm1734_vm3, %v10563_v39, %v8497_v9 }
 0x335   : > { %v8506_v48 = vpop.permute.xlu1 %8505  ;;  %v8523_v26 = vunpack.i.h.bf16 %v8521_v52  ;;  %v8522_v5 = vunpack.i.l.bf16 %v8521_v52 }
 0x336   : > { %v8508_v29 = vunpack.i.h.bf16 %v8506_v48  ;;  %v8507_v55 = vunpack.i.l.bf16 %v8506_v48 }
 0x337   : > { %v3765_v21 = vsel %vm1932_vm10, %v3733_v45, %v8522_v5  ;;  %v3766_v40 = vsel %vm1932_vm10, %v3734_v23, %v8523_v26 }
 0x338   : > { %v8531_v43 = vpop.permute.xlu0 %8530  ;;  %v3703_v56 = vsel %vm1800_vm6, %v3671_v6, %v8507_v55  ;;  %v3704_v13 = vsel %vm1800_vm6, %v3672_v46, %v8508_v29 }
 0x339   : > { %v8516_v60 = vpop.permute.xlu1 %8515  ;;  %v8533_v42 = vunpack.i.h.bf16 %v8531_v43  ;;  %v8532_v19 = vunpack.i.l.bf16 %v8531_v43 }
 0x33a   : > { %v8518_v31 = vunpack.i.h.bf16 %v8516_v60  ;;  %v8517_v14 = vunpack.i.l.bf16 %v8516_v60 }
 0x33b   : > { %v3798_v59 = vsel %vm3773_vm15, %v3765_v21, %v8532_v19  ;;  %v3799_v30 = vsel %vm3773_vm15, %v3766_v40, %v8533_v42 }
 0x33c   : > { %v8541_v17 = vpop.permute.xlu0 %8540  ;;  %v3735_v52 = vsel %vm1866_vm8, %v3703_v56, %v8517_v14  ;;  %v3736_v48 = vsel %vm1866_vm8, %v3704_v13, %v8518_v31 }
 0x33d   : > { %v8526_v32 = vpop.permute.xlu1 %8525  ;;  %v8543_v12 = vunpack.i.h.bf16 %v8541_v17  ;;  %v8542_v33 = vunpack.i.l.bf16 %v8541_v17 }
 0x33e   : > { %v8528_v39 = vunpack.i.h.bf16 %v8526_v32  ;;  %v8527_v57 = vunpack.i.l.bf16 %v8526_v32 }
 0x33f   : > { %v3831_v28 = vsel %vm3806_vm0, %v3798_v59, %v8542_v33  ;;  %v3832_v36 = vsel %vm3806_vm0, %v3799_v30, %v8543_v12 }
 0x340   : > { %v8551_v58 = vpop.permute.xlu0 %8550  ;;  %v3767_v43 = vsel %vm1932_vm10, %v3735_v52, %v8527_v57  ;;  %v3768_v60 = vsel %vm1932_vm10, %v3736_v48, %v8528_v39 }
 0x341   : > { %v8536_v8 = vpop.permute.xlu1 %8535  ;;  %v8553_v11 = vunpack.i.h.bf16 %v8551_v58  ;;  %v8552_v27 = vunpack.i.l.bf16 %v8551_v58 }
 0x342   : > { %v8538_v7 = vunpack.i.h.bf16 %v8536_v8  ;;  %v8537_v0 = vunpack.i.l.bf16 %v8536_v8 }
 0x343   : > { %v3864_v15 = vsel %vm3839_vm1, %v3831_v28, %v8552_v27  ;;  %v3865_v50 = vsel %vm3839_vm1, %v3832_v36, %v8553_v11 }
 0x344   : > { %v8561_v25 = vpop.permute.xlu0 %8560  ;;  %v3800_v44 = vsel %vm3773_vm15, %v3767_v43, %v8537_v0  ;;  %v3801_v24 = vsel %vm3773_vm15, %v3768_v60, %v8538_v7 }
 0x345   : > { %v8563_v63 = vunpack.i.h.bf16 %v8561_v25  ;;  %v8562_v34 = vunpack.i.l.bf16 %v8561_v25  ;;  %v8546_v41 = vpop.permute.xlu1 %8545 }
 0x346   : > { %v8548_v47 = vunpack.i.h.bf16 %v8546_v41  ;;  %v8547_v22 = vunpack.i.l.bf16 %v8546_v41 }
 0x347   : > { %v3897_v1 = vsel %vm3872_vm2, %v3864_v15, %v8562_v34  ;;  %v3898_v61 = vsel %vm3872_vm2, %v3865_v50, %v8563_v63 }
 0x348   : > { %v3917_v20 = vpack.c.bf16 %v3898_v61, %v3897_v1  ;;  %v8571_v16 = vpop.permute.xlu0 %8570  ;;  %v3833_v37 = vsel %vm3806_vm0, %v3800_v44, %v8547_v22  ;;  %v3834_v17 = vsel %vm3806_vm0, %v3801_v24, %v8548_v47 }
 0x349   : > { %v8573_v62 = vunpack.i.h.bf16 %v8571_v16  ;;  %v8572_v10 = vunpack.i.l.bf16 %v8571_v16  ;;  %v8556_v3 = vpop.permute.xlu1 %8555 }
 0x34a   : > { %v8558_v35 = vunpack.i.h.bf16 %v8556_v3  ;;  %v8557_v53 = vunpack.i.l.bf16 %v8556_v3  ;;  %7287 = vmatprep.mubr.msk.bf16.mxu1 %vm11573_vm4, %v3917_v20 }
 0x34c   : > { %v3866_v51 = vsel %vm3839_vm1, %v3833_v37, %v8557_v53  ;;  %v3867_v9 = vsel %vm3839_vm1, %v3834_v17, %v8558_v35  ;;  %v8581_v32 = vpop.permute.xlu0 %8580 }
 0x34d   : > { %v8566_v26 = vpop.permute.xlu1 %8565  ;;  %v3899_v5 = vsel %vm3872_vm2, %v3866_v51, %v8572_v10  ;;  %v3900_v38 = vsel %vm3872_vm2, %v3867_v9, %v8573_v62  ;;  %v8583_v12 = vunpack.i.h.bf16 %v8581_v32  ;;  %v8582_v33 = vunpack.i.l.bf16 %v8581_v32 }
 0x34e   : > { %v3918_v2 = vpack.c.bf16 %v3900_v38, %v3899_v5  ;;  %v8568_v58 = vunpack.i.h.bf16 %v8566_v26  ;;  %v8567_v46 = vunpack.i.l.bf16 %v8566_v26 }
 0x350   : > { %7288 = vmatmul.mubr.msk.bf16.gmra.mrb[24].mxu1 %vm11573_vm4, %v3918_v2  ;;  %v8591_v29 = vpop.permute.xlu0 %8590  ;;  %v3674_v21 = vsel %vm1734_vm3, %v10617_v49, %v8568_v58  ;;  %v3673_v40 = vsel %vm1734_vm3, %v10623_v54, %v8567_v46 }
 0x351   : > { %v8576_v55 = vpop.permute.xlu1 %8575  ;;  %v8593_v11 = vunpack.i.h.bf16 %v8591_v29  ;;  %v8592_v27 = vunpack.i.l.bf16 %v8591_v29  ;;  %v3705_v30 = vsel %vm1800_vm6, %v3673_v40, %v8582_v33  ;;  %v3706_v39 = vsel %vm1800_vm6, %v3674_v21, %v8583_v12 }
 0x352   : > { %v8578_v15 = vunpack.i.h.bf16 %v8576_v55  ;;  %v8577_v50 = vunpack.i.l.bf16 %v8576_v55 }
 0x353   : > { %v3737_v36 = vsel %vm1866_vm8, %v3705_v30, %v8592_v27  ;;  %v3738_v49 = vsel %vm1866_vm8, %v3706_v39, %v8593_v11  ;;  %v8918_v27 = vmov 1983009808   ;;  %v10968_v30 = vld [vmem:[%s11540_s4] ss:$0 sm:$0xff] }
 0x354   : > { %v8601_v45 = vpop.permute.xlu0 %8600  ;;  %v3676_v37 = vsel %vm1734_vm3, %v10669_v4, %v8578_v15  ;;  %v3675_v17 = vsel %vm1734_vm3, %v10677_v18, %v8577_v50 }
 0x355   : > { %v8586_v23 = vpop.permute.xlu1 %8585  ;;  %v8603_v56 = vunpack.i.h.bf16 %v8601_v45  ;;  %v8602_v13 = vunpack.i.l.bf16 %v8601_v45 }
 0x356   : > { %v8588_v20 = vunpack.i.h.bf16 %v8586_v23  ;;  %v8587_v16 = vunpack.i.l.bf16 %v8586_v23 }
 0x357   : > { %v3769_v34 = vsel %vm1932_vm10, %v3737_v36, %v8602_v13  ;;  %v3770_v41 = vsel %vm1932_vm10, %v3738_v49, %v8603_v56  ;;  %v4244_v56 = vunpack.c.l.s4 %v8918_v27  ;;  %v4246_v13 = vlaneseq }
 0x358   : > { %v8611_v42 = vpop.permute.xlu0 %8610  ;;  %v3707_v26 = vsel %vm1800_vm6, %v3675_v17, %v8587_v16  ;;  %v3708_v5 = vsel %vm1800_vm6, %v3676_v37, %v8588_v20 }
 0x359   : > { %v8596_v19 = vpop.permute.xlu1 %8595  ;;  %v8613_v31 = vunpack.i.h.bf16 %v8611_v42  ;;  %v8612_v14 = vunpack.i.l.bf16 %v8611_v42 }
 0x35a   : > { %v8598_v62 = vunpack.i.h.bf16 %v8596_v19  ;;  %v8597_v10 = vunpack.i.l.bf16 %v8596_v19 }
 0x35b   : > { %v3802_v7 = vsel %vm3773_vm15, %v3769_v34, %v8612_v14  ;;  %v3803_v0 = vsel %vm3773_vm15, %v3770_v41, %v8613_v31  ;;  %v4245_v14 = vunpack.c.0.s8 %v4244_v56 }
 0x35c   : > { %v8621_v6 = vpop.permute.xlu0 %8620  ;;  %v3739_v29 = vsel %vm1866_vm8, %v3707_v26, %v8597_v10  ;;  %v3740_v55 = vsel %vm1866_vm8, %v3708_v5, %v8598_v62 }
 0x35d   : > { %v8606_v8 = vpop.permute.xlu1 %8605  ;;  %v8623_v57 = vunpack.i.h.bf16 %v8621_v6  ;;  %v8622_v25 = vunpack.i.l.bf16 %v8621_v6 }
 0x35e   : > { %v8608_v24 = vunpack.i.h.bf16 %v8606_v8  ;;  %v8607_v35 = vunpack.i.l.bf16 %v8606_v8 }
 0x35f   : > { %v3835_v61 = vsel %vm3806_vm0, %v3802_v7, %v8622_v25  ;;  %v3836_v47 = vsel %vm3806_vm0, %v3803_v0, %v8623_v57 }
 0x360   : > { %v8631_v59 = vpop.permute.xlu0 %8630  ;;  %v3771_v23 = vsel %vm1932_vm10, %v3739_v29, %v8607_v35  ;;  %v3772_v18 = vsel %vm1932_vm10, %v3740_v55, %v8608_v24 }
 0x361   : > { %v8616_v28 = vpop.permute.xlu1 %8615  ;;  %v8633_v63 = vunpack.i.h.bf16 %v8631_v59  ;;  %v8632_v54 = vunpack.i.l.bf16 %v8631_v59  ;;  %v4247_v59 = vshrl.u32 %v4246_v13, 7 }
 0x362   : > { %v8618_v51 = vunpack.i.h.bf16 %v8616_v28  ;;  %v8617_v9 = vunpack.i.l.bf16 %v8616_v28 }
 0x363   : > { %v3868_v43 = vsel %vm3839_vm1, %v3835_v61, %v8632_v54  ;;  %v3869_v60 = vsel %vm3839_vm1, %v3836_v47, %v8633_v63  ;;  %v10971_v25 = vsub.s32 %v4245_v14, %v4247_v59  ;;  %v10978_v47 = vsub.s32 0, %v4247_v59 }
 0x364   : > { %v8641_v1 = vpop.permute.xlu0 %8640  ;;  %v3804_v42 = vsel %vm3773_vm15, %v3771_v23, %v8617_v9  ;;  %v3805_v19 = vsel %vm3773_vm15, %v3772_v18, %v8618_v51 }
 0x365   : > { %v8643_v22 = vunpack.i.h.bf16 %v8641_v1  ;;  %v8642_v52 = vunpack.i.l.bf16 %v8641_v1  ;;  %v8626_v48 = vpop.permute.xlu1 %8625 }
 0x366   : > { %v8628_v38 = vunpack.i.h.bf16 %v8626_v48  ;;  %v8627_v2 = vunpack.i.l.bf16 %v8626_v48 }
 0x367   : > { %v3901_v3 = vsel %vm3872_vm2, %v3868_v43, %v8642_v52  ;;  %v3902_v44 = vsel %vm3872_vm2, %v3869_v60, %v8643_v22 }
 0x368   : > { %v3919_v53 = vpack.c.bf16 %v3902_v44, %v3901_v3  ;;  %v3837_v46 = vsel %vm3806_vm0, %v3804_v42, %v8627_v2  ;;  %v3838_v6 = vsel %vm3806_vm0, %v3805_v19, %v8628_v38 }
 0x369   : > { %v8636_v32 = vpop.permute.xlu1 %8635 }
 0x36a   : > { %7291 = vmatprep.mubr.msk.bf16.mxu1 %vm11573_vm4, %v3919_v53  ;;  %v8638_v45 = vunpack.i.h.bf16 %v8636_v32  ;;  %v8637_v4 = vunpack.i.l.bf16 %v8636_v32 }
 0x36c   : > { %v3870_v8 = vsel %vm3839_vm1, %v3837_v46, %v8637_v4  ;;  %v3871_v21 = vsel %vm3839_vm1, %v3838_v6, %v8638_v45 }
 0x36d   : > { %v8646_v58 = vpop.permute.xlu1 %8645 }
 0x36e   : > { %v8648_v12 = vunpack.i.h.bf16 %v8646_v58  ;;  %v8647_v33 = vunpack.i.l.bf16 %v8646_v58 }
 0x370   : > { %v3903_v40 = vsel %vm3872_vm2, %v3870_v8, %v8647_v33  ;;  %v3904_v11 = vsel %vm3872_vm2, %v3871_v21, %v8648_v12 }
 0x371   : > { %v3920_v31 = vpack.c.bf16 %v3904_v11, %v3903_v40 }
 0x373   : > { %7292 = vmatmul.mubr.msk.bf16.gmra.mrb[28].mxu1 %vm11573_vm4, %v3920_v31  ;;  %vm5847_vm4 = vcmask 1047559  }
 0x377   : > { %v7265_v39 = vpop.f32.mrb[0].mxu1 }
 0x378   : > { %v4060_v57 = vadd.f32 %v7265_v39, %v10968_v30  ;;  %v4051_v28 = vpop.f32.mrb[1].mxu1 }
 0x379   : > { %v4052_v36 = vadd.f32 %v10968_v30, %v4051_v28  ;;  %v7266_v49 = vpop.f32.mrb[2].mxu1 }
 0x37a   : > { %v4180_v63 = vmax.f32 %v4060_v57, 0.0  ;;  %v4063_v54 = vadd.f32 %v7266_v49, %v10968_v30  ;;  %v4054_v34 = vpop.f32.mrb[3].mxu1 }
 0x37b   : > { %v4178_v41 = vmax.f32 %v4052_v36, 0.0  ;;  %v4055_v15 = vadd.f32 %v10968_v30, %v4054_v34 }
 0x37c   : > { %v4276_v50 = vcombine.high %v4180_v63, %v4180_v63  ;;  %v4283_v7 = vrot.slane %v4180_v63, %v10971_v25  ;;  %v4181_v0 = vmax.f32 %v4063_v54, 0.0 }
 0x37d   : > { %v4242_v1 = vcombine.high %v4178_v41, %v4178_v41  ;;  %v4249_v61 = vrot.slane %v4178_v41, %v10971_v25  ;;  %v4179_v22 = vmax.f32 %v4055_v15, 0.0 }
 0x37e   : > { %v4290_v52 = vrot.slane %v4276_v50, %v10971_v25  ;;  %v4291_v48 = vcombine.high %v4283_v7, %v4283_v7  ;;  %v6997_v20 = vrot.slane %v4283_v7, 9  ;;  %v4293_v16 = vcombine.high %v4181_v0, %v4181_v0 }
 0x37f   : > { %v4256_v43 = vrot.slane %v4242_v1, %v10971_v25  ;;  %v4257_v60 = vcombine.high %v4249_v61, %v4249_v61  ;;  %v6989_v62 = vrot.slane %v4249_v61, 9  ;;  %v4300_v10 = vrot.slane %v4181_v0, %v10971_v25 }
 0x380   : > { %v4292_v3 = vcombine.high %v4290_v52, %v4290_v52  ;;  %v6998_v44 = vrot.slane %v4291_v48, 9  ;;  %v6999_v24 = vrot.slane %v4290_v52, 9  ;;  %v5306_v35 = vmax.f32 %v4283_v7, %v6997_v20 }
 0x381   : > { %v4258_v53 = vcombine.high %v4256_v43, %v4256_v43  ;;  %v6990_v37 = vrot.slane %v4257_v60, 9  ;;  %v6991_v17 = vrot.slane %v4256_v43, 9  ;;  %v5298_v51 = vmax.f32 %v4249_v61, %v6989_v62 }
 0x382   : > { %v7000_v9 = vrot.slane %v4292_v3, 9  ;;  %v5307_v32 = vmax.f32 %v4291_v48, %v6998_v44  ;;  %v5308_v26 = vmax.f32 %v4290_v52, %v6999_v24  ;;  %v4307_v5 = vrot.slane %v4293_v16, %v10971_v25 }
 0x383   : > { %v6992_v38 = vrot.slane %v4258_v53, 9  ;;  %v5299_v2 = vmax.f32 %v4257_v60, %v6990_v37  ;;  %v5300_v29 = vmax.f32 %v4256_v43, %v6991_v17  ;;  %v5426_v55 = vmax.f32 %v5298_v51, %v5306_v35 }
 0x384   : > { %v5309_v45 = vmax.f32 %v4292_v3, %v7000_v9  ;;  %v4308_v4 = vcombine.high %v4300_v10, %v4300_v10  ;;  %v4309_v19 = vcombine.high %v4307_v5, %v4307_v5  ;;  %v7001_v46 = vrot.slane %v4300_v10, 9 }
 0x385   : > { %v5301_v23 = vmax.f32 %v4258_v53, %v6992_v38  ;;  %v5427_v18 = vmax.f32 %v5299_v2, %v5307_v32  ;;  %v5428_v42 = vmax.f32 %v5300_v29, %v5308_v26  ;;  %v5582_v58 = vrot.slane %v5426_v55, %v10978_v47 }
 0x386   : > { %v7003_v6 = vrot.slane %v4307_v5, 9  ;;  %v4259_v21 = vcombine.high %v4179_v22, %v4179_v22  ;;  %v7002_v40 = vrot.slane %v4308_v4, 9  ;;  %v4266_v11 = vrot.slane %v4179_v22, %v10971_v25 }
 0x387   : > { %v5429_v12 = vmax.f32 %v5301_v23, %v5309_v45  ;;  %v5586_v33 = vrot.slane %v5427_v18, %v10978_v47  ;;  %v5590_v8 = vrot.slane %v5428_v42, %v10978_v47  ;;  %v7004_v13 = vrot.slane %v4309_v19, 9 }
 0x388   : > { %v4273_v31 = vrot.slane %v4259_v21, %v10971_v25  ;;  %v5310_v59 = vmax.f32 %v4300_v10, %v7001_v46  ;;  %v4274_v39 = vcombine.high %v4266_v11, %v4266_v11  ;;  %v6993_v57 = vrot.slane %v4266_v11, 9 }
 0x389   : > { %v5594_v27 = vrot.slane %v5429_v12, %v10978_v47  ;;  %v5836_v56 = vsel %vm5835_vm5, %v5586_v33, %v5582_v58  ;;  %v5312_v28 = vmax.f32 %v4307_v5, %v7003_v6  ;;  %v5311_v54 = vmax.f32 %v4308_v4, %v7002_v40 }
 0x38a   : > { %v5838_v14 = vsel %vm5837_vm7, %v5590_v8, %v5836_v56  ;;  %v4275_v36 = vcombine.high %v4273_v31, %v4273_v31  ;;  %v6995_v49 = vrot.slane %v4273_v31, 9  ;;  %v6994_v34 = vrot.slane %v4274_v39, 9 }
 0x38b   : > { %v5840_v63 = vsel %vm5839_vm9, %v5594_v27, %v5838_v14  ;;  %v5302_v41 = vmax.f32 %v4266_v11, %v6993_v57  ;;  %v5313_v15 = vmax.f32 %v4309_v19, %v7004_v13 }
 0x38c   : > { %v6996_v50 = vrot.slane %v4275_v36, 9  ;;  %v5304_v7 = vmax.f32 %v4273_v31, %v6995_v49  ;;  %v5303_v0 = vmax.f32 %v4274_v39, %v6994_v34 }
 0x38d   : > { %v5430_v1 = vmax.f32 %v5302_v41, %v5310_v59 }
 0x38e   : > { %v5305_v61 = vmax.f32 %v4275_v36, %v6996_v50  ;;  %v5432_v22 = vmax.f32 %v5304_v7, %v5312_v28  ;;  %v5431_v52 = vmax.f32 %v5303_v0, %v5311_v54 }
 0x38f   : > { %v5598_v48 = vrot.slane %v5430_v1, %v10978_v47 }
 0x390   : > { %v5433_v20 = vmax.f32 %v5305_v61, %v5313_v15  ;;  %v5602_v16 = vrot.slane %v5431_v52, %v10978_v47  ;;  %v5606_v60 = vrot.slane %v5432_v22, %v10978_v47  ;;  %v5923_v61 = vld [vmem:[#allocation4 + $0x1] sm:$0xff] }
 0x391   : > { %v5842_v43 = vsel %vm5841_vm11, %v5598_v48, %v5840_v63 }
 0x392   : > { %v5610_v62 = vrot.slane %v5433_v20, %v10978_v47  ;;  %v5844_v10 = vsel %vm5843_vm12, %v5602_v16, %v5842_v43 }
 0x393   : > { %v5846_v3 = vsel %vm5845_vm13, %v5606_v60, %v5844_v10 }
 0x394   : > { %v5848_v44 = vsel %vm5847_vm4, %v5610_v62, %v5846_v3 }
 0x395   : > { %5907 = vst.msk [vmem:[#allocation4 + $0x11] sm:$0xff] %vm1734_vm3, %v5848_v44 }
 0x397   : > { %v7269_v24 = vpop.f32.mrb[4].mxu1 }
 0x398   : > { %v4076_v35 = vadd.f32 %v7269_v24, %v10968_v30  ;;  %v4067_v53 = vpop.f32.mrb[5].mxu1 }
 0x399   : > { %v4068_v37 = vadd.f32 %v10968_v30, %v4067_v53  ;;  %v7270_v17 = vpop.f32.mrb[6].mxu1 }
 0x39a   : > { %v4184_v51 = vmax.f32 %v4076_v35, 0.0  ;;  %v4079_v9 = vadd.f32 %v7270_v17, %v10968_v30  ;;  %v4070_v32 = vpop.f32.mrb[7].mxu1 }
 0x39b   : > { %v4182_v26 = vmax.f32 %v4068_v37, 0.0  ;;  %v4071_v5 = vadd.f32 %v10968_v30, %v4070_v32 }
 0x39c   : > { %v4344_v38 = vcombine.high %v4184_v51, %v4184_v51  ;;  %v4351_v2 = vrot.slane %v4184_v51, %v10971_v25  ;;  %v4185_v29 = vmax.f32 %v4079_v9, 0.0  ;;  %v11013_v22 = vld [vmem:[#allocation4 + $0x11] sm:$0xff]  ;;  %v5931_v51 = vld [vmem:[#allocation4 + $0x2] sm:$0xff] }
 0x39d   : > { %v4310_v55 = vcombine.high %v4182_v26, %v4182_v26  ;;  %v4317_v45 = vrot.slane %v4182_v26, %v10971_v25  ;;  %v4183_v4 = vmax.f32 %v4071_v5, 0.0  ;;  %v8649_v24 = vpack.i.bf16 %v11013_v22, %v5923_v61  ;;  %v11023_v9 = vld [vmem:[#allocation4 + $0x12] sm:$0xff] }
 0x39e   : > { %v4358_v23 = vrot.slane %v4344_v38, %v10971_v25  ;;  %v4359_v18 = vcombine.high %v4351_v2, %v4351_v2  ;;  %v7013_v42 = vrot.slane %v4351_v2, 9  ;;  %v4361_v19 = vcombine.high %v4185_v29, %v4185_v29 }
 0x39f   : > { %v4324_v58 = vrot.slane %v4310_v55, %v10971_v25  ;;  %v4325_v46 = vcombine.high %v4317_v45, %v4317_v45  ;;  %v7005_v6 = vrot.slane %v4317_v45, 9  ;;  %v4368_v12 = vrot.slane %v4185_v29, %v10971_v25  ;;  %8650 = vrot.lane.b32.xlu0 %v8649_v24, %s8907_s19 }
 0x3a0   : > { %v4360_v33 = vcombine.high %v4358_v23, %v4358_v23  ;;  %v7014_v8 = vrot.slane %v4359_v18, 9  ;;  %v7015_v21 = vrot.slane %v4358_v23, 9  ;;  %v5322_v40 = vmax.f32 %v4351_v2, %v7013_v42 }
 0x3a1   : > { %v4326_v11 = vcombine.high %v4324_v58, %v4324_v58  ;;  %v7006_v27 = vrot.slane %v4325_v46, 9  ;;  %v7007_v56 = vrot.slane %v4324_v58, 9  ;;  %v5314_v13 = vmax.f32 %v4317_v45, %v7005_v6 }
 0x3a2   : > { %v7016_v31 = vrot.slane %v4360_v33, 9  ;;  %v5323_v14 = vmax.f32 %v4359_v18, %v7014_v8  ;;  %v5324_v59 = vmax.f32 %v4358_v23, %v7015_v21  ;;  %v4375_v39 = vrot.slane %v4361_v19, %v10971_v25 }
 0x3a3   : > { %v7008_v57 = vrot.slane %v4326_v11, 9  ;;  %v5315_v28 = vmax.f32 %v4325_v46, %v7006_v27  ;;  %v5316_v36 = vmax.f32 %v4324_v58, %v7007_v56  ;;  %v5434_v49 = vmax.f32 %v5314_v13, %v5322_v40 }
 0x3a4   : > { %v5325_v63 = vmax.f32 %v4360_v33, %v7016_v31  ;;  %v4376_v54 = vcombine.high %v4368_v12, %v4368_v12  ;;  %v4377_v34 = vcombine.high %v4375_v39, %v4375_v39  ;;  %v7017_v0 = vrot.slane %v4368_v12, 9 }
 0x3a5   : > { %v5317_v41 = vmax.f32 %v4326_v11, %v7008_v57  ;;  %v5435_v15 = vmax.f32 %v5315_v28, %v5323_v14  ;;  %v5436_v50 = vmax.f32 %v5316_v36, %v5324_v59  ;;  %v5614_v7 = vrot.slane %v5434_v49, %v10978_v47 }
 0x3a6   : > { %v7019_v1 = vrot.slane %v4375_v39, 9  ;;  %v4327_v16 = vcombine.high %v4183_v4, %v4183_v4  ;;  %v7018_v43 = vrot.slane %v4376_v54, 9  ;;  %v7020_v60 = vrot.slane %v4377_v34, 9 }
 0x3a7   : > { %v5437_v52 = vmax.f32 %v5317_v41, %v5325_v63  ;;  %v5618_v48 = vrot.slane %v5435_v15, %v10978_v47  ;;  %v5622_v20 = vrot.slane %v5436_v50, %v10978_v47  ;;  %v4334_v62 = vrot.slane %v4183_v4, %v10971_v25 }
 0x3a8   : > { %v4341_v44 = vrot.slane %v4327_v16, %v10971_v25  ;;  %v5326_v53 = vmax.f32 %v4368_v12, %v7017_v0  ;;  %v5328_v32 = vmax.f32 %v4375_v39, %v7019_v1  ;;  %v5327_v2 = vmax.f32 %v4376_v54, %v7018_v43 }
 0x3a9   : > { %v5626_v10 = vrot.slane %v5437_v52, %v10978_v47  ;;  %v5849_v3 = vsel %vm5835_vm5, %v5618_v48, %v5614_v7  ;;  %v4342_v37 = vcombine.high %v4334_v62, %v4334_v62  ;;  %v7009_v17 = vrot.slane %v4334_v62, 9 }
 0x3aa   : > { %v5850_v35 = vsel %vm5837_vm7, %v5622_v20, %v5849_v3  ;;  %v4343_v26 = vcombine.high %v4341_v44, %v4341_v44  ;;  %v7011_v5 = vrot.slane %v4341_v44, 9  ;;  %v5329_v45 = vmax.f32 %v4377_v34, %v7020_v60 }
 0x3ab   : > { %v5851_v38 = vsel %vm5839_vm9, %v5626_v10, %v5850_v35  ;;  %v7010_v29 = vrot.slane %v4342_v37, 9  ;;  %v5318_v55 = vmax.f32 %v4334_v62, %v7009_v17  ;;  %v8654_v18 = vpack.i.bf16 %v11023_v9, %v5931_v51 }
 0x3ac   : > { %v7012_v4 = vrot.slane %v4343_v26, 9  ;;  %v5320_v23 = vmax.f32 %v4341_v44, %v7011_v5 }
 0x3ad   : > { %v5319_v42 = vmax.f32 %v4342_v37, %v7010_v29  ;;  %v5438_v19 = vmax.f32 %v5318_v55, %v5326_v53  ;;  %8655 = vrot.lane.b32.xlu0 %v8654_v18, %s8909_s23 }
 0x3ae   : > { %v5321_v58 = vmax.f32 %v4343_v26, %v7012_v4  ;;  %v5440_v46 = vmax.f32 %v5320_v23, %v5328_v32 }
 0x3af   : > { %v5439_v6 = vmax.f32 %v5319_v42, %v5327_v2  ;;  %v5630_v12 = vrot.slane %v5438_v19, %v10978_v47 }
 0x3b0   : > { %v5441_v33 = vmax.f32 %v5321_v58, %v5329_v45  ;;  %v5638_v40 = vrot.slane %v5440_v46, %v10978_v47 }
 0x3b1   : > { %v5634_v8 = vrot.slane %v5439_v6, %v10978_v47  ;;  %v5852_v21 = vsel %vm5841_vm11, %v5630_v12, %v5851_v38 }
 0x3b2   : > { %v5642_v11 = vrot.slane %v5441_v33, %v10978_v47 }
 0x3b3   : > { %v5853_v27 = vsel %vm5843_vm12, %v5634_v8, %v5852_v21 }
 0x3b4   : > { %v5854_v56 = vsel %vm5845_vm13, %v5638_v40, %v5853_v27 }
 0x3b5   : > { %v5855_v13 = vsel %vm5847_vm4, %v5642_v11, %v5854_v56  ;;  %v11054_v56 = vld [vmem:[#allocation4 + $0x10] sm:$0xff] }
 0x3b6   : > { %5908 = vst.msk [vmem:[#allocation4 + $0x21] sm:$0xff] %vm1734_vm3, %v5855_v13 }
 0x3b7   : > { %v7273_v31 = vpop.f32.mrb[8].mxu1 }
 0x3b8   : > { %v4092_v14 = vadd.f32 %v7273_v31, %v10968_v30  ;;  %v4083_v59 = vpop.f32.mrb[9].mxu1 }
 0x3b9   : > { %v4084_v39 = vadd.f32 %v10968_v30, %v4083_v59  ;;  %v7274_v57 = vpop.f32.mrb[10].mxu1 }
 0x3ba   : > { %v4188_v28 = vmax.f32 %v4092_v14, 0.0  ;;  %v4095_v36 = vadd.f32 %v7274_v57, %v10968_v30  ;;  %v4086_v49 = vpop.f32.mrb[11].mxu1 }
 0x3bb   : > { %v4186_v63 = vmax.f32 %v4084_v39, 0.0  ;;  %v4087_v54 = vadd.f32 %v10968_v30, %v4086_v49 }
 0x3bc   : > { %v4412_v34 = vcombine.high %v4188_v28, %v4188_v28  ;;  %v4419_v41 = vrot.slane %v4188_v28, %v10971_v25  ;;  %v4189_v15 = vmax.f32 %v4095_v36, 0.0 }
 0x3bd   : > { %v4378_v50 = vcombine.high %v4186_v63, %v4186_v63  ;;  %v4385_v7 = vrot.slane %v4186_v63, %v10971_v25  ;;  %v4187_v0 = vmax.f32 %v4087_v54, 0.0  ;;  %v11049_v6 = vld [vmem:[#allocation4 + $0x20] sm:$0xff] }
 0x3be   : > { %v4426_v1 = vrot.slane %v4412_v34, %v10971_v25  ;;  %v4427_v61 = vcombine.high %v4419_v41, %v4419_v41  ;;  %v7029_v52 = vrot.slane %v4419_v41, 9  ;;  %v4429_v48 = vcombine.high %v4189_v15, %v4189_v15  ;;  %v11062_v49 = vld [vmem:[#allocation4 + $0x21] sm:$0xff] }
 0x3bf   : > { %v4392_v20 = vrot.slane %v4378_v50, %v10971_v25  ;;  %v4393_v16 = vcombine.high %v4385_v7, %v4385_v7  ;;  %v7021_v43 = vrot.slane %v4385_v7, 9  ;;  %v4436_v60 = vrot.slane %v4189_v15, %v10971_v25 }
 0x3c0   : > { %v4428_v62 = vcombine.high %v4426_v1, %v4426_v1  ;;  %v7030_v10 = vrot.slane %v4427_v61, 9  ;;  %v7031_v3 = vrot.slane %v4426_v1, 9  ;;  %v5338_v44 = vmax.f32 %v4419_v41, %v7029_v52 }
 0x3c1   : > { %v4394_v24 = vcombine.high %v4392_v20, %v4392_v20  ;;  %v7022_v35 = vrot.slane %v4393_v16, 9  ;;  %v7023_v53 = vrot.slane %v4392_v20, 9  ;;  %v5330_v37 = vmax.f32 %v4385_v7, %v7021_v43 }
 0x3c2   : > { %v7032_v17 = vrot.slane %v4428_v62, 9  ;;  %v5339_v51 = vmax.f32 %v4427_v61, %v7030_v10  ;;  %v5340_v32 = vmax.f32 %v4426_v1, %v7031_v3  ;;  %v4443_v26 = vrot.slane %v4429_v48, %v10971_v25 }
 0x3c3   : > { %v7024_v5 = vrot.slane %v4394_v24, 9  ;;  %v5331_v38 = vmax.f32 %v4393_v16, %v7022_v35  ;;  %v5332_v2 = vmax.f32 %v4392_v20, %v7023_v53  ;;  %v5442_v29 = vmax.f32 %v5330_v37, %v5338_v44  ;;  %v11068_v16 = vld [vmem:[#allocation4 + $0x22] sm:$0xff] }
 0x3c4   : > { %v5341_v55 = vmax.f32 %v4428_v62, %v7032_v17  ;;  %v4444_v45 = vcombine.high %v4436_v60, %v4436_v60  ;;  %v4445_v4 = vcombine.high %v4443_v26, %v4443_v26  ;;  %v7033_v58 = vrot.slane %v4436_v60, 9 }
 0x3c5   : > { %v5333_v23 = vmax.f32 %v4394_v24, %v7024_v5  ;;  %v5443_v18 = vmax.f32 %v5331_v38, %v5339_v51  ;;  %v5444_v42 = vmax.f32 %v5332_v2, %v5340_v32  ;;  %v5646_v19 = vrot.slane %v5442_v29, %v10978_v47 }
 0x3c6   : > { %v7035_v46 = vrot.slane %v4443_v26, 9  ;;  %v4395_v21 = vcombine.high %v4187_v0, %v4187_v0  ;;  %v7034_v40 = vrot.slane %v4444_v45, 9  ;;  %v7036_v11 = vrot.slane %v4445_v4, 9 }
 0x3c7   : > { %v5445_v12 = vmax.f32 %v5333_v23, %v5341_v55  ;;  %v5650_v33 = vrot.slane %v5443_v18, %v10978_v47  ;;  %v5654_v8 = vrot.slane %v5444_v42, %v10978_v47  ;;  %v4402_v27 = vrot.slane %v4187_v0, %v10971_v25 }
 0x3c8   : > { %v4409_v14 = vrot.slane %v4395_v21, %v10971_v25  ;;  %v8659_v59 = vpack.i.bf16 %v11049_v6, %v11054_v56  ;;  %v5342_v57 = vmax.f32 %v4436_v60, %v7033_v58  ;;  %v5344_v63 = vmax.f32 %v4443_v26, %v7035_v46 }
 0x3c9   : > { %v5658_v13 = vrot.slane %v5445_v12, %v10978_v47  ;;  %v5856_v31 = vsel %vm5835_vm5, %v5650_v33, %v5646_v19  ;;  %v4410_v28 = vcombine.high %v4402_v27, %v4402_v27  ;;  %v7025_v36 = vrot.slane %v4402_v27, 9 }
 0x3ca   : > { %v5857_v39 = vsel %vm5837_vm7, %v5654_v8, %v5856_v31  ;;  %v4411_v54 = vcombine.high %v4409_v14, %v4409_v14  ;;  %v7027_v34 = vrot.slane %v4409_v14, 9  ;;  %8660 = vrot.lane.b32.xlu0 %v8659_v59, %s8911_s15  ;;  %v5343_v15 = vmax.f32 %v4444_v45, %v7034_v40 }
 0x3cb   : > { %v5858_v41 = vsel %vm5839_vm9, %v5658_v13, %v5857_v39  ;;  %v7026_v50 = vrot.slane %v4410_v28, 9  ;;  %v5334_v7 = vmax.f32 %v4402_v27, %v7025_v36  ;;  %v5345_v0 = vmax.f32 %v4445_v4, %v7036_v11 }
 0x3cc   : > { %v7028_v1 = vrot.slane %v4411_v54, 9  ;;  %v5336_v61 = vmax.f32 %v4409_v14, %v7027_v34  ;;  %v8664_v52 = vpack.i.bf16 %v11062_v49, %v11013_v22  ;;  %v8669_v53 = vpack.i.bf16 %v11068_v16, %v11023_v9 }
 0x3cd   : > { %v5335_v48 = vmax.f32 %v4410_v28, %v7026_v50  ;;  %v5446_v20 = vmax.f32 %v5334_v7, %v5342_v57 }
 0x3ce   : > { %v5337_v43 = vmax.f32 %v4411_v54, %v7028_v1  ;;  %v5448_v60 = vmax.f32 %v5336_v61, %v5344_v63  ;;  %8665 = vrot.lane.b32.xlu0 %v8664_v52, %s8913_s17 }
 0x3cf   : > { %v7277_v62 = vpop.f32.mrb[12].mxu1  ;;  %v5447_v10 = vmax.f32 %v5335_v48, %v5343_v15  ;;  %v5662_v3 = vrot.slane %v5446_v20, %v10978_v47 }
 0x3d0   : > { %v4108_v44 = vadd.f32 %v7277_v62, %v10968_v30  ;;  %v4099_v24 = vpop.f32.mrb[13].mxu1  ;;  %v5449_v35 = vmax.f32 %v5337_v43, %v5345_v0  ;;  %v5670_v38 = vrot.slane %v5448_v60, %v10978_v47 }
 0x3d1   : > { %v4100_v22 = vadd.f32 %v10968_v30, %v4099_v24  ;;  %v7278_v37 = vpop.f32.mrb[14].mxu1  ;;  %v5666_v17 = vrot.slane %v5447_v10, %v10978_v47  ;;  %v5859_v51 = vsel %vm5841_vm11, %v5662_v3, %v5858_v41 }
 0x3d2   : > { %v4192_v32 = vmax.f32 %v4108_v44, 0.0  ;;  %v4111_v26 = vadd.f32 %v7278_v37, %v10968_v30  ;;  %v4102_v5 = vpop.f32.mrb[15].mxu1  ;;  %v5674_v2 = vrot.slane %v5449_v35, %v10978_v47  ;;  %8670 = vrot.lane.b32.xlu0 %v8669_v53, %s8917_s9 }
 0x3d3   : > { %v4190_v29 = vmax.f32 %v4100_v22, 0.0  ;;  %v4103_v9 = vadd.f32 %v10968_v30, %v4102_v5  ;;  %v5860_v55 = vsel %vm5843_vm12, %v5666_v17, %v5859_v51 }
 0x3d4   : > { %v4480_v45 = vcombine.high %v4192_v32, %v4192_v32  ;;  %v4487_v4 = vrot.slane %v4192_v32, %v10971_v25  ;;  %v4193_v23 = vmax.f32 %v4111_v26, 0.0  ;;  %v5861_v18 = vsel %vm5845_vm13, %v5670_v38, %v5860_v55 }
 0x3d5   : > { %v4446_v42 = vcombine.high %v4190_v29, %v4190_v29  ;;  %v4453_v19 = vrot.slane %v4190_v29, %v10971_v25  ;;  %v4191_v58 = vmax.f32 %v4103_v9, 0.0  ;;  %v5862_v46 = vsel %vm5847_vm4, %v5674_v2, %v5861_v18 }
 0x3d6   : > { %v4494_v12 = vrot.slane %v4480_v45, %v10971_v25  ;;  %v4495_v33 = vcombine.high %v4487_v4, %v4487_v4  ;;  %v7045_v8 = vrot.slane %v4487_v4, 9  ;;  %5909 = vst.msk [vmem:[#allocation4 + $0x31] sm:$0xff] %vm1734_vm3, %v5862_v46  ;;  %v4497_v27 = vcombine.high %v4193_v23, %v4193_v23 }
 0x3d7   : > { %v4460_v21 = vrot.slane %v4446_v42, %v10971_v25  ;;  %v4461_v40 = vcombine.high %v4453_v19, %v4453_v19  ;;  %v7037_v11 = vrot.slane %v4453_v19, 9  ;;  %v4504_v41 = vrot.slane %v4193_v23, %v10971_v25 }
 0x3d8   : > { %v4496_v13 = vcombine.high %v4494_v12, %v4494_v12  ;;  %v7046_v31 = vrot.slane %v4495_v33, 9  ;;  %v7047_v14 = vrot.slane %v4494_v12, 9  ;;  %v5354_v59 = vmax.f32 %v4487_v4, %v7045_v8 }
 0x3d9   : > { %v4462_v39 = vcombine.high %v4460_v21, %v4460_v21  ;;  %v7038_v57 = vrot.slane %v4461_v40, 9  ;;  %v7039_v28 = vrot.slane %v4460_v21, 9  ;;  %v5346_v36 = vmax.f32 %v4453_v19, %v7037_v11 }
 0x3da   : > { %v7048_v63 = vrot.slane %v4496_v13, 9  ;;  %v5355_v54 = vmax.f32 %v4495_v33, %v7046_v31  ;;  %v5356_v34 = vmax.f32 %v4494_v12, %v7047_v14  ;;  %v4511_v61 = vrot.slane %v4497_v27, %v10971_v25 }
 0x3db   : > { %v7040_v15 = vrot.slane %v4462_v39, 9  ;;  %v5347_v50 = vmax.f32 %v4461_v40, %v7038_v57  ;;  %v5348_v7 = vmax.f32 %v4460_v21, %v7039_v28  ;;  %v5450_v0 = vmax.f32 %v5346_v36, %v5354_v59 }
 0x3dc   : > { %v5357_v1 = vmax.f32 %v4496_v13, %v7048_v63  ;;  %v4512_v52 = vcombine.high %v4504_v41, %v4504_v41  ;;  %v7049_v48 = vrot.slane %v4504_v41, 9  ;;  %v4513_v10 = vcombine.high %v4511_v61, %v4511_v61 }
 0x3dd   : > { %v5349_v20 = vmax.f32 %v4462_v39, %v7040_v15  ;;  %v5451_v43 = vmax.f32 %v5347_v50, %v5355_v54  ;;  %v5452_v60 = vmax.f32 %v5348_v7, %v5356_v34  ;;  %v5678_v62 = vrot.slane %v5450_v0, %v10978_v47  ;;  %v11094_v24 = vld [vmem:[#allocation4 + $0x31] sm:$0xff] }
 0x3de   : > { %v7050_v3 = vrot.slane %v4512_v52, 9  ;;  %v7051_v44 = vrot.slane %v4511_v61, 9  ;;  %v4463_v37 = vcombine.high %v4191_v58, %v4191_v58  ;;  %v7052_v17 = vrot.slane %v4513_v10, 9  ;;  %v11099_v5 = vld [vmem:[#allocation4 + $0x30] sm:$0xff] }
 0x3df   : > { %v5453_v35 = vmax.f32 %v5349_v20, %v5357_v1  ;;  %v5682_v53 = vrot.slane %v5451_v43, %v10978_v47  ;;  %v5686_v22 = vrot.slane %v5452_v60, %v10978_v47  ;;  %v5358_v51 = vmax.f32 %v4504_v41, %v7049_v48  ;;  %v11107_v18 = vld [vmem:[#allocation4 + $0x32] sm:$0xff] }
 0x3e0   : > { %v5359_v32 = vmax.f32 %v4512_v52, %v7050_v3  ;;  %v4470_v26 = vrot.slane %v4191_v58, %v10971_v25  ;;  %v4477_v29 = vrot.slane %v4463_v37, %v10971_v25  ;;  %v8674_v9 = vpack.i.bf16 %v11094_v24, %v11062_v49 }
 0x3e1   : > { %v5690_v38 = vrot.slane %v5453_v35, %v10978_v47  ;;  %v5863_v2 = vsel %vm5835_vm5, %v5682_v53, %v5678_v62  ;;  %v5360_v45 = vmax.f32 %v4511_v61, %v7051_v44  ;;  %v8684_v46 = vpack.i.bf16 %v11099_v5, %v11049_v6 }
 0x3e2   : > { %v5864_v55 = vsel %vm5837_vm7, %v5686_v22, %v5863_v2  ;;  %v4478_v4 = vcombine.high %v4470_v26, %v4470_v26  ;;  %v7041_v23 = vrot.slane %v4470_v26, 9  ;;  %v4479_v42 = vcombine.high %v4477_v29, %v4477_v29  ;;  %8675 = vrot.lane.b32.xlu1 %v8674_v9, %s8907_s19 }
 0x3e3   : > { %v7043_v19 = vrot.slane %v4477_v29, 9  ;;  %v5865_v58 = vsel %vm5839_vm9, %v5690_v38, %v5864_v55  ;;  %v7281_v12 = vpop.f32.mrb[16].mxu1  ;;  %v5361_v33 = vmax.f32 %v4513_v10, %v7052_v17  ;;  %8685 = vrot.lane.b32.xlu0 %v8684_v46, %s8914_s22  ;;  %v8679_v13 = vpack.i.bf16 %v11107_v18, %v11068_v16 }
 0x3e4   : > { %v7042_v8 = vrot.slane %v4478_v4, 9  ;;  %v5350_v49 = vmax.f32 %v4470_v26, %v7041_v23  ;;  %v4124_v21 = vadd.f32 %v7281_v12, %v10968_v30  ;;  %v4115_v40 = vpop.f32.mrb[17].mxu1  ;;  %v7044_v11 = vrot.slane %v4479_v42, 9 }
 0x3e5   : > { %v5352_v27 = vmax.f32 %v4477_v29, %v7043_v19  ;;  %v4116_v31 = vadd.f32 %v10968_v30, %v4115_v40  ;;  %v7282_v14 = vpop.f32.mrb[18].mxu1 }
 0x3e6   : > { %v5351_v59 = vmax.f32 %v4478_v4, %v7042_v8  ;;  %v5454_v39 = vmax.f32 %v5350_v49, %v5358_v51  ;;  %v4196_v6 = vmax.f32 %v4124_v21, 0.0  ;;  %v4127_v57 = vadd.f32 %v7282_v14, %v10968_v30  ;;  %v4118_v28 = vpop.f32.mrb[19].mxu1  ;;  %8680 = vrot.lane.b32.xlu1 %v8679_v13, %s8909_s23 }
 0x3e7   : > { %v5353_v36 = vmax.f32 %v4479_v42, %v7044_v11  ;;  %v5456_v63 = vmax.f32 %v5352_v27, %v5360_v45  ;;  %v4194_v54 = vmax.f32 %v4116_v31, 0.0  ;;  %v4119_v34 = vadd.f32 %v10968_v30, %v4118_v28  ;;  %8690 = vrot.lane.b32.xlu0 %v8674_v9, %s8915_s29 }
 0x3e8   : > { %v5455_v41 = vmax.f32 %v5351_v59, %v5359_v32  ;;  %v5694_v15 = vrot.slane %v5454_v39, %v10978_v47  ;;  %v4548_v16 = vcombine.high %v4196_v6, %v4196_v6  ;;  %v4555_v50 = vrot.slane %v4196_v6, %v10971_v25 }
 0x3e9   : > { %v5457_v7 = vmax.f32 %v5353_v36, %v5361_v33  ;;  %v5702_v0 = vrot.slane %v5456_v63, %v10978_v47  ;;  %v4514_v1 = vcombine.high %v4194_v54, %v4194_v54  ;;  %v4521_v61 = vrot.slane %v4194_v54, %v10971_v25 }
 0x3ea   : > { %v5698_v52 = vrot.slane %v5455_v41, %v10978_v47  ;;  %v5866_v48 = vsel %vm5841_vm11, %v5694_v15, %v5865_v58  ;;  %v4562_v20 = vrot.slane %v4548_v16, %v10971_v25  ;;  %v4563_v43 = vcombine.high %v4555_v50, %v4555_v50 }
 0x3eb   : > { %v5706_v60 = vrot.slane %v5457_v7, %v10978_v47  ;;  %v7061_v62 = vrot.slane %v4555_v50, 9  ;;  %v4528_v10 = vrot.slane %v4514_v1, %v10971_v25  ;;  %v4529_v3 = vcombine.high %v4521_v61, %v4521_v61  ;;  %8695 = vrot.lane.b32.xlu0 %v8679_v13, %s8916_s8 }
 0x3ec   : > { %v5867_v44 = vsel %vm5843_vm12, %v5698_v52, %v5866_v48  ;;  %v4564_v35 = vcombine.high %v4562_v20, %v4562_v20  ;;  %v7062_v53 = vrot.slane %v4563_v43, 9  ;;  %v7063_v22 = vrot.slane %v4562_v20, 9 }
 0x3ed   : > { %v5868_v37 = vsel %vm5845_vm13, %v5702_v0, %v5867_v44  ;;  %v5370_v17 = vmax.f32 %v4555_v50, %v7061_v62  ;;  %v4530_v51 = vcombine.high %v4528_v10, %v4528_v10  ;;  %v7053_v32 = vrot.slane %v4521_v61, 9  ;;  %v8818_v44 = vld [vmem:[%s11541_s5 + $0x8] sm:$0xff]  }
 0x3ee   : > { %v5869_v26 = vsel %vm5847_vm4, %v5706_v60, %v5868_v37  ;;  %v7064_v38 = vrot.slane %v4564_v35, 9  ;;  %v5371_v2 = vmax.f32 %v4563_v43, %v7062_v53  ;;  %v5372_v29 = vmax.f32 %v4562_v20, %v7063_v22 }
 0x3ef   : > { %5910 = vst.msk [vmem:[#allocation4 + $0x41] sm:$0xff] %vm1734_vm3, %v5869_v26  ;;  %v7054_v9 = vrot.slane %v4529_v3, 9  ;;  %v7055_v55 = vrot.slane %v4528_v10, 9  ;;  %v7056_v45 = vrot.slane %v4530_v51, 9  ;;  %v5362_v4 = vmax.f32 %v4521_v61, %v7053_v32 }
 0x3f0   : > { %v5373_v23 = vmax.f32 %v4564_v35, %v7064_v38  ;;  %v4197_v42 = vmax.f32 %v4127_v57, 0.0  ;;  %v4195_v19 = vmax.f32 %v4119_v34, 0.0 }
 0x3f1   : > { %v5363_v58 = vmax.f32 %v4529_v3, %v7054_v9  ;;  %v5364_v46 = vmax.f32 %v4528_v10, %v7055_v55  ;;  %v5365_v12 = vmax.f32 %v4530_v51, %v7056_v45  ;;  %v5458_v33 = vmax.f32 %v5362_v4, %v5370_v17  ;;  %v8817_v3 = vld [vmem:[%s11541_s5] sm:$0xff]   ;;  %v8819_v9 = vld [vmem:[%s11541_s5 + $0x10] sm:$0xff]  }
 0x3f2   : > { %v4565_v8 = vcombine.high %v4197_v42, %v4197_v42  ;;  %v4572_v49 = vrot.slane %v4197_v42, %v10971_v25  ;;  %v4531_v21 = vcombine.high %v4195_v19, %v4195_v19  ;;  %v4538_v40 = vrot.slane %v4195_v19, %v10971_v25  ;;  %7295 = vmatprep.subr.bf16.mxu0 %v8817_v3 }
 0x3f3   : > { %v5459_v11 = vmax.f32 %v5363_v58, %v5371_v2  ;;  %v5460_v27 = vmax.f32 %v5364_v46, %v5372_v29  ;;  %v5461_v13 = vmax.f32 %v5365_v12, %v5373_v23  ;;  %v5710_v31 = vrot.slane %v5458_v33, %v10978_v47  ;;  %7296 = vmatpush3.bf16.msra.mxu0 %v8817_v3 }
 0x3f4   : > { %v4579_v14 = vrot.slane %v4565_v8, %v10971_v25  ;;  %v4580_v59 = vcombine.high %v4572_v49, %v4572_v49  ;;  %v7065_v39 = vrot.slane %v4572_v49, 9  ;;  %v4545_v6 = vrot.slane %v4531_v21, %v10971_v25  ;;  %7297 = vmatprep.subr.bf16.mxu0 %v8818_v44 }
 0x3f5   : > { %v5714_v57 = vrot.slane %v5459_v11, %v10978_v47  ;;  %v5718_v28 = vrot.slane %v5460_v27, %v10978_v47  ;;  %v5722_v36 = vrot.slane %v5461_v13, %v10978_v47  ;;  %v4546_v63 = vcombine.high %v4538_v40, %v4538_v40 }
 0x3f6   : > { %v4581_v54 = vcombine.high %v4579_v14, %v4579_v14  ;;  %v7066_v34 = vrot.slane %v4580_v59, 9  ;;  %v7067_v41 = vrot.slane %v4579_v14, 9  ;;  %v5374_v15 = vmax.f32 %v4572_v49, %v7065_v39  ;;  %v11145_v1 = vld [vmem:[#allocation4 + $0x40] sm:$0xff] }
 0x3f7   : > { %v5870_v16 = vsel %vm5835_vm5, %v5714_v57, %v5710_v31  ;;  %v4547_v50 = vcombine.high %v4545_v6, %v4545_v6  ;;  %v7057_v7 = vrot.slane %v4538_v40, 9  ;;  %v7058_v0 = vrot.slane %v4546_v63, 9  ;;  %v11157_v26 = vld [vmem:[#allocation4 + $0x41] sm:$0xff]  ;;  %7298 = vmatpush3.bf16.msra.mxu0 %v8818_v44 }
 0x3f8   : > { %v5871_v61 = vsel %vm5837_vm7, %v5718_v28, %v5870_v16  ;;  %v7068_v52 = vrot.slane %v4581_v54, 9  ;;  %v5375_v48 = vmax.f32 %v4580_v59, %v7066_v34  ;;  %v5376_v20 = vmax.f32 %v4579_v14, %v7067_v41  ;;  %v11169_v23 = vld [vmem:[#allocation4 + $0x42] sm:$0xff]  ;;  %7299 = vmatprep.subr.bf16.mxu0 %v8819_v9 }
 0x3f9   : > { %v7059_v43 = vrot.slane %v4545_v6, 9  ;;  %v7060_v60 = vrot.slane %v4547_v50, 9  ;;  %v5366_v62 = vmax.f32 %v4538_v40, %v7057_v7  ;;  %v5367_v10 = vmax.f32 %v4546_v63, %v7058_v0 }
 0x3fa   : > { %v5377_v35 = vmax.f32 %v4581_v54, %v7068_v52  ;;  %v5872_v53 = vsel %vm5839_vm9, %v5722_v36, %v5871_v61  ;;  %v8699_v22 = vpack.i.bf16 %v11145_v1, %v11099_v5  ;;  %v8704_v55 = vpack.i.bf16 %v11157_v26, %v11094_v24  ;;  %v8820_v61 = vld [vmem:[%s11541_s5 + $0x18] sm:$0xff]  }
 0x3fb   : > { %v5368_v37 = vmax.f32 %v4545_v6, %v7059_v43  ;;  %v5369_v17 = vmax.f32 %v4547_v50, %v7060_v60  ;;  %v5462_v51 = vmax.f32 %v5366_v62, %v5374_v15  ;;  %v5463_v32 = vmax.f32 %v5367_v10, %v5375_v48  ;;  %7300 = vmatpush3.bf16.msra.mxu0 %v8819_v9 }
 0x3fc   : > { %8700 = vrot.lane.b32.xlu1 %v8699_v22, %s8911_s15  ;;  %v8709_v24 = vpack.i.bf16 %v11169_v23, %v11107_v18  ;;  %7301 = vmatprep.subr.bf16.mxu0 %v8820_v61 }
 0x3fd   : > { %v5464_v38 = vmax.f32 %v5368_v37, %v5376_v20  ;;  %v5465_v2 = vmax.f32 %v5369_v17, %v5377_v35  ;;  %v5726_v29 = vrot.slane %v5462_v51, %v10978_v47  ;;  %v5730_v5 = vrot.slane %v5463_v32, %v10978_v47 }
 0x3ff   : > { %v5734_v45 = vrot.slane %v5464_v38, %v10978_v47  ;;  %v5873_v4 = vsel %vm5841_vm11, %v5726_v29, %v5872_v53  ;;  %v5738_v42 = vrot.slane %v5465_v2, %v10978_v47  ;;  %7302 = vmatpush3.bf16.msra.mxu0 %v8820_v61  ;;  %v8821_v38 = vld [vmem:[%s11541_s5 + $0x20] ss:$0 sps:$4 sm:$0xff]  }
 0x400   : > { %v5874_v19 = vsel %vm5843_vm12, %v5730_v5, %v5873_v4  ;;  %8705 = vrot.lane.b32.xlu1 %v8704_v55, %s8913_s17  ;;  %7315 = vmatprep.subr.msk.bf16.mxu0 %vm4013_vm14, %v8821_v38 }
 0x401   : > { %v5875_v58 = vsel %vm5845_vm13, %v5734_v45, %v5874_v19 }
 0x402   : > { %v5876_v46 = vsel %vm5847_vm4, %v5738_v42, %v5875_v58 }
 0x403   : > { %5911 = vst.msk [vmem:[#allocation4 + $0x51] sm:$0xff] %vm1734_vm3, %v5876_v46  ;;  %v7285_v12 = vpop.f32.mrb[20].mxu1 }
 0x404   : > { %8710 = vrot.lane.b32.xlu1 %v8709_v24, %s8917_s9  ;;  %v4140_v33 = vadd.f32 %v7285_v12, %v10968_v30  ;;  %v4131_v8 = vpop.f32.mrb[21].mxu1 }
 0x405   : > { %v4132_v49 = vadd.f32 %v10968_v30, %v4131_v8  ;;  %v7286_v21 = vpop.f32.mrb[22].mxu1 }
 0x406   : > { %v4200_v40 = vmax.f32 %v4140_v33, 0.0  ;;  %v4143_v11 = vadd.f32 %v7286_v21, %v10968_v30  ;;  %v4134_v27 = vpop.f32.mrb[23].mxu1 }
 0x407   : > { %v4198_v13 = vmax.f32 %v4132_v49, 0.0  ;;  %v4135_v31 = vadd.f32 %v10968_v30, %v4134_v27 }
 0x408   : > { %v4616_v18 = vcombine.high %v4200_v40, %v4200_v40  ;;  %v4623_v14 = vrot.slane %v4200_v40, %v10971_v25  ;;  %v4201_v59 = vmax.f32 %v4143_v11, 0.0 }
 0x409   : > { %v4582_v39 = vcombine.high %v4198_v13, %v4198_v13  ;;  %v4589_v6 = vrot.slane %v4198_v13, %v10971_v25  ;;  %v4199_v57 = vmax.f32 %v4135_v31, 0.0 }
 0x40a   : > { %v4630_v28 = vrot.slane %v4616_v18, %v10971_v25  ;;  %v4631_v36 = vcombine.high %v4623_v14, %v4623_v14  ;;  %v7077_v63 = vrot.slane %v4623_v14, 9  ;;  %v4633_v54 = vcombine.high %v4201_v59, %v4201_v59  ;;  %v11197_v45 = vld [vmem:[#allocation4 + $0x50] sm:$0xff] }
 0x40b   : > { %v4596_v34 = vrot.slane %v4582_v39, %v10971_v25  ;;  %v4597_v41 = vcombine.high %v4589_v6, %v4589_v6  ;;  %v7069_v15 = vrot.slane %v4589_v6, 9  ;;  %v4640_v16 = vrot.slane %v4201_v59, %v10971_v25  ;;  %v11202_v46 = vld [vmem:[#allocation4 + $0x52] sm:$0xff] }
 0x40c   : > { %v4632_v30 = vcombine.high %v4630_v28, %v4630_v28  ;;  %v7078_v50 = vrot.slane %v4631_v36, 9  ;;  %v7079_v7 = vrot.slane %v4630_v28, 9  ;;  %v5386_v0 = vmax.f32 %v4623_v14, %v7077_v63  ;;  %v11213_v14 = vld [vmem:[#allocation4 + $0x51] sm:$0xff] }
 0x40d   : > { %v4598_v52 = vcombine.high %v4596_v34, %v4596_v34  ;;  %v7070_v48 = vrot.slane %v4597_v41, 9  ;;  %v7071_v20 = vrot.slane %v4596_v34, 9  ;;  %v5378_v43 = vmax.f32 %v4589_v6, %v7069_v15 }
 0x40e   : > { %v7080_v60 = vrot.slane %v4632_v30, 9  ;;  %v5387_v62 = vmax.f32 %v4631_v36, %v7078_v50  ;;  %v5388_v10 = vmax.f32 %v4630_v28, %v7079_v7  ;;  %v4647_v3 = vrot.slane %v4633_v54, %v10971_v25 }
 0x40f   : > { %v7072_v44 = vrot.slane %v4598_v52, 9  ;;  %v5379_v35 = vmax.f32 %v4597_v41, %v7070_v48  ;;  %v5380_v53 = vmax.f32 %v4596_v34, %v7071_v20  ;;  %v5466_v22 = vmax.f32 %v5378_v43, %v5386_v0 }
 0x410   : > { %v5389_v37 = vmax.f32 %v4632_v30, %v7080_v60  ;;  %v4648_v17 = vcombine.high %v4640_v16, %v4640_v16  ;;  %v4649_v51 = vcombine.high %v4647_v3, %v4647_v3  ;;  %v7081_v32 = vrot.slane %v4640_v16, 9 }
 0x411   : > { %v5381_v2 = vmax.f32 %v4598_v52, %v7072_v44  ;;  %v5467_v29 = vmax.f32 %v5379_v35, %v5387_v62  ;;  %v5468_v9 = vmax.f32 %v5380_v53, %v5388_v10  ;;  %v5742_v5 = vrot.slane %v5466_v22, %v10978_v47  ;;  %v11236_v44 = vld [vmem:[%s11540_s4] ss:$0 sm:$0xff] }
 0x412   : > { %v7083_v55 = vrot.slane %v4647_v3, 9  ;;  %v4599_v58 = vcombine.high %v4199_v57, %v4199_v57  ;;  %v7082_v24 = vrot.slane %v4648_v17, 9  ;;  %v7084_v12 = vrot.slane %v4649_v51, 9 }
 0x413   : > { %v5469_v4 = vmax.f32 %v5381_v2, %v5389_v37  ;;  %v5746_v42 = vrot.slane %v5467_v29, %v10978_v47  ;;  %v5750_v19 = vrot.slane %v5468_v9, %v10978_v47  ;;  %v5390_v33 = vmax.f32 %v4640_v16, %v7081_v32 }
 0x414   : > { %v4606_v8 = vrot.slane %v4199_v57, %v10971_v25  ;;  %v4613_v40 = vrot.slane %v4599_v58, %v10971_v25  ;;  %v8714_v11 = vpack.i.bf16 %v11197_v45, %v11145_v1  ;;  %v8729_v18 = vpack.i.bf16 %v11202_v46, %v11169_v23 }
 0x415   : > { %v5754_v49 = vrot.slane %v5469_v4, %v10978_v47  ;;  %v5877_v21 = vsel %vm5835_vm5, %v5746_v42, %v5742_v5  ;;  %v5392_v59 = vmax.f32 %v4647_v3, %v7083_v55  ;;  %v5391_v28 = vmax.f32 %v4648_v17, %v7082_v24 }
 0x416   : > { %v5878_v27 = vsel %vm5837_vm7, %v5750_v19, %v5877_v21  ;;  %v4614_v13 = vcombine.high %v4606_v8, %v4606_v8  ;;  %v7073_v31 = vrot.slane %v4606_v8, 9  ;;  %v4615_v39 = vcombine.high %v4613_v40, %v4613_v40  ;;  %8715 = vrot.lane.b32.xlu1 %v8714_v11, %s8914_s22  ;;  %8730 = vrot.lane.b32.xlu0 %v8729_v18, %s8916_s8 }
 0x417   : > { %v7075_v6 = vrot.slane %v4613_v40, 9  ;;  %v5879_v57 = vsel %vm5839_vm9, %v5754_v49, %v5878_v27  ;;  %v6368_v54 = vsel %vm4013_vm14, %v8821_v38, 0  ;;  %v5393_v34 = vmax.f32 %v4649_v51, %v7084_v12 }
 0x418   : > { %v7074_v36 = vrot.slane %v4614_v13, 9  ;;  %v5382_v63 = vmax.f32 %v4606_v8, %v7073_v31  ;;  %v7076_v41 = vrot.slane %v4615_v39, 9  ;;  %v8719_v23 = vpack.i.bf16 %v11213_v14, %v11157_v26  ;;  %7304 = vmatpush3.bf16.msra.mxu0 %v6368_v54 }
 0x419   : > { %v5384_v15 = vmax.f32 %v4613_v40, %v7075_v6  ;;  %vm11631_vm14 = vcmask 588800  }
 0x41a   : > { %v5383_v16 = vmax.f32 %v4614_v13, %v7074_v36  ;;  %v5470_v30 = vmax.f32 %v5382_v63, %v5390_v33  ;;  %v5385_v50 = vmax.f32 %v4615_v39, %v7076_v41  ;;  %8720 = vrot.lane.b32.xlu1 %v8719_v23, %s8915_s29  ;;  %8735 = vrot.lane.b32.xlu0 %v8729_v18, %s8909_s23 }
 0x41b   : > { %v5472_v7 = vmax.f32 %v5384_v15, %v5392_v59 }
 0x41c   : > { %v5471_v0 = vmax.f32 %v5383_v16, %v5391_v28  ;;  %v5758_v61 = vrot.slane %v5470_v30, %v10978_v47  ;;  %v5473_v52 = vmax.f32 %v5385_v50, %v5393_v34 }
 0x41d   : > { %v5766_v43 = vrot.slane %v5472_v7, %v10978_v47 }
 0x41e   : > { %v5762_v48 = vrot.slane %v5471_v0, %v10978_v47  ;;  %v5880_v20 = vsel %vm5841_vm11, %v5758_v61, %v5879_v57  ;;  %8725 = vrot.lane.b32.xlu1 %v8719_v23, %s8907_s19  ;;  %v5770_v26 = vrot.slane %v5473_v52, %v10978_v47 }
 0x420   : > { %v5881_v60 = vsel %vm5843_vm12, %v5762_v48, %v5880_v20 }
 0x421   : > { %v5882_v62 = vsel %vm5845_vm13, %v5766_v43, %v5881_v60 }
 0x422   : > { %v5883_v10 = vsel %vm5847_vm4, %v5770_v26, %v5882_v62 }
 0x423   : > { %5912 = vst.msk [vmem:[#allocation4 + $0x61] sm:$0xff] %vm1734_vm3, %v5883_v10  ;;  %v7289_v3 = vpop.f32.mrb[24].mxu1 }
 0x424   : > { %v4156_v35 = vadd.f32 %v11236_v44, %v7289_v3  ;;  %v4147_v53 = vpop.f32.mrb[25].mxu1 }
 0x425   : > { %v4148_v22 = vadd.f32 %v11236_v44, %v4147_v53  ;;  %v7290_v37 = vpop.f32.mrb[26].mxu1 }
 0x426   : > { %v4204_v17 = vmax.f32 %v4156_v35, 0.0  ;;  %v4159_v51 = vadd.f32 %v11236_v44, %v7290_v37  ;;  %v4150_v32 = vpop.f32.mrb[27].mxu1 }
 0x427   : > { %v4202_v38 = vmax.f32 %v4148_v22, 0.0  ;;  %v4151_v2 = vadd.f32 %v11236_v44, %v4150_v32 }
 0x428   : > { %v4684_v29 = vcombine.high %v4204_v17, %v4204_v17  ;;  %v4691_v9 = vrot.slane %v4204_v17, %v10971_v25  ;;  %v4205_v5 = vmax.f32 %v4159_v51, 0.0 }
 0x429   : > { %v4650_v55 = vcombine.high %v4202_v38, %v4202_v38  ;;  %v4657_v4 = vrot.slane %v4202_v38, %v10971_v25  ;;  %v4203_v42 = vmax.f32 %v4151_v2, 0.0 }
 0x42a   : > { %v4698_v19 = vrot.slane %v4684_v29, %v10971_v25  ;;  %v4699_v58 = vcombine.high %v4691_v9, %v4691_v9  ;;  %v7093_v24 = vrot.slane %v4691_v9, 9  ;;  %v4701_v12 = vcombine.high %v4205_v5, %v4205_v5  ;;  %v11249_v48 = vld [vmem:[#allocation4 + $0x60] sm:$0xff] }
 0x42b   : > { %v4664_v33 = vrot.slane %v4650_v55, %v10971_v25  ;;  %v4665_v8 = vcombine.high %v4657_v4, %v4657_v4  ;;  %v7085_v49 = vrot.slane %v4657_v4, 9  ;;  %v4708_v21 = vrot.slane %v4205_v5, %v10971_v25  ;;  %v5952_v2 = vld [vmem:[#allocation4 + $0x61] sm:$0xff] }
 0x42c   : > { %v4700_v40 = vcombine.high %v4698_v19, %v4698_v19  ;;  %v7094_v11 = vrot.slane %v4699_v58, 9  ;;  %v7095_v27 = vrot.slane %v4698_v19, 9  ;;  %v5402_v13 = vmax.f32 %v4691_v9, %v7093_v24 }
 0x42d   : > { %v4666_v31 = vcombine.high %v4664_v33, %v4664_v33  ;;  %v7086_v18 = vrot.slane %v4665_v8, 9  ;;  %v7087_v59 = vrot.slane %v4664_v33, 9  ;;  %v5394_v39 = vmax.f32 %v4657_v4, %v7085_v49 }
 0x42e   : > { %v7096_v6 = vrot.slane %v4700_v40, 9  ;;  %v5403_v57 = vmax.f32 %v4699_v58, %v7094_v11  ;;  %v5404_v28 = vmax.f32 %v4698_v19, %v7095_v27  ;;  %v4715_v36 = vrot.slane %v4701_v12, %v10971_v25  ;;  %v8651_v27 = vpop.permute.xlu0 %8650 }
 0x42f   : > { %v7088_v63 = vrot.slane %v4666_v31, 9  ;;  %v5395_v54 = vmax.f32 %v4665_v8, %v7086_v18  ;;  %v5396_v34 = vmax.f32 %v4664_v33, %v7087_v59  ;;  %v5474_v41 = vmax.f32 %v5394_v39, %v5402_v13 }
 0x430   : > { %v5405_v15 = vmax.f32 %v4700_v40, %v7096_v6  ;;  %v4716_v23 = vcombine.high %v4708_v21, %v4708_v21  ;;  %v4717_v16 = vcombine.high %v4715_v36, %v4715_v36  ;;  %v7097_v61 = vrot.slane %v4708_v21, 9 }
 0x431   : > { %v5397_v30 = vmax.f32 %v4666_v31, %v7088_v63  ;;  %v5475_v50 = vmax.f32 %v5395_v54, %v5403_v57  ;;  %v5476_v7 = vmax.f32 %v5396_v34, %v5404_v28  ;;  %v5774_v0 = vrot.slane %v5474_v41, %v10978_v47  ;;  %v5915_v34 = vld [vmem:[#allocation4] sm:$0xff] }
 0x432   : > { %v7099_v52 = vrot.slane %v4715_v36, 9  ;;  %v4667_v60 = vcombine.high %v4203_v42, %v4203_v42  ;;  %v7098_v62 = vrot.slane %v4716_v23, 9  ;;  %v7100_v10 = vrot.slane %v4717_v16, 9  ;;  %v8656_v63 = vpop.permute.xlu0 %8655 }
 0x433   : > { %v5477_v20 = vmax.f32 %v5397_v30, %v5405_v15  ;;  %v5778_v43 = vrot.slane %v5475_v50, %v10978_v47  ;;  %v5782_v26 = vrot.slane %v5476_v7, %v10978_v47  ;;  %v4674_v3 = vrot.slane %v4203_v42, %v10971_v25 }
 0x434   : > { %v4681_v22 = vrot.slane %v4667_v60, %v10971_v25  ;;  %v8739_v37 = vpack.i.bf16 %v11249_v48, %v11197_v45  ;;  %v5406_v51 = vmax.f32 %v4708_v21, %v7097_v61  ;;  %v5408_v29 = vmax.f32 %v4715_v36, %v7099_v52  ;;  %v5960_v21 = vld [vmem:[#allocation4 + $0x62] sm:$0xff] }
 0x435   : > { %v5786_v35 = vrot.slane %v5477_v20, %v10978_v47  ;;  %v5884_v53 = vsel %vm5835_vm5, %v5778_v43, %v5774_v0  ;;  %v4682_v32 = vcombine.high %v4674_v3, %v4674_v3  ;;  %v7089_v38 = vrot.slane %v4674_v3, 9 }
 0x436   : > { %v5885_v17 = vsel %vm5837_vm7, %v5782_v26, %v5884_v53  ;;  %v4683_v9 = vcombine.high %v4681_v22, %v4681_v22  ;;  %v7091_v5 = vrot.slane %v4681_v22, 9  ;;  %8740 = vrot.lane.b32.xlu0 %v8739_v37, %s8911_s15  ;;  %v5407_v4 = vmax.f32 %v4716_v23, %v7098_v62 }
 0x437   : > { %v5886_v55 = vsel %vm5839_vm9, %v5786_v35, %v5885_v17  ;;  %v7090_v42 = vrot.slane %v4682_v32, 9  ;;  %v5398_v19 = vmax.f32 %v4674_v3, %v7089_v38  ;;  %v5409_v58 = vmax.f32 %v4717_v16, %v7100_v10 }
 0x438   : > { %v7092_v24 = vrot.slane %v4683_v9, 9  ;;  %v5400_v12 = vmax.f32 %v4681_v22, %v7091_v5  ;;  %v8744_v33 = vpack.i.bf16 %v5952_v2, %v11213_v14  ;;  %v8749_v59 = vpack.i.bf16 %v5960_v21, %v11202_v46 }
 0x439   : > { %v5399_v8 = vmax.f32 %v4682_v32, %v7090_v42  ;;  %v5478_v49 = vmax.f32 %v5398_v19, %v5406_v51  ;;  %v8652_v46 = vunpack.i.l.bf16 %v8651_v27  ;;  %v8653_v41 = vunpack.i.h.bf16 %v8651_v27 }
 0x43a   : > { %v5401_v40 = vmax.f32 %v4683_v9, %v7092_v24  ;;  %v5480_v11 = vmax.f32 %v5400_v12, %v5408_v29  ;;  %8745 = vrot.lane.b32.xlu0 %v8744_v33, %s8913_s17  ;;  %v8657_v15 = vunpack.i.l.bf16 %v8656_v63  ;;  %v8658_v23 = vunpack.i.h.bf16 %v8656_v63 }
 0x43b   : > { %v5479_v13 = vmax.f32 %v5399_v8, %v5407_v4  ;;  %v5790_v31 = vrot.slane %v5478_v49, %v10978_v47  ;;  %v6244_v0 = vsel %vm1734_vm3, %v5915_v34, %v8652_v46  ;;  %v6245_v20 = vsel %vm1734_vm3, %v11054_v56, %v8653_v41 }
 0x43c   : > { %v5481_v18 = vmax.f32 %v5401_v40, %v5409_v58  ;;  %v5798_v14 = vrot.slane %v5480_v11, %v10978_v47  ;;  %v11275_v30 = vpop.permute.xlu0 %8660  ;;  %v6252_v43 = vsel %vm1800_vm6, %v6244_v0, %v8657_v15  ;;  %v11285_v10 = vsel %vm1800_vm6, %v6245_v20, %v8658_v23 }
 0x43d   : > { %v5794_v39 = vrot.slane %v5479_v13, %v10978_v47  ;;  %v5887_v6 = vsel %vm5841_vm11, %v5790_v31, %v5886_v55  ;;  %v8662_v3 = vunpack.i.l.bf16 %v11275_v30  ;;  %v8663_v63 = vunpack.i.h.bf16 %v11275_v30 }
 0x43e   : > { %8750 = vrot.lane.b32.xlu0 %v8749_v59, %s8917_s9  ;;  %v5802_v57 = vrot.slane %v5481_v18, %v10978_v47 }
 0x43f   : > { %v5888_v28 = vsel %vm5843_vm12, %v5794_v39, %v5887_v6  ;;  %v6260_v15 = vsel %vm1866_vm8, %v6252_v43, %v8662_v3 }
 0x440   : > { %v5889_v36 = vsel %vm5845_vm13, %v5798_v14, %v5888_v28  ;;  %v11300_v4 = vpop.permute.xlu0 %8665 }
 0x441   : > { %v5890_v54 = vsel %vm5847_vm4, %v5802_v57, %v5889_v36  ;;  %v8667_v43 = vunpack.i.l.bf16 %v11300_v4 }
 0x442   : > { %5913 = vst.msk [vmem:[#allocation4 + $0x71] sm:$0xff] %vm1734_vm3, %v5890_v54 }
 0x444   : > { %v8671_v54 = vpop.permute.xlu0 %8670 }
 0x446   : > { %v7293_v16 = vpop.f32.mrb[28].mxu1 }
 0x447   : > { %v4172_v50 = vadd.f32 %v11236_v44, %v7293_v16  ;;  %v4163_v7 = vpop.f32.mrb[29].mxu1 }
 0x448   : > { %v4164_v61 = vadd.f32 %v11236_v44, %v4163_v7  ;;  %v7294_v52 = vpop.f32.mrb[30].mxu1 }
 0x449   : > { %v4208_v26 = vmax.f32 %v4172_v50, 0.0  ;;  %v4175_v60 = vadd.f32 %v11236_v44, %v7294_v52  ;;  %v4166_v62 = vpop.f32.mrb[31].mxu1  ;;  %v11288_v35 = vld [vmem:[#allocation4 + $0x71] sm:$0xff] }
 0x44a   : > { %v11290_v53 = vld [vmem:[#allocation4 + $0x70] sm:$0xff]  ;;  %v4206_v22 = vmax.f32 %v4164_v61, 0.0  ;;  %v4167_v37 = vadd.f32 %v11236_v44, %v4166_v62  ;;  %v8754_v32 = vpack.i.bf16 %v11288_v35, %v5952_v2  ;;  %v8668_v62 = vunpack.i.h.bf16 %v11300_v4 }
 0x44b   : > { %v11293_v17 = vld [vmem:[#allocation4 + $0x72] sm:$0xff]  ;;  %v4752_v56 = vcombine.high %v4208_v26, %v4208_v26  ;;  %v4759_v51 = vrot.slane %v4208_v26, %v10971_v25  ;;  %v8764_v38 = vpack.i.bf16 %v11290_v53, %v11249_v48  ;;  %v4209_v5 = vmax.f32 %v4175_v60, 0.0 }
 0x44c   : > { %v4718_v29 = vcombine.high %v4206_v22, %v4206_v22  ;;  %v4725_v9 = vrot.slane %v4206_v22, %v10971_v25  ;;  %v4207_v55 = vmax.f32 %v4167_v37, 0.0  ;;  %8755 = vrot.lane.b32.xlu1 %v8754_v32, %s8907_s19  ;;  %v8759_v2 = vpack.i.bf16 %v11293_v17, %v5960_v21  ;;  %s8845_s19 = sshll.u32 %s8919_s20, 4  ;;  %s8846_s19 = int_to_ptr.vmem [resolvable:$false] %s8845_s19 }
 0x44d   : > { %v4766_v42 = vrot.slane %v4752_v56, %v10971_v25  ;;  %v4767_v44 = vcombine.high %v4759_v51, %v4759_v51  ;;  %v7109_v19 = vrot.slane %v4759_v51, 9  ;;  %8765 = vrot.lane.b32.xlu0 %v8764_v38, %s8914_s22  ;;  %v4769_v33 = vcombine.high %v4209_v5, %v4209_v5 }
 0x44e   : > { %v4732_v58 = vrot.slane %v4718_v29, %v10971_v25  ;;  %v4733_v24 = vcombine.high %v4725_v9, %v4725_v9  ;;  %v7101_v12 = vrot.slane %v4725_v9, 9  ;;  %v4776_v14 = vrot.slane %v4209_v5, %v10971_v25 }
 0x44f   : > { %v4768_v8 = vcombine.high %v4766_v42, %v4766_v42  ;;  %v7110_v49 = vrot.slane %v4767_v44, 9  ;;  %v7111_v40 = vrot.slane %v4766_v42, 9  ;;  %v5418_v11 = vmax.f32 %v4759_v51, %v7109_v19 }
 0x450   : > { %v4734_v27 = vcombine.high %v4732_v58, %v4732_v58  ;;  %v7102_v13 = vrot.slane %v4733_v24, 9  ;;  %v7103_v31 = vrot.slane %v4732_v58, 9  ;;  %v5410_v18 = vmax.f32 %v4725_v9, %v7101_v12  ;;  %8760 = vrot.lane.b32.xlu1 %v8759_v2, %s8909_s23  ;;  %s8847_s23 = scalar_lea.vmem %s8846_s19, 512 }
 0x451   : > { %v7112_v59 = vrot.slane %v4768_v8, 9  ;;  %v5419_v39 = vmax.f32 %v4767_v44, %v7110_v49  ;;  %v5420_v6 = vmax.f32 %v4766_v42, %v7111_v40  ;;  %8770 = vrot.lane.b32.xlu0 %v8754_v32, %s8915_s29  ;;  %v4783_v34 = vrot.slane %v4769_v33, %v10971_v25 }
 0x452   : > { %v7104_v21 = vrot.slane %v4734_v27, 9  ;;  %v5411_v57 = vmax.f32 %v4733_v24, %v7102_v13  ;;  %v5412_v28 = vmax.f32 %v4732_v58, %v7103_v31  ;;  %v5482_v36 = vmax.f32 %v5410_v18, %v5418_v11 }
 0x453   : > { %v5421_v46 = vmax.f32 %v4768_v8, %v7112_v59  ;;  %v4784_v41 = vcombine.high %v4776_v14, %v4776_v14  ;;  %v4785_v0 = vcombine.high %v4783_v34, %v4783_v34  ;;  %v7113_v61 = vrot.slane %v4776_v14, 9 }
 0x454   : > { %v5413_v23 = vmax.f32 %v4734_v27, %v7104_v21  ;;  %v5483_v16 = vmax.f32 %v5411_v57, %v5419_v39  ;;  %v5484_v50 = vmax.f32 %v5412_v28, %v5420_v6  ;;  %v5806_v7 = vrot.slane %v5482_v36, %v10978_v47 }
 0x455   : > { %v7115_v52 = vrot.slane %v4783_v34, 9  ;;  %8800 = vrot.lane.b32.xlu0 %v8759_v2, %s8916_s8  ;;  %v4735_v60 = vcombine.high %v4207_v55, %v4207_v55  ;;  %v7114_v3 = vrot.slane %v4784_v41, 9  ;;  %v4742_v22 = vrot.slane %v4207_v55, %v10971_v25  ;;  %v8686_v37 = vpop.permute.xlu0 %8685 }
 0x456   : > { %v5485_v20 = vmax.f32 %v5413_v23, %v5421_v46  ;;  %v5810_v30 = vrot.slane %v5483_v16, %v10978_v47  ;;  %v5814_v26 = vrot.slane %v5484_v50, %v10978_v47  ;;  %v7116_v32 = vrot.slane %v4785_v0, 9 }
 0x457   : > { %v4749_v38 = vrot.slane %v4735_v60, %v10971_v25  ;;  %v5422_v9 = vmax.f32 %v4776_v14, %v7113_v61  ;;  %v4750_v5 = vcombine.high %v4742_v22, %v4742_v22  ;;  %v7105_v42 = vrot.slane %v4742_v22, 9 }
 0x458   : > { %v5818_v56 = vrot.slane %v5485_v20, %v10978_v47  ;;  %v5891_v51 = vsel %vm5835_vm5, %v5810_v30, %v5806_v7  ;;  %v5424_v44 = vmax.f32 %v4783_v34, %v7115_v52  ;;  %v8673_v58 = vunpack.i.h.bf16 %v8671_v54 }
 0x459   : > { %v5892_v29 = vsel %vm5837_vm7, %v5814_v26, %v5891_v51  ;;  %v4751_v19 = vcombine.high %v4749_v38, %v4749_v38  ;;  %v7107_v2 = vrot.slane %v4749_v38, 9  ;;  %v5423_v55 = vmax.f32 %v4784_v41, %v7114_v3  ;;  %v8691_v33 = vpop.permute.xlu0 %8690 }
 0x45a   : > { %v5893_v4 = vsel %vm5839_vm9, %v5818_v56, %v5892_v29  ;;  %v7106_v24 = vrot.slane %v4750_v5, 9  ;;  %v5414_v12 = vmax.f32 %v4742_v22, %v7105_v42  ;;  %v8672_v8 = vunpack.i.l.bf16 %v8671_v54  ;;  %v8676_v56 = vpop.permute.xlu1 %8675 }
 0x45b   : > { %v5425_v49 = vmax.f32 %v4785_v0, %v7116_v32  ;;  %v7108_v40 = vrot.slane %v4751_v19, 9  ;;  %v5416_v11 = vmax.f32 %v4749_v38, %v7107_v2  ;;  %v6261_v27 = vsel %vm1866_vm8, %v11285_v10, %v8663_v63 }
 0x45c   : > { %v5415_v13 = vmax.f32 %v4750_v5, %v7106_v24  ;;  %v5486_v31 = vmax.f32 %v5414_v12, %v5422_v9  ;;  %v8688_v18 = vunpack.i.h.bf16 %v8686_v37  ;;  %v6268_v59 = vsel %vm1932_vm10, %v6260_v15, %v8667_v43  ;;  %v5971_v5 = vld [vmem:[#allocation4 + $0x90] sm:$0xff] }
 0x45d   : > { %v5417_v39 = vmax.f32 %v4751_v19, %v7108_v40  ;;  %v5488_v6 = vmax.f32 %v5416_v11, %v5424_v44  ;;  %v8687_v14 = vunpack.i.l.bf16 %v8686_v37  ;;  %v6269_v21 = vsel %vm1932_vm10, %v6261_v27, %v8668_v62  ;;  %v8696_v54 = vpop.permute.xlu0 %8695  ;;  %v5979_v19 = vld [vmem:[#allocation4 + $0x91] sm:$0xff]  ;;  %v5917_v40 = vld [vmem:[#allocation4 + $0x20] sm:$0xff] }
 0x45e   : > { %v5487_v57 = vmax.f32 %v5415_v13, %v5423_v55  ;;  %v5822_v28 = vrot.slane %v5486_v31, %v10978_v47  ;;  %v8693_v36 = vunpack.i.h.bf16 %v8691_v33  ;;  %v6276_v46 = vsel %vm3773_vm15, %v6268_v59, %v8672_v8  ;;  %v8681_v29 = vpop.permute.xlu1 %8680  ;;  %v8840_v31 = vld [vmem:[#allocation4 + $0x30] sm:$0xff] }
 0x45f   : > { %v6277_v34 = vsel %vm3773_vm15, %v6269_v21, %v8673_v58  ;;  %v5489_v10 = vmax.f32 %v5417_v39, %v5425_v49  ;;  %v8692_v63 = vunpack.i.l.bf16 %v8691_v33  ;;  %v8698_v16 = vunpack.i.h.bf16 %v8696_v54  ;;  %v5987_v58 = vld [vmem:[#allocation4 + $0x92] sm:$0xff] }
 0x460   : > { %v5826_v41 = vrot.slane %v5487_v57, %v10978_v47  ;;  %v5894_v15 = vsel %vm5841_vm11, %v5822_v28, %v5893_v4  ;;  %v6285_v23 = vsel %vm3806_vm0, %v6277_v34, %v8688_v18  ;;  %v5830_v50 = vrot.slane %v5488_v6, %v10978_v47 }
 0x461   : > { %v6284_v7 = vsel %vm3806_vm0, %v6276_v46, %v8687_v14  ;;  %v6293_v0 = vsel %vm3839_vm1, %v6285_v23, %v8693_v36  ;;  %v8697_v61 = vunpack.i.l.bf16 %v8696_v54  ;;  %v5834_v52 = vrot.slane %v5489_v10, %v10978_v47 }
 0x462   : > { %v5895_v20 = vsel %vm5843_vm12, %v5826_v41, %v5894_v15  ;;  %v6292_v30 = vsel %vm3839_vm1, %v6284_v7, %v8692_v63  ;;  %v6301_v26 = vsel %vm3872_vm2, %v6293_v0, %v8698_v16  ;;  %v8678_v24 = vunpack.i.h.bf16 %v8676_v56 }
 0x463   : > { %v5896_v60 = vsel %vm5845_vm13, %v5830_v50, %v5895_v20  ;;  %v6300_v62 = vsel %vm3872_vm2, %v6292_v30, %v8697_v61  ;;  %v8677_v12 = vunpack.i.l.bf16 %v8676_v56  ;;  %v8682_v33 = vunpack.i.l.bf16 %v8681_v29 }
 0x464   : > { %v5897_v43 = vsel %vm5847_vm4, %v5834_v52, %v5896_v60  ;;  %v6308_v3 = vpack.c.bf16 %v6301_v26, %v6300_v62  ;;  %v6247_v18 = vsel %vm1734_vm3, %v8840_v31, %v8678_v24  ;;  %vm11632_vm4 = vmmov %vm11631_vm14 }
 0x465   : > { %5914 = vst.msk [vmem:[#allocation4 + $0x81] sm:$0xff] %vm1734_vm3, %v5897_v43  ;;  %v6246_v59 = vsel %vm1734_vm3, %v5917_v40, %v8677_v12  ;;  %vm11633_vm11 = vmmov %vm11632_vm4 }
 0x466   : > { %7305 = vmatprep.mubr.msk.bf16.mxu0 %vm11631_vm14, %v6308_v3  ;;  %v6254_v14 = vsel %vm1800_vm6, %v6246_v59, %v8682_v33 }
 0x46c   : > { %v5946_v22 = vld [vmem:[#allocation4 + $0x80] sm:$0xff] }
 0x46d   : > { %v8774_v37 = vpack.i.bf16 %v5946_v22, %v11290_v53  ;;  %v5954_v51 = vld [vmem:[#allocation4 + $0x81] sm:$0xff]  ;;  %v8789_v44 = vpack.i.bf16 %v5971_v5, %v5946_v22 }
 0x46e   : > { %v8779_v32 = vpack.i.bf16 %v5954_v51, %v11288_v35  ;;  %v5962_v38 = vld [vmem:[#allocation4 + $0x82] sm:$0xff]  ;;  %v8701_v42 = vpop.permute.xlu1 %8700  ;;  %v8794_v2 = vpack.i.bf16 %v5979_v19, %v5954_v51 }
 0x46f   : > { %8775 = vrot.lane.b32.xlu1 %v8774_v37, %s8911_s15  ;;  %v8784_v9 = vpack.i.bf16 %v5962_v38, %v11293_v17  ;;  %v8804_v35 = vpack.i.bf16 %v5987_v58, %v5962_v38  ;;  %v8683_v17 = vunpack.i.h.bf16 %v8681_v29  ;;  %v8703_v8 = vunpack.i.h.bf16 %v8701_v42  ;;  %s269_s15 = sand.u32 1, %s8895_s25  }
 0x470   : > { %v8702_v49 = vunpack.i.l.bf16 %v8701_v42 }
 0x471   : > { %v6255_v21 = vsel %vm1800_vm6, %v6247_v18, %v8683_v17 }
 0x472   : > { %v8706_v4 = vpop.permute.xlu1 %8705  ;;  %v6262_v36 = vsel %vm1866_vm8, %v6254_v14, %v8702_v49  ;;  %v6263_v54 = vsel %vm1866_vm8, %v6255_v21, %v8703_v8 }
 0x473   : > { %8780 = vrot.lane.b32.xlu1 %v8779_v32, %s8913_s17  ;;  %v8708_v11 = vunpack.i.h.bf16 %v8706_v4  ;;  %v8707_v27 = vunpack.i.l.bf16 %v8706_v4  ;;  %s6944_s17 = sshll.u32 %s269_s15, 4 }
 0x475   : > { %v6270_v34 = vsel %vm1932_vm10, %v6262_v36, %v8707_v27  ;;  %v6271_v10 = vsel %vm1932_vm10, %v6263_v54, %v8708_v11 }
 0x476   : > { %v8711_v55 = vpop.permute.xlu1 %8710 }
 0x477   : > { %8785 = vrot.lane.b32.xlu1 %v8784_v9, %s8917_s9  ;;  %v8713_v39 = vunpack.i.h.bf16 %v8711_v55  ;;  %v8712_v6 = vunpack.i.l.bf16 %v8711_v55 }
 0x479   : > { %v6278_v41 = vsel %vm3773_vm15, %v6270_v34, %v8712_v6  ;;  %v6279_v15 = vsel %vm3773_vm15, %v6271_v10, %v8713_v39 }
 0x47b   : > { %8790 = vrot.lane.b32.xlu1 %v8789_v44, %s8914_s22  ;;  %s11441_s22 = scalar_lea.vmem [#allocation5], %s6944_s17 }
 0x47c   : > { %s6878_s9 = sshll.u32 %s11441_s22, 4  ;;  %s11485_s9 = int_to_ptr.vmem [resolvable:$true] %s6878_s9 }
 0x47d   : > { %s8841_s16 = scalar_lea.vmem %s11485_s9, 256  ;;  %p8848_p0 = scmp.lt.s32.totalorder %s11485_s9, %s8846_s19 }
 0x47e   : > { %p8842_p11 = scmp.ne.s32.totalorder %s11485_s9, %s8841_s16  ;;  %p8849_p1 = scmp.lt.s32.totalorder %s8847_s23, %s8841_s16 }
 0x47f   : > { %8795 = vrot.lane.b32.xlu1 %v8794_v2, %s8915_s29  ;;  %s7165_s29 = sshll.u32 %s8981_s28, 8  ;;  %s11492_s28 = scalar_lea.sflag [#allocation6], %s269_s15 }
 0x480   : > { %s11483_s14 = scalar_lea.hbm %s11543_s7, %s7165_s29  ;;  %p8843_p12 = pnand %p8842_p11, %p8998_p5 }
 0x481   : > { %p8850_p2 = por %p8849_p1, %p8848_p0 }
 0x482   : > { %p8844_p13 = pneg %p8843_p12 }
 0x483   : > { %8805 = vrot.lane.b32.xlu1 %v8804_v35, %s8916_s8 }
 0x484   : > { %p8851_p3 = pnand %p8850_p2, %p8844_p13 }
 0x488   : > { %v8716_v13 = vpop.permute.xlu1 %8715  ;;  %v8731_v46 = vpop.permute.xlu0 %8730 }
 0x489   : > { %v8718_v57 = vunpack.i.h.bf16 %v8716_v13  ;;  %v8717_v28 = vunpack.i.l.bf16 %v8716_v13  ;;  %v8733_v0 = vunpack.i.h.bf16 %v8731_v46  ;;  %v8732_v61 = vunpack.i.l.bf16 %v8731_v46 }
 0x48b   : > { %v6286_v50 = vsel %vm3806_vm0, %v6278_v41, %v8717_v28  ;;  %v6287_v7 = vsel %vm3806_vm0, %v6279_v15, %v8718_v57 }
 0x48c   : > { %v8721_v63 = vpop.permute.xlu1 %8720  ;;  %v8736_v62 = vpop.permute.xlu0 %8735 }
 0x48d   : > { %v8723_v23 = vunpack.i.h.bf16 %v8721_v63  ;;  %v8722_v16 = vunpack.i.l.bf16 %v8721_v63  ;;  %v8738_v42 = vunpack.i.h.bf16 %v8736_v62  ;;  %v8737_v44 = vunpack.i.l.bf16 %v8736_v62 }
 0x48f   : > { %v6294_v52 = vsel %vm3839_vm1, %v6286_v50, %v8722_v16  ;;  %v6295_v20 = vsel %vm3839_vm1, %v6287_v7, %v8723_v23 }
 0x490   : > { %v6302_v30 = vsel %vm3872_vm2, %v6294_v52, %v8732_v61  ;;  %v6303_v26 = vsel %vm3872_vm2, %v6295_v20, %v8733_v0  ;;  %v8726_v22 = vpop.permute.xlu1 %8725 }
 0x491   : > { %v6309_v60 = vpack.c.bf16 %v6303_v26, %v6302_v30  ;;  %v8728_v56 = vunpack.i.h.bf16 %v8726_v22  ;;  %v8727_v51 = vunpack.i.l.bf16 %v8726_v22 }
 0x493   : > { %7306 = vmatmul.mubr.msk.bf16.vlgmr.msra.gmra.mrb[32].mxu0 %vm11632_vm4, %v6309_v60  ;;  %v6249_v38 = vsel %vm1734_vm3, %v11197_v45, %v8728_v56  ;;  %v6248_v29 = vsel %vm1734_vm3, %v11145_v1, %v8727_v51 }
 0x494   : > { %v6256_v55 = vsel %vm1800_vm6, %v6248_v29, %v8737_v44  ;;  %v6257_v24 = vsel %vm1800_vm6, %v6249_v38, %v8738_v42 }
 0x4a8   : > { %v8741_v43 = vpop.permute.xlu0 %8740 }
 0x4a9   : > { %v8743_v9 = vunpack.i.h.bf16 %v8741_v43  ;;  %v8742_v5 = vunpack.i.l.bf16 %v8741_v43 }
 0x4ab   : > { %v6264_v45 = vsel %vm1866_vm8, %v6256_v55, %v8742_v5  ;;  %v6265_v33 = vsel %vm1866_vm8, %v6257_v24, %v8743_v9  ;;  %v11414_v24 = vld [vmem:[%s11542_s6] ss:$0 sm:$0xff] }
 0x4ac   : > { %v8746_v3 = vpop.permute.xlu0 %8745 }
 0x4ad   : > { %v8748_v19 = vunpack.i.h.bf16 %v8746_v3  ;;  %v8747_v2 = vunpack.i.l.bf16 %v8746_v3 }
 0x4af   : > { %v6272_v49 = vsel %vm1932_vm10, %v6264_v45, %v8747_v2  ;;  %v6273_v40 = vsel %vm1932_vm10, %v6265_v33, %v8748_v19 }
 0x4b0   : > { %v8751_v37 = vpop.permute.xlu0 %8750 }
 0x4b1   : > { %v8753_v4 = vunpack.i.h.bf16 %v8751_v37  ;;  %v8752_v58 = vunpack.i.l.bf16 %v8751_v37 }
 0x4b3   : > { %v6280_v11 = vsel %vm3773_vm15, %v6272_v49, %v8752_v58  ;;  %v6281_v27 = vsel %vm3773_vm15, %v6273_v40, %v8753_v4 }
 0x4be   : > { %v8756_v36 = vpop.permute.xlu1 %8755 }
 0x4bf   : > { %v8766_v32 = vpop.permute.xlu0 %8765  ;;  %v8758_v63 = vunpack.i.h.bf16 %v8756_v36  ;;  %v8757_v41 = vunpack.i.l.bf16 %v8756_v36 }
 0x4c0   : > { %v8768_v12 = vunpack.i.h.bf16 %v8766_v32  ;;  %v8767_v17 = vunpack.i.l.bf16 %v8766_v32 }
 0x4c1   : > { %v6251_v52 = vsel %vm1734_vm3, %v11290_v53, %v8758_v63  ;;  %v6250_v20 = vsel %vm1734_vm3, %v11249_v48, %v8757_v41  ;;  %vm11634_vm3 = vmmov %vm11632_vm4 }
 0x4c2   : > { %v6288_v31 = vsel %vm3806_vm0, %v6280_v11, %v8767_v17  ;;  %v6289_v18 = vsel %vm3806_vm0, %v6281_v27, %v8768_v12  ;;  %v8761_v54 = vpop.permute.xlu1 %8760 }
 0x4c3   : > { %v8771_v35 = vpop.permute.xlu0 %8770  ;;  %v8763_v23 = vunpack.i.h.bf16 %v8761_v54  ;;  %v8762_v16 = vunpack.i.l.bf16 %v8761_v54 }
 0x4c4   : > { %v8773_v1 = vunpack.i.h.bf16 %v8771_v35  ;;  %v8772_v8 = vunpack.i.l.bf16 %v8771_v35 }
 0x4c5   : > { %v6258_v62 = vsel %vm1800_vm6, %v6250_v20, %v8762_v16  ;;  %v6259_v43 = vsel %vm1800_vm6, %v6251_v52, %v8763_v23  ;;  %vm6859_vm6 = vcmask 125952  }
 0x4c6   : > { %v6296_v6 = vsel %vm3839_vm1, %v6288_v31, %v8772_v8  ;;  %v6297_v14 = vsel %vm3839_vm1, %v6289_v18, %v8773_v1 }
 0x4c7   : > { %v8801_v13 = vpop.permute.xlu0 %8800 }
 0x4c8   : > { %v8803_v59 = vunpack.i.h.bf16 %v8801_v13  ;;  %v8802_v39 = vunpack.i.l.bf16 %v8801_v13 }
 0x4ca   : > { %v6304_v21 = vsel %vm3872_vm2, %v6296_v6, %v8802_v39  ;;  %v6305_v57 = vsel %vm3872_vm2, %v6297_v14, %v8803_v59 }
 0x4cb   : > { %v6310_v28 = vpack.c.bf16 %v6305_v57, %v6304_v21 }
 0x4cd   : > { %7309 = vmatprep.mubr.msk.bf16.mxu0 %vm11633_vm11, %v6310_v28 }
 0x4e1   : > { %v8776_v46 = vpop.permute.xlu1 %8775 }
 0x4e2   : > { %v8778_v50 = vunpack.i.h.bf16 %v8776_v46  ;;  %v8777_v7 = vunpack.i.l.bf16 %v8776_v46 }
 0x4e4   : > { %v6266_v37 = vsel %vm1866_vm8, %v6258_v62, %v8777_v7  ;;  %v6267_v56 = vsel %vm1866_vm8, %v6259_v43, %v8778_v50 }
 0x4e5   : > { %v8781_v34 = vpop.permute.xlu1 %8780 }
 0x4e6   : > { %v8783_v0 = vunpack.i.h.bf16 %v8781_v34  ;;  %v8782_v61 = vunpack.i.l.bf16 %v8781_v34 }
 0x4e8   : > { %v6274_v53 = vsel %vm1932_vm10, %v6266_v37, %v8782_v61  ;;  %v6275_v38 = vsel %vm1932_vm10, %v6267_v56, %v8783_v0 }
 0x4e9   : > { %v8786_v10 = vpop.permute.xlu1 %8785 }
 0x4ea   : > { %v8788_v30 = vunpack.i.h.bf16 %v8786_v10  ;;  %v8787_v26 = vunpack.i.l.bf16 %v8786_v10 }
 0x4ec   : > { %v6282_v48 = vsel %vm3773_vm15, %v6274_v53, %v8787_v26  ;;  %v6283_v29 = vsel %vm3773_vm15, %v6275_v38, %v8788_v30 }
 0x4ed   : > { %v8791_v15 = vpop.permute.xlu1 %8790 }
 0x4ee   : > { %v8793_v3 = vunpack.i.h.bf16 %v8791_v15  ;;  %v8792_v22 = vunpack.i.l.bf16 %v8791_v15 }
 0x4f0   : > { %v6290_v5 = vsel %vm3806_vm0, %v6282_v48, %v8792_v22  ;;  %v6291_v42 = vsel %vm3806_vm0, %v6283_v29, %v8793_v3 }
 0x4f1   : > { %v8796_v60 = vpop.permute.xlu1 %8795 }
 0x4f2   : > { %v8798_v51 = vunpack.i.h.bf16 %v8796_v60  ;;  %v8797_v32 = vunpack.i.l.bf16 %v8796_v60 }
 0x4f4   : > { %v6298_v2 = vsel %vm3839_vm1, %v6290_v5, %v8797_v32  ;;  %v6299_v4 = vsel %vm3839_vm1, %v6291_v42, %v8798_v51 }
 0x4f5   : > { %v8806_v9 = vpop.permute.xlu1 %8805 }
 0x4f6   : > { %v8808_v44 = vunpack.i.h.bf16 %v8806_v9  ;;  %v8807_v19 = vunpack.i.l.bf16 %v8806_v9 }
 0x4f8   : > { %v6306_v58 = vsel %vm3872_vm2, %v6298_v2, %v8807_v19  ;;  %v6307_v35 = vsel %vm3872_vm2, %v6299_v4, %v8808_v44 }
 0x4f9   : > { %v6311_v55 = vpack.c.bf16 %v6307_v35, %v6306_v58 }
 0x4fb   : > { %7310 = vmatmul.mubr.msk.bf16.gmra.mrb[36].mxu0 %vm11634_vm3, %v6311_v55 }
 0x566   : > { %v7307_v12 = vpop.f32.mrb[32].mxu0 }
 0x567   : > { %v6413_v17 = vadd.f32 %v7307_v12, %v11414_v24  ;;  %v6404_v45 = vpop.f32.mrb[33].mxu0 }
 0x568   : > { %v6405_v33 = vadd.f32 %v11414_v24, %v6404_v45  ;;  %v7308_v1 = vpop.f32.mrb[34].mxu0 }
 0x569   : > { %v6437_v8 = vmax.f32 %v6413_v17, 0.0  ;;  %v6416_v49 = vadd.f32 %v7308_v1, %v11414_v24  ;;  %v6407_v40 = vpop.f32.mrb[35].mxu0 }
 0x56a   : > { %v6435_v11 = vmax.f32 %v6405_v33, 0.0  ;;  %v6408_v39 = vadd.f32 %v11414_v24, %v6407_v40 }
 0x56b   : > { %v6485_v27 = vcombine.high %v6437_v8, %v6437_v8  ;;  %v6492_v13 = vrot.slane %v6437_v8, %v10971_v25  ;;  %v6438_v31 = vmax.f32 %v6416_v49, 0.0 }
 0x56c   : > { %v6451_v18 = vcombine.high %v6435_v11, %v6435_v11  ;;  %v6458_v59 = vrot.slane %v6435_v11, %v10971_v25  ;;  %v6436_v23 = vmax.f32 %v6408_v39, 0.0 }
 0x56d   : > { %v6499_v6 = vrot.slane %v6485_v27, %v10971_v25  ;;  %v6500_v14 = vcombine.high %v6492_v13, %v6492_v13  ;;  %v7135_v21 = vrot.slane %v6492_v13, 9  ;;  %v6502_v57 = vcombine.high %v6438_v31, %v6438_v31 }
 0x56e   : > { %v6465_v28 = vrot.slane %v6451_v18, %v10971_v25  ;;  %v6466_v36 = vcombine.high %v6458_v59, %v6458_v59  ;;  %v7127_v54 = vrot.slane %v6458_v59, 9  ;;  %v6509_v46 = vrot.slane %v6438_v31, %v10971_v25 }
 0x56f   : > { %v6501_v34 = vcombine.high %v6499_v6, %v6499_v6  ;;  %v7136_v10 = vrot.slane %v6500_v14, 9  ;;  %v7137_v63 = vrot.slane %v6499_v6, 9  ;;  %v6723_v16 = vmax.f32 %v6492_v13, %v7135_v21 }
 0x570   : > { %v6467_v41 = vcombine.high %v6465_v28, %v6465_v28  ;;  %v7128_v15 = vrot.slane %v6466_v36, 9  ;;  %v7129_v50 = vrot.slane %v6465_v28, 9  ;;  %v6715_v7 = vmax.f32 %v6458_v59, %v7127_v54 }
 0x571   : > { %v6516_v0 = vrot.slane %v6502_v57, %v10971_v25  ;;  %v7138_v61 = vrot.slane %v6501_v34, 9  ;;  %v6724_v52 = vmax.f32 %v6500_v14, %v7136_v10  ;;  %v6725_v20 = vmax.f32 %v6499_v6, %v7137_v63 }
 0x572   : > { %v6517_v30 = vcombine.high %v6509_v46, %v6509_v46  ;;  %v7130_v26 = vrot.slane %v6467_v41, 9  ;;  %v7139_v62 = vrot.slane %v6509_v46, 9  ;;  %v6716_v3 = vmax.f32 %v6466_v36, %v7128_v15 }
 0x573   : > { %v6518_v60 = vcombine.high %v6516_v0, %v6516_v0  ;;  %v7141_v43 = vrot.slane %v6516_v0, 9  ;;  %v6468_v37 = vcombine.high %v6436_v23, %v6436_v23  ;;  %v6475_v56 = vrot.slane %v6436_v23, %v10971_v25 }
 0x574   : > { %v7140_v22 = vrot.slane %v6517_v30, 9  ;;  %v6717_v51 = vmax.f32 %v6465_v28, %v7129_v50  ;;  %v6727_v53 = vmax.f32 %v6509_v46, %v7139_v62  ;;  %v6726_v42 = vmax.f32 %v6501_v34, %v7138_v61 }
 0x575   : > { %v7142_v32 = vrot.slane %v6518_v60, 9  ;;  %v6729_v38 = vmax.f32 %v6516_v0, %v7141_v43  ;;  %v6482_v29 = vrot.slane %v6468_v37, %v10971_v25  ;;  %v6483_v9 = vcombine.high %v6475_v56, %v6475_v56 }
 0x576   : > { %v6728_v48 = vmax.f32 %v6517_v30, %v7140_v22  ;;  %v7131_v5 = vrot.slane %v6475_v56, 9  ;;  %v6751_v19 = vmax.f32 %v6723_v16, %v6727_v53  ;;  %v6718_v11 = vmax.f32 %v6467_v41, %v7130_v26 }
 0x577   : > { %v6730_v44 = vmax.f32 %v6518_v60, %v7142_v32  ;;  %v6753_v2 = vmax.f32 %v6725_v20, %v6729_v38  ;;  %v6484_v58 = vcombine.high %v6482_v29, %v6482_v29  ;;  %v7132_v35 = vrot.slane %v6483_v9, 9 }
 0x578   : > { %v6752_v4 = vmax.f32 %v6724_v52, %v6728_v48  ;;  %v7133_v55 = vrot.slane %v6482_v29, 9  ;;  %v6798_v17 = vrot.slane %v6751_v19, %v10978_v47  ;;  %v6719_v33 = vmax.f32 %v6475_v56, %v7131_v5 }
 0x579   : > { %v6754_v12 = vmax.f32 %v6726_v42, %v6730_v44  ;;  %v6806_v45 = vrot.slane %v6753_v2, %v10978_v47  ;;  %v7134_v8 = vrot.slane %v6484_v58, 9  ;;  %v6720_v49 = vmax.f32 %v6483_v9, %v7132_v35 }
 0x57a   : > { %v6802_v1 = vrot.slane %v6752_v4, %v10978_v47  ;;  %v6721_v40 = vmax.f32 %v6482_v29, %v7133_v55  ;;  %v6747_v13 = vmax.f32 %v6715_v7, %v6719_v33 }
 0x57b   : > { %v6810_v27 = vrot.slane %v6754_v12, %v10978_v47  ;;  %v6722_v18 = vmax.f32 %v6484_v58, %v7134_v8  ;;  %v6748_v59 = vmax.f32 %v6716_v3, %v6720_v49 }
 0x57c   : > { %v6846_v31 = vsel %vm5835_vm5, %v6802_v1, %v6798_v17  ;;  %v6749_v39 = vmax.f32 %v6717_v51, %v6721_v40  ;;  %v6782_v14 = vrot.slane %v6747_v13, %v10978_v47 }
 0x57d   : > { %v6847_v6 = vsel %vm5837_vm7, %v6806_v45, %v6846_v31  ;;  %v6750_v57 = vmax.f32 %v6718_v11, %v6722_v18  ;;  %v6786_v28 = vrot.slane %v6748_v59, %v10978_v47 }
 0x57e   : > { %v6848_v21 = vsel %vm5839_vm9, %v6810_v27, %v6847_v6  ;;  %v6790_v36 = vrot.slane %v6749_v39, %v10978_v47 }
 0x57f   : > { %6861 = vst.msk [vmem:[%s11441_s22 + $0x4] sm:$0xf] %vm6859_vm6, %v6848_v21  ;;  %v6794_v54 = vrot.slane %v6750_v57, %v10978_v47  ;;  %v6843_v46 = vsel %vm5835_vm5, %v6786_v28, %v6782_v14 }
 0x580   : > { %v6844_v34 = vsel %vm5837_vm7, %v6790_v36, %v6843_v46 }
 0x581   : > { %v6845_v10 = vsel %vm5839_vm9, %v6794_v54, %v6844_v34 }
 0x582   : > { %6860 = vst.msk [vmem:[%s11441_s22] sm:$0xf] %vm6859_vm6, %v6845_v10 }
 0x5ce   : > { %v7311_v63 = vpop.f32.mrb[36].mxu0 }
 0x5cf   : > { %v6429_v41 = vadd.f32 %v7311_v63, %v11414_v24  ;;  %v6420_v15 = vpop.f32.mrb[37].mxu0 }
 0x5d0   : > { %v6421_v23 = vadd.f32 %v11414_v24, %v6420_v15  ;;  %v7312_v16 = vpop.f32.mrb[38].mxu0 }
 0x5d1   : > { %v6441_v50 = vmax.f32 %v6429_v41, 0.0  ;;  %v6432_v7 = vadd.f32 %v7312_v16, %v11414_v24  ;;  %v6423_v0 = vpop.f32.mrb[39].mxu0 }
 0x5d2   : > { %v6439_v61 = vmax.f32 %v6421_v23, 0.0  ;;  %v6424_v62 = vadd.f32 %v11414_v24, %v6423_v0 }
 0x5d3   : > { %v6553_v52 = vcombine.high %v6441_v50, %v6441_v50  ;;  %v6560_v20 = vrot.slane %v6441_v50, %v10971_v25  ;;  %v6442_v30 = vmax.f32 %v6432_v7, 0.0 }
 0x5d4   : > { %v6519_v26 = vcombine.high %v6439_v61, %v6439_v61  ;;  %v6526_v60 = vrot.slane %v6439_v61, %v10971_v25  ;;  %v6440_v42 = vmax.f32 %v6424_v62, 0.0 }
 0x5d5   : > { %v6567_v43 = vrot.slane %v6553_v52, %v10971_v25  ;;  %v6568_v3 = vcombine.high %v6560_v20, %v6560_v20  ;;  %v7151_v22 = vrot.slane %v6560_v20, 9  ;;  %v6570_v37 = vcombine.high %v6442_v30, %v6442_v30 }
 0x5d6   : > { %v6533_v56 = vrot.slane %v6519_v26, %v10971_v25  ;;  %v6534_v51 = vcombine.high %v6526_v60, %v6526_v60  ;;  %v7143_v32 = vrot.slane %v6526_v60, 9  ;;  %v6577_v53 = vrot.slane %v6442_v30, %v10971_v25 }
 0x5d7   : > { %v6569_v38 = vcombine.high %v6567_v43, %v6567_v43  ;;  %v7152_v48 = vrot.slane %v6568_v3, 9  ;;  %v7153_v29 = vrot.slane %v6567_v43, 9  ;;  %v6739_v44 = vmax.f32 %v6560_v20, %v7151_v22 }
 0x5d8   : > { %v6535_v9 = vcombine.high %v6533_v56, %v6533_v56  ;;  %v7144_v5 = vrot.slane %v6534_v51, 9  ;;  %v7145_v19 = vrot.slane %v6533_v56, 9  ;;  %v6731_v24 = vmax.f32 %v6526_v60, %v7143_v32 }
 0x5d9   : > { %v6584_v2 = vrot.slane %v6570_v37, %v10971_v25  ;;  %v7154_v4 = vrot.slane %v6569_v38, 9  ;;  %v6740_v58 = vmax.f32 %v6568_v3, %v7152_v48  ;;  %v6741_v35 = vmax.f32 %v6567_v43, %v7153_v29 }
 0x5da   : > { %v6585_v55 = vcombine.high %v6577_v53, %v6577_v53  ;;  %v7146_v12 = vrot.slane %v6535_v9, 9  ;;  %v7155_v45 = vrot.slane %v6577_v53, 9  ;;  %v6732_v1 = vmax.f32 %v6534_v51, %v7144_v5 }
 0x5db   : > { %v6586_v17 = vcombine.high %v6584_v2, %v6584_v2  ;;  %v7157_v33 = vrot.slane %v6584_v2, 9  ;;  %v6536_v49 = vcombine.high %v6440_v42, %v6440_v42  ;;  %v6543_v40 = vrot.slane %v6440_v42, %v10971_v25 }
 0x5dc   : > { %v7156_v8 = vrot.slane %v6585_v55, 9  ;;  %v6733_v11 = vmax.f32 %v6533_v56, %v7145_v19  ;;  %v6743_v13 = vmax.f32 %v6577_v53, %v7155_v45  ;;  %v6742_v14 = vmax.f32 %v6569_v38, %v7154_v4 }
 0x5dd   : > { %v7158_v27 = vrot.slane %v6586_v17, 9  ;;  %v6745_v31 = vmax.f32 %v6584_v2, %v7157_v33  ;;  %v6550_v59 = vrot.slane %v6536_v49, %v10971_v25  ;;  %v6551_v39 = vcombine.high %v6543_v40, %v6543_v40 }
 0x5de   : > { %v6744_v18 = vmax.f32 %v6585_v55, %v7156_v8  ;;  %v7147_v6 = vrot.slane %v6543_v40, 9  ;;  %v6759_v57 = vmax.f32 %v6739_v44, %v6743_v13  ;;  %v6734_v7 = vmax.f32 %v6535_v9, %v7146_v12 }
 0x5df   : > { %v6746_v21 = vmax.f32 %v6586_v17, %v7158_v27  ;;  %v6761_v28 = vmax.f32 %v6741_v35, %v6745_v31  ;;  %v6552_v54 = vcombine.high %v6550_v59, %v6550_v59  ;;  %v7148_v46 = vrot.slane %v6551_v39, 9 }
 0x5e0   : > { %v6760_v36 = vmax.f32 %v6740_v58, %v6744_v18  ;;  %v7149_v34 = vrot.slane %v6550_v59, 9  ;;  %v6830_v63 = vrot.slane %v6759_v57, %v10978_v47  ;;  %v6735_v15 = vmax.f32 %v6543_v40, %v7147_v6 }
 0x5e1   : > { %v6762_v10 = vmax.f32 %v6742_v14, %v6746_v21  ;;  %v6838_v41 = vrot.slane %v6761_v28, %v10978_v47  ;;  %v7150_v16 = vrot.slane %v6552_v54, 9  ;;  %v6736_v25 = vmax.f32 %v6551_v39, %v7148_v46 }
 0x5e2   : > { %v6834_v23 = vrot.slane %v6760_v36, %v10978_v47  ;;  %v6737_v50 = vmax.f32 %v6550_v59, %v7149_v34  ;;  %v6755_v61 = vmax.f32 %v6731_v24, %v6735_v15 }
 0x5e3   : > { %v6842_v0 = vrot.slane %v6762_v10, %v10978_v47  ;;  %v6738_v20 = vmax.f32 %v6552_v54, %v7150_v16  ;;  %v6756_v30 = vmax.f32 %v6732_v1, %v6736_v25 }
 0x5e4   : > { %v6852_v52 = vsel %vm5835_vm5, %v6834_v23, %v6830_v63  ;;  %v6757_v26 = vmax.f32 %v6733_v11, %v6737_v50  ;;  %v6814_v62 = vrot.slane %v6755_v61, %v10978_v47 }
 0x5e5   : > { %v6853_v60 = vsel %vm5837_vm7, %v6838_v41, %v6852_v52  ;;  %v6758_v3 = vmax.f32 %v6734_v7, %v6738_v20  ;;  %v6818_v22 = vrot.slane %v6756_v30, %v10978_v47 }
 0x5e6   : > { %v6854_v43 = vsel %vm5839_vm9, %v6842_v0, %v6853_v60  ;;  %v6822_v37 = vrot.slane %v6757_v26, %v10978_v47 }
 0x5e7   : > { %6863 = vst.msk [vmem:[%s11441_s22 + $0xc] sm:$0xf] %vm6859_vm6, %v6854_v43  ;;  %v6826_v56 = vrot.slane %v6758_v3, %v10978_v47  ;;  %v6849_v51 = vsel %vm5835_vm5, %v6818_v22, %v6814_v62 }
 0x5e8   : > { %v6850_v32 = vsel %vm5837_vm7, %v6822_v37, %v6849_v51 }
 0x5e9   : > { %v6851_v53 = vsel %vm5839_vm9, %v6826_v56, %v6850_v32 }
 0x5ea   : > { %6862 = vst.msk [vmem:[%s11441_s22 + $0x8] sm:$0xf] %vm6859_vm6, %v6851_v53 }
 0x5eb   : > { %8854 = shalt.err (!%p8851_p3)
}
 0x5ec   : > { %s8855_s15 = scalar_lea.hbm %s11483_s14, 256  ;;  %s8859_s29 = scalar_lea.hbm %s11543_s7, 512 }
 0x5ed   : > { %p8856_p4 = scmp.ne.s32.totalorder %s11483_s14, %s8855_s15  ;;  %p8860_p9 = scmp.lt.u32.totalorder %s11483_s14, %s11543_s7 }
 0x5ee   : > { %p8861_p10 = scmp.lt.u32.totalorder %s8859_s29, %s8855_s15  ;;  %p8863_p12 = scmp.lt.u32.totalorder %s8855_s15, %s11483_s14 }
 0x5ef   : > { %p8857_p7 = pnand %p8856_p4, %p8998_p5 }
 0x5f0   : > { %p8862_p11 = por %p8861_p10, %p8860_p9 }
 0x5f1   : > { %p8858_p8 = pneg %p8857_p7 }
 0x5f2   : > { %p8864_p13 = por %p8863_p12, %p8862_p11 }
 0x5f4   : > { %p8865_p0 = pnand %p8864_p13, %p8858_p8 }
 0x5f6   : > { %8868 = shalt.err (!%p8865_p0)
}
 0x5f7   : > { %7316 = dma.vmem_to_hbm [thread:$0]  (%p8998_p5), %s11485_s9, 256, %s11483_s14, %s11492_s28, %s8916_s8, %s8916_s8, %s8906_s18  }
 0x5f8 PF: > { %p7322_p1 = scmp.ge.s32.totalorder %s8903_s27, 2  ;;  %s6893_s16 = sand.u32 1, %s8891_s24  }
 0x5f9   : > { %s6894_s20 = scalar_lea.sflag [#allocation6], %s6893_s16 }
 0x5fa   : > { %p7319_p2 = pnand %p7322_p1, %p9002_p6 }
 0x5fc   : > { %8886 = dma.done.wait (!%p7319_p2), %s6894_s20, 256  }
 0x5fd   : > { %8888 = vsyncadd (!%p7319_p2), %s6894_s20, 4294967040  ;;  %p17_p3 = scmp.ge.s32.totalorder %s8985_s30, 4   ;;  %s11635_s24 = smov %s8895_s25 }
 0x5fe   : > { %s11636_s25 = smov %s8899_s26  ;;  %s11637_s26 = smov %s8996_s10 }
 0x5ff   : > { %s11638_s27 = smov %s8985_s30  ;;  %19 = sbr.rel (!%p17_p3) target bundleno = 3 (0x3), region = 92 }
 0x606   :  { %6899 = vsyncpa [#allocation6], 1 }
 0x607   :  { %6901 = vsyncpa [#allocation6 + $0x1], 1 }

</bundles_post_ra>
